<compile_context>
chip_gen: v7x
topology: tpu7x:2x2x1
jax: 0.10.0
libtpu: 0.0.40
codegen_flags: <defaults>
</compile_context>

<pallas_src>
import functools

import jax
import jax.numpy as jnp
from jax import lax
from jax.experimental import pallas as pl
from jax.experimental.pallas import tpu as pltpu

BN_EPS = 1e-5
LANE = 128
SUBLANE = 8


def _round_up(x, m):
    return (x + m - 1) // m * m


# --------------------------------------------------------------------------------------
# In-kernel helpers (shared by both phases)
# --------------------------------------------------------------------------------------
def _fetch_x_window(x_hbm, xbuf, sem, *, tile_h):
    """Manually DMA the overlapping (tile_h+2)-row window for grid step (n, h) into the
    double-buffered VMEM scratch, prefetching the next h window. Returns the slot."""
    n = pl.program_id(0)
    h = pl.program_id(1)
    slot = lax.rem(h, 2)

    def window(hh):
        return x_hbm.at[n, pl.ds(hh * tile_h, tile_h + 2)]

    @pl.when(h == 0)                               # prime the pipeline for this image
    def _():
        pltpu.make_async_copy(window(0), xbuf.at[0], sem.at[0]).start()

    @pl.when(h + 1 < pl.num_programs(1))           # prefetch the next row window
    def _():
        pltpu.make_async_copy(window(h + 1), xbuf.at[1 - slot], sem.at[1 - slot]).start()

    pltpu.make_async_copy(window(h), xbuf.at[slot], sem.at[slot]).wait()
    return slot


def _depthwise_3x3(xwin, dw_ref, *, tile_h, W, cp_in):
    """3x3 depthwise conv on the haloed window view (tile_h+2, Wp, cp_in) -> f32
    (tile_h, W, cp_in). The 3 dx-shifted views are materialized once (3 relayouts) and
    their dy slices are sublane-aligned because W % 8 == 0."""
    # TODO(synk): on v6e/v7x, if the VALU is the binding slot, fold the depthwise into
    #             the MXU (9 matmuls with per-tap weights dw[k][:,None]*pw); keep this
    #             VPU path on v5e.
    cols = [xwin[:, dx:dx + W, :].astype(jnp.float32) for dx in range(3)]
    acc = cols[0][0:tile_h] * dw_ref[0:1, :].reshape(1, 1, cp_in)
    for k in range(1, 9):
        dy, dx = divmod(k, 3)
        acc = acc + cols[dx][dy:dy + tile_h] * dw_ref[k:k + 1, :].reshape(1, 1, cp_in)
    return acc


# --------------------------------------------------------------------------------------
# Phase 1: depthwise + pointwise, emit per-tile per-channel [sum, sum-of-squares]
# --------------------------------------------------------------------------------------
def _stats_kernel(x_hbm, dw_ref, pw_ref, stats_ref, xbuf, sem, *, tile_h, W, cp_in):
    slot = _fetch_x_window(x_hbm, xbuf, sem, tile_h=tile_h)
    acc = _depthwise_3x3(xbuf.at[slot], dw_ref, tile_h=tile_h, W=W, cp_in=cp_in)
    # 1x1 pointwise on the MXU; reshape is layout-preserving because W % 8 == 0.
    y = jnp.dot(acc.reshape(tile_h * W, cp_in), pw_ref[...],
                preferred_element_type=jnp.float32)
    stats_ref[...] = jnp.concatenate(
        [jnp.sum(y, axis=0, keepdims=True),
         jnp.sum(y * y, axis=0, keepdims=True)], axis=0)


# --------------------------------------------------------------------------------------
# Phase 2: recompute depthwise + (BN-scale-folded) pointwise, add shift, ReLU, and store
# channel-major so only the real output channels hit HBM.
# --------------------------------------------------------------------------------------
def _out_kernel(x_hbm, dw_ref, pws_ref, shift_ref, o_ref, xbuf, sem,
                *, tile_h, W, cp_in, coutp8):
    slot = _fetch_x_window(x_hbm, xbuf, sem, tile_h=tile_h)
    acc = _depthwise_3x3(xbuf.at[slot], dw_ref, tile_h=tile_h, W=W, cp_in=cp_in)
    y = jnp.dot(acc.reshape(tile_h * W, cp_in), pws_ref[...],
                preferred_element_type=jnp.float32)          # BN scale folded into pws
    yt = jnp.transpose(y, (1, 0))[:coutp8, :]                # channel-major, unpadded rows
    o_ref[...] = jnp.maximum(yt + shift_ref[...], 0.0)       # BN shift + ReLU


# --------------------------------------------------------------------------------------
# Wrapper
# --------------------------------------------------------------------------------------
def _budgets():
    """(per-step tile budget, vmem_limit_bytes), generation aware."""
    phys = 128 * 1024 * 1024
    try:
        info = pltpu.get_tpu_info()
        phys = int(getattr(info, "vmem_capacity_bytes", phys))
    except Exception:
        pass
    if phys <= 64 * 1024 * 1024:            # v7x-class parts (64 MiB physical VMEM)
        return 10 * 1024 * 1024, 32 * 1024 * 1024
    return 24 * 1024 * 1024, 64 * 1024 * 1024   # v5e / v6e (128 MiB physical)


def _pick_tile_h(H, W, Wp, cp_in, cp_out, coutp8, budget_bytes):
    def need(th):
        thw = th * W
        return (2 * (th + 2) * Wp * cp_in * 2       # double-buffered bf16 input window
                + 3 * (th + 2) * W * cp_in * 4      # dx-shifted f32 views
                + th * W * cp_in * 4                # depthwise accumulator
                + 2 * thw * cp_out * 4              # matmul result + transpose temp
                + 2 * 2 * coutp8 * thw * 4)         # double-buffered output block

    cands = [th for th in range(1, H + 1)
             if H % th == 0 and (th == H or (th * W) % LANE == 0)]
    fitting = [th for th in cands if need(th) <= budget_bytes]
    return max(fitting) if fitting else min(cands)


@functools.partial(jax.jit, static_argnames=("tile_h",))
def depthwise_separable_conv(x_nchw, dw_hwc, pw_io, gamma, beta, *, tile_h=None):
    """x_nchw: (N, Cin, H, W) -> (N, Cout, H, W), matching the PyTorch module forward."""
    N, Cin, H, W = x_nchw.shape
    Cout = pw_io.shape[1]
    # TODO(synk): support W not a multiple of 8 (needs masked BN stats over padded columns).
    assert W % SUBLANE == 0, "W must be a multiple of 8"

    cp_in = _round_up(Cin, LANE)
    cp_out = _round_up(Cout, LANE)
    coutp8 = _round_up(Cout, SUBLANE)
    Wp = _round_up(W + 2, SUBLANE)

    tile_budget, vmem_limit = _budgets()
    if tile_h is None:
        tile_h = _pick_tile_h(H, W, Wp, cp_in, cp_out, coutp8, tile_budget)
    assert H % tile_h == 0 and (tile_h == H or (tile_h * W) % LANE == 0)
    n_h = H // tile_h
    thw = tile_h * W

    # ---- single glue pass: NCHW -> NHWC, bf16, pad (spatial halo + sublane width + lanes)
    # TODO(synk): for Cin << 128 a width-on-lanes layout would avoid the channel-pad
    #             inflation of the staged input; channels-on-lanes kept for the MXU pointwise.
    x = jnp.transpose(x_nchw, (0, 2, 3, 1)).astype(jnp.bfloat16)
    x = jnp.pad(x, ((0, 0), (1, 1), (1, Wp - W - 1), (0, cp_in - Cin)))
    # x: (N, H+2, Wp, cp_in) bf16, resident once in HBM and read by both phases.

    dw = jnp.pad(dw_hwc.astype(jnp.float32),
                 ((0, 0), (0, 0), (0, cp_in - Cin))).reshape(9, cp_in)
    pw = jnp.pad(pw_io.astype(jnp.float32),
                 ((0, cp_in - Cin), (0, cp_out - Cout)))
    gamma_p = jnp.pad(gamma.astype(jnp.float32), (0, cp_out - Cout))
    beta_p = jnp.pad(beta.astype(jnp.float32), (0, cp_out - Cout))

    compiler_params = pltpu.CompilerParams(
        dimension_semantics=("parallel", "arbitrary"),   # batch across cores, h sequential
        vmem_limit_bytes=vmem_limit,
    )
    scratch = [pltpu.VMEM((2, tile_h + 2, Wp, cp_in), jnp.bfloat16),
               pltpu.SemaphoreType.DMA((2,))]

    pix = N * H * W
    conv_flops = pix * (2 * 9 * cp_in + 2 * cp_in * cp_out)
    x_bytes = N * n_h * (tile_h + 2) * Wp * cp_in * 2

    # ---------------- phase 1: per-tile per-channel sum / sumsq of the pre-BN output ------
    stats = pl.pallas_call(
        functools.partial(_stats_kernel, tile_h=tile_h, W=W, cp_in=cp_in),
        grid=(N, n_h),
        in_specs=[
            pl.BlockSpec(memory_space=pl.ANY),                        # x stays in HBM
            pl.BlockSpec((9, cp_in), lambda n, h: (0, 0)),
            pl.BlockSpec((cp_in, cp_out), lambda n, h: (0, 0)),
        ],
        out_specs=pl.BlockSpec((None, None, 2, cp_out), lambda n, h: (n, h, 0, 0)),
        out_shape=jax.ShapeDtypeStruct((N, n_h, 2, cp_out), jnp.float32),
        scratch_shapes=scratch,
        compiler_params=compiler_params,
        cost_estimate=pl.CostEstimate(
            flops=conv_flops + 3 * pix * cp_out, transcendentals=0,
            bytes_accessed=x_bytes + (9 * cp_in + cp_in * cp_out) * 4
                           + N * n_h * 2 * cp_out * 4),
    )(x, dw, pw)

    # ---------------- tiny O(C) BN fold (training-mode biased variance), two-level combine -
    cnt_t = jnp.float32(thw)
    total = jnp.float32(pix)
    sum_t, sumsq_t = stats[:, :, 0, :], stats[:, :, 1, :]
    mean_t = sum_t / cnt_t
    mean = jnp.sum(sum_t, axis=(0, 1)) / total
    m2_t = sumsq_t - cnt_t * mean_t * mean_t
    var = (jnp.sum(m2_t, axis=(0, 1))
           + cnt_t * jnp.sum((mean_t - mean[None, None, :]) ** 2, axis=(0, 1))) / total
    inv_std = lax.rsqrt(jnp.maximum(var, 0.0) + BN_EPS)
    scale = gamma_p * inv_std                               # (cp_out,)
    pw_scaled = pw * scale[None, :]                         # fold BN scale into pointwise
    shift_col = (beta_p - mean * scale)[:coutp8].reshape(coutp8, 1)

    # ---------------- phase 2: recompute dw+pw, apply folded BN + ReLU, channel-major out --
    out = pl.pallas_call(
        functools.partial(_out_kernel, tile_h=tile_h, W=W, cp_in=cp_in, coutp8=coutp8),
        grid=(N, n_h),
        in_specs=[
            pl.BlockSpec(memory_space=pl.ANY),
            pl.BlockSpec((9, cp_in), lambda n, h: (0, 0)),
            pl.BlockSpec((cp_in, cp_out), lambda n, h: (0, 0)),
            pl.BlockSpec((coutp8, 1), lambda n, h: (0, 0)),
        ],
        out_specs=pl.BlockSpec((None, coutp8, thw), lambda n, h: (n, 0, h)),
        out_shape=jax.ShapeDtypeStruct((N, coutp8, H * W), jnp.float32),
        scratch_shapes=scratch,
        compiler_params=compiler_params,
        cost_estimate=pl.CostEstimate(
            flops=conv_flops + 2 * pix * coutp8, transcendentals=0,
            bytes_accessed=x_bytes + (9 * cp_in + cp_in * cp_out + coutp8) * 4
                           + N * coutp8 * H * W * 4),
    )(x, dw, pw_scaled, shift_col)

    # channel-major result already matches NCHW: free reshape + drop channel padding rows.
    return out.reshape(N, coutp8, H, W)[:, :Cout]


# --------------------------------------------------------------------------------------
# Pure-JAX reference (validates the Pallas kernels)
# --------------------------------------------------------------------------------------
def _reference(x_nchw, dw_hwc, pw_io, gamma, beta):
    Cin = x_nchw.shape[1]
    Cout = pw_io.shape[1]
    w_depth = jnp.transpose(dw_hwc, (2, 0, 1))[:, None, :, :]          # (Cin,1,3,3)
    y = lax.conv_general_dilated(
        x_nchw, w_depth, window_strides=(1, 1), padding=((1, 1), (1, 1)),
        dimension_numbers=("NCHW", "OIHW", "NCHW"), feature_group_count=Cin)
    w_point = jnp.transpose(pw_io, (1, 0))[:, :, None, None]           # (Cout,Cin,1,1)
    y = lax.conv_general_dilated(
        y, w_point, window_strides=(1, 1), padding=((0, 0), (0, 0)),
        dimension_numbers=("NCHW", "OIHW", "NCHW"))
    mean = jnp.mean(y, axis=(0, 2, 3), keepdims=True)
    var = jnp.mean((y - mean) ** 2, axis=(0, 2, 3), keepdims=True)
    y = (y - mean) * lax.rsqrt(var + BN_EPS)
    y = y * gamma.reshape(1, Cout, 1, 1) + beta.reshape(1, Cout, 1, 1)
    return jnp.maximum(y, 0.0)


if __name__ == "__main__":
    N, Cin, H, W = 2, 4, 16, 16
    Cout = 8

    key = jax.random.PRNGKey(0)
    kx, kd, kp, kg, kb = jax.random.split(key, 5)

    x = jax.random.normal(kx, (N, Cin, H, W), jnp.float32)
    # depthwise weights stored as (kh, kw, Cin)  (PyTorch: (Cin, 1, 3, 3))
    dw = jax.random.normal(kd, (3, 3, Cin), jnp.float32) * 0.2
    # pointwise weights stored as (Cin, Cout)    (PyTorch: (Cout, Cin, 1, 1))
    pw = jax.random.normal(kp, (Cin, Cout), jnp.float32) * 0.2
    gamma = 1.0 + 0.1 * jax.random.normal(kg, (Cout,), jnp.float32)
    beta = 0.1 * jax.random.normal(kb, (Cout,), jnp.float32)

    # tile_h=8 -> grid (2, 2): exercises the row tiling + manual halo-window prefetch path.
    out = depthwise_separable_conv(x, dw, pw, gamma, beta, tile_h=8)
    out = jax.block_until_ready(out)

    # The kernel stages x in bf16 by design; compare against a reference computed on the
    # same bf16-rounded input so the check isolates kernel correctness.
    x_staged = x.astype(jnp.bfloat16).astype(jnp.float32)
    ref = jax.block_until_ready(_reference(x_staged, dw, pw, gamma, beta))

    assert out.shape == (N, Cout, H, W)
    assert jnp.allclose(out, ref, atol=2e-3, rtol=2e-3), "Pallas kernel mismatch vs reference"

    print("KERNEL_OK")
</pallas_src>

<mosaic_0001>
module attributes {stable_mosaic.version = 11 : i64} {
  func.func @_stats_kernel(%arg0: i32, %arg1: i32, %arg2: memref<2x18x24x128xbf16, #tpu.memory_space<any>>, %arg3: memref<9x128xf32, #tpu.memory_space<vmem>>, %arg4: memref<128x128xf32, #tpu.memory_space<vmem>>, %arg5: memref<1x1x2x128xf32, #tpu.memory_space<vmem>>, %arg6: memref<2x10x24x128xbf16, #tpu.memory_space<vmem>>, %arg7: memref<2x!tpu.dma_semaphore, #tpu.memory_space<semaphore_mem>>) attributes {dimension_semantics = [#tpu.dimension_semantics<parallel>, #tpu.dimension_semantics<arbitrary>], iteration_bounds = array<i64: 2, 2>, scalar_prefetch = 0 : i64, scratch_operands = 2 : i64, tpu.core_type = #tpu.core_type<tc>, window_params = [{}, {pipeline_mode = #tpu.pipeline_mode<synchronous>, transform_indices = @transform_1, window_bounds = array<i64: 9, 128>}, {pipeline_mode = #tpu.pipeline_mode<synchronous>, transform_indices = @transform_2, window_bounds = array<i64: 128, 128>}, {transform_indices = @transform_3, window_bounds = array<i64: 1, 1, 2, 128>}]} {
    %c2_i32 = arith.constant 2 : i32
    %0 = arith.remsi %arg1, %c2_i32 : i32
    %c0_i32 = arith.constant 0 : i32
    %1 = arith.cmpi eq, %arg1, %c0_i32 : i32
    %2 = arith.extui %1 : i1 to i32
    %c0_i32_0 = arith.constant 0 : i32
    %3 = arith.cmpi ne, %2, %c0_i32_0 : i32
    scf.if %3 {
      %c0_i32_43 = arith.constant 0 : i32
      %c0_i32_44 = arith.constant 0 : i32
      %c0_i32_45 = arith.constant 0 : i32
      %c0_i32_46 = arith.constant 0 : i32
      %c0_i32_47 = arith.constant 0 : i32
      %92 = tpu.memref_slice %arg2[%arg0, %c0_i32_45, %c0_i32_46, %c0_i32_47] : memref<2x18x24x128xbf16, #tpu.memory_space<any>> -> memref<1x10x24x128xbf16, #tpu.memory_space<any>>
      %93 = tpu.memref_squeeze %92 : memref<1x10x24x128xbf16, #tpu.memory_space<any>> -> memref<10x24x128xbf16, #tpu.memory_space<any>>
      %c0_i32_48 = arith.constant 0 : i32
      %c0_i32_49 = arith.constant 0 : i32
      %c0_i32_50 = arith.constant 0 : i32
      %94 = tpu.memref_slice %arg6[%c0_i32_43, %c0_i32_48, %c0_i32_49, %c0_i32_50] : memref<2x10x24x128xbf16, #tpu.memory_space<vmem>> -> memref<1x10x24x128xbf16, #tpu.memory_space<vmem>>
      %95 = tpu.memref_squeeze %94 : memref<1x10x24x128xbf16, #tpu.memory_space<vmem>> -> memref<10x24x128xbf16, #tpu.memory_space<vmem>>
      %96 = tpu.memref_slice %arg7[%c0_i32_44] : memref<2x!tpu.dma_semaphore, #tpu.memory_space<semaphore_mem>> -> memref<1x!tpu.dma_semaphore, #tpu.memory_space<semaphore_mem>>
      %97 = tpu.memref_squeeze %96 : memref<1x!tpu.dma_semaphore, #tpu.memory_space<semaphore_mem>> -> memref<!tpu.dma_semaphore, #tpu.memory_space<semaphore_mem>>
      tpu.enqueue_dma source(%93 : memref<10x24x128xbf16, #tpu.memory_space<any>>) target(%95 : memref<10x24x128xbf16, #tpu.memory_space<vmem>>) target_semaphore(%97 : memref<!tpu.dma_semaphore, #tpu.memory_space<semaphore_mem>>)
    } else {
    }
    %c1_i32 = arith.constant 1 : i32
    %4 = arith.addi %arg1, %c1_i32 : i32
    %c2_i32_1 = arith.constant 2 : i32
    %5 = arith.cmpi slt, %4, %c2_i32_1 : i32
    %6 = arith.extui %5 : i1 to i32
    %c0_i32_2 = arith.constant 0 : i32
    %7 = arith.cmpi ne, %6, %c0_i32_2 : i32
    scf.if %7 {
      %c1_i32_43 = arith.constant 1 : i32
      %92 = arith.addi %arg1, %c1_i32_43 : i32
      %c8_i32_44 = arith.constant 8 : i32
      %93 = arith.muli %92, %c8_i32_44 : i32
      %c1_i32_45 = arith.constant 1 : i32
      %94 = arith.subi %c1_i32_45, %0 : i32
      %c1_i32_46 = arith.constant 1 : i32
      %95 = arith.subi %c1_i32_46, %0 : i32
      %c0_i32_47 = arith.constant 0 : i32
      %c0_i32_48 = arith.constant 0 : i32
      %96 = tpu.memref_slice %arg2[%arg0, %93, %c0_i32_47, %c0_i32_48] : memref<2x18x24x128xbf16, #tpu.memory_space<any>> -> memref<1x10x24x128xbf16, #tpu.memory_space<any>>
      %97 = tpu.memref_squeeze %96 : memref<1x10x24x128xbf16, #tpu.memory_space<any>> -> memref<10x24x128xbf16, #tpu.memory_space<any>>
      %c0_i32_49 = arith.constant 0 : i32
      %c0_i32_50 = arith.constant 0 : i32
      %c0_i32_51 = arith.constant 0 : i32
      %98 = tpu.memref_slice %arg6[%94, %c0_i32_49, %c0_i32_50, %c0_i32_51] : memref<2x10x24x128xbf16, #tpu.memory_space<vmem>> -> memref<1x10x24x128xbf16, #tpu.memory_space<vmem>>
      %99 = tpu.memref_squeeze %98 : memref<1x10x24x128xbf16, #tpu.memory_space<vmem>> -> memref<10x24x128xbf16, #tpu.memory_space<vmem>>
      %100 = tpu.memref_slice %arg7[%95] : memref<2x!tpu.dma_semaphore, #tpu.memory_space<semaphore_mem>> -> memref<1x!tpu.dma_semaphore, #tpu.memory_space<semaphore_mem>>
      %101 = tpu.memref_squeeze %100 : memref<1x!tpu.dma_semaphore, #tpu.memory_space<semaphore_mem>> -> memref<!tpu.dma_semaphore, #tpu.memory_space<semaphore_mem>>
      tpu.enqueue_dma source(%97 : memref<10x24x128xbf16, #tpu.memory_space<any>>) target(%99 : memref<10x24x128xbf16, #tpu.memory_space<vmem>>) target_semaphore(%101 : memref<!tpu.dma_semaphore, #tpu.memory_space<semaphore_mem>>)
    } else {
    }
    %c8_i32 = arith.constant 8 : i32
    %8 = arith.muli %arg1, %c8_i32 : i32
    %c0_i32_3 = arith.constant 0 : i32
    %c0_i32_4 = arith.constant 0 : i32
    %9 = tpu.memref_slice %arg2[%arg0, %8, %c0_i32_3, %c0_i32_4] : memref<2x18x24x128xbf16, #tpu.memory_space<any>> -> memref<1x10x24x128xbf16, #tpu.memory_space<any>>
    %10 = tpu.memref_squeeze %9 : memref<1x10x24x128xbf16, #tpu.memory_space<any>> -> memref<10x24x128xbf16, #tpu.memory_space<any>>
    %c0_i32_5 = arith.constant 0 : i32
    %c0_i32_6 = arith.constant 0 : i32
    %c0_i32_7 = arith.constant 0 : i32
    %11 = tpu.memref_slice %arg6[%0, %c0_i32_5, %c0_i32_6, %c0_i32_7] : memref<2x10x24x128xbf16, #tpu.memory_space<vmem>> -> memref<1x10x24x128xbf16, #tpu.memory_space<vmem>>
    %12 = tpu.memref_squeeze %11 : memref<1x10x24x128xbf16, #tpu.memory_space<vmem>> -> memref<10x24x128xbf16, #tpu.memory_space<vmem>>
    %13 = tpu.memref_slice %arg7[%0] : memref<2x!tpu.dma_semaphore, #tpu.memory_space<semaphore_mem>> -> memref<1x!tpu.dma_semaphore, #tpu.memory_space<semaphore_mem>>
    %14 = tpu.memref_squeeze %13 : memref<1x!tpu.dma_semaphore, #tpu.memory_space<semaphore_mem>> -> memref<!tpu.dma_semaphore, #tpu.memory_space<semaphore_mem>>
    tpu.wait_dma2 semaphore(%14 : memref<!tpu.dma_semaphore, #tpu.memory_space<semaphore_mem>>) src(%10 : memref<10x24x128xbf16, #tpu.memory_space<any>>) dst(%12 : memref<10x24x128xbf16, #tpu.memory_space<vmem>>)
    %c0_i32_8 = arith.constant 0 : i32
    %c0_i32_9 = arith.constant 0 : i32
    %c0_i32_10 = arith.constant 0 : i32
    %15 = tpu.memref_slice %arg6[%0, %c0_i32_8, %c0_i32_9, %c0_i32_10] : memref<2x10x24x128xbf16, #tpu.memory_space<vmem>> -> memref<1x10x24x128xbf16, #tpu.memory_space<vmem>>
    %16 = tpu.memref_squeeze %15 : memref<1x10x24x128xbf16, #tpu.memory_space<vmem>> -> memref<10x24x128xbf16, #tpu.memory_space<vmem>>
    %c0 = arith.constant 0 : index
    %c0_11 = arith.constant 0 : index
    %c0_12 = arith.constant 0 : index
    %17 = vector.load %16[%c0, %c0_11, %c0_12] : memref<10x24x128xbf16, #tpu.memory_space<vmem>>, vector<10x16x128xbf16>
    %18 = arith.extf %17 : vector<10x16x128xbf16> to vector<10x16x128xf32>
    %c0_i32_13 = arith.constant 0 : i32
    %c0_i32_14 = arith.constant 0 : i32
    %c0_i32_15 = arith.constant 0 : i32
    %19 = tpu.memref_slice %arg6[%0, %c0_i32_13, %c0_i32_14, %c0_i32_15] : memref<2x10x24x128xbf16, #tpu.memory_space<vmem>> -> memref<1x10x24x128xbf16, #tpu.memory_space<vmem>>
    %20 = tpu.memref_squeeze %19 : memref<1x10x24x128xbf16, #tpu.memory_space<vmem>> -> memref<10x24x128xbf16, #tpu.memory_space<vmem>>
    %c0_16 = arith.constant 0 : index
    %c1 = arith.constant 1 : index
    %c0_17 = arith.constant 0 : index
    %21 = vector.load %20[%c0_16, %c1, %c0_17] : memref<10x24x128xbf16, #tpu.memory_space<vmem>>, vector<10x16x128xbf16>
    %22 = arith.extf %21 : vector<10x16x128xbf16> to vector<10x16x128xf32>
    %c0_i32_18 = arith.constant 0 : i32
    %c0_i32_19 = arith.constant 0 : i32
    %c0_i32_20 = arith.constant 0 : i32
    %23 = tpu.memref_slice %arg6[%0, %c0_i32_18, %c0_i32_19, %c0_i32_20] : memref<2x10x24x128xbf16, #tpu.memory_space<vmem>> -> memref<1x10x24x128xbf16, #tpu.memory_space<vmem>>
    %24 = tpu.memref_squeeze %23 : memref<1x10x24x128xbf16, #tpu.memory_space<vmem>> -> memref<10x24x128xbf16, #tpu.memory_space<vmem>>
    %c0_21 = arith.constant 0 : index
    %c2 = arith.constant 2 : index
    %c0_22 = arith.constant 0 : index
    %25 = vector.load %24[%c0_21, %c2, %c0_22] : memref<10x24x128xbf16, #tpu.memory_space<vmem>>, vector<10x16x128xbf16>
    %26 = arith.extf %25 : vector<10x16x128xbf16> to vector<10x16x128xf32>
    %27 = vector.extract_strided_slice %18 {offsets = [0, 0, 0], sizes = [8, 16, 128], strides = [1, 1, 1]} : vector<10x16x128xf32> to vector<8x16x128xf32>
    %c0_23 = arith.constant 0 : index
    %c0_24 = arith.constant 0 : index
    %28 = vector.load %arg3[%c0_23, %c0_24] : memref<9x128xf32, #tpu.memory_space<vmem>>, vector<1x128xf32>
    %29 = vector.shape_cast %28 : vector<1x128xf32> to vector<1x1x128xf32>
    %30 = vector.broadcast %29 : vector<1x1x128xf32> to vector<8x16x128xf32>
    %31 = arith.mulf %27, %30 : vector<8x16x128xf32>
    %32 = vector.extract_strided_slice %22 {offsets = [0, 0, 0], sizes = [8, 16, 128], strides = [1, 1, 1]} : vector<10x16x128xf32> to vector<8x16x128xf32>
    %c1_25 = arith.constant 1 : index
    %c0_26 = arith.constant 0 : index
    %33 = vector.load %arg3[%c1_25, %c0_26] : memref<9x128xf32, #tpu.memory_space<vmem>>, vector<1x128xf32>
    %34 = vector.shape_cast %33 : vector<1x128xf32> to vector<1x1x128xf32>
    %35 = vector.broadcast %34 : vector<1x1x128xf32> to vector<8x16x128xf32>
    %36 = arith.mulf %32, %35 : vector<8x16x128xf32>
    %37 = arith.addf %31, %36 : vector<8x16x128xf32>
    %38 = vector.extract_strided_slice %26 {offsets = [0, 0, 0], sizes = [8, 16, 128], strides = [1, 1, 1]} : vector<10x16x128xf32> to vector<8x16x128xf32>
    %c2_27 = arith.constant 2 : index
    %c0_28 = arith.constant 0 : index
    %39 = vector.load %arg3[%c2_27, %c0_28] : memref<9x128xf32, #tpu.memory_space<vmem>>, vector<1x128xf32>
    %40 = vector.shape_cast %39 : vector<1x128xf32> to vector<1x1x128xf32>
    %41 = vector.broadcast %40 : vector<1x1x128xf32> to vector<8x16x128xf32>
    %42 = arith.mulf %38, %41 : vector<8x16x128xf32>
    %43 = arith.addf %37, %42 : vector<8x16x128xf32>
    %44 = vector.extract_strided_slice %18 {offsets = [1, 0, 0], sizes = [8, 16, 128], strides = [1, 1, 1]} : vector<10x16x128xf32> to vector<8x16x128xf32>
    %c3 = arith.constant 3 : index
    %c0_29 = arith.constant 0 : index
    %45 = vector.load %arg3[%c3, %c0_29] : memref<9x128xf32, #tpu.memory_space<vmem>>, vector<1x128xf32>
    %46 = vector.shape_cast %45 : vector<1x128xf32> to vector<1x1x128xf32>
    %47 = vector.broadcast %46 : vector<1x1x128xf32> to vector<8x16x128xf32>
    %48 = arith.mulf %44, %47 : vector<8x16x128xf32>
    %49 = arith.addf %43, %48 : vector<8x16x128xf32>
    %50 = vector.extract_strided_slice %22 {offsets = [1, 0, 0], sizes = [8, 16, 128], strides = [1, 1, 1]} : vector<10x16x128xf32> to vector<8x16x128xf32>
    %c4 = arith.constant 4 : index
    %c0_30 = arith.constant 0 : index
    %51 = vector.load %arg3[%c4, %c0_30] : memref<9x128xf32, #tpu.memory_space<vmem>>, vector<1x128xf32>
    %52 = vector.shape_cast %51 : vector<1x128xf32> to vector<1x1x128xf32>
    %53 = vector.broadcast %52 : vector<1x1x128xf32> to vector<8x16x128xf32>
    %54 = arith.mulf %50, %53 : vector<8x16x128xf32>
    %55 = arith.addf %49, %54 : vector<8x16x128xf32>
    %56 = vector.extract_strided_slice %26 {offsets = [1, 0, 0], sizes = [8, 16, 128], strides = [1, 1, 1]} : vector<10x16x128xf32> to vector<8x16x128xf32>
    %c5 = arith.constant 5 : index
    %c0_31 = arith.constant 0 : index
    %57 = vector.load %arg3[%c5, %c0_31] : memref<9x128xf32, #tpu.memory_space<vmem>>, vector<1x128xf32>
    %58 = vector.shape_cast %57 : vector<1x128xf32> to vector<1x1x128xf32>
    %59 = vector.broadcast %58 : vector<1x1x128xf32> to vector<8x16x128xf32>
    %60 = arith.mulf %56, %59 : vector<8x16x128xf32>
    %61 = arith.addf %55, %60 : vector<8x16x128xf32>
    %62 = vector.extract_strided_slice %18 {offsets = [2, 0, 0], sizes = [8, 16, 128], strides = [1, 1, 1]} : vector<10x16x128xf32> to vector<8x16x128xf32>
    %c6 = arith.constant 6 : index
    %c0_32 = arith.constant 0 : index
    %63 = vector.load %arg3[%c6, %c0_32] : memref<9x128xf32, #tpu.memory_space<vmem>>, vector<1x128xf32>
    %64 = vector.shape_cast %63 : vector<1x128xf32> to vector<1x1x128xf32>
    %65 = vector.broadcast %64 : vector<1x1x128xf32> to vector<8x16x128xf32>
    %66 = arith.mulf %62, %65 : vector<8x16x128xf32>
    %67 = arith.addf %61, %66 : vector<8x16x128xf32>
    %68 = vector.extract_strided_slice %22 {offsets = [2, 0, 0], sizes = [8, 16, 128], strides = [1, 1, 1]} : vector<10x16x128xf32> to vector<8x16x128xf32>
    %c7 = arith.constant 7 : index
    %c0_33 = arith.constant 0 : index
    %69 = vector.load %arg3[%c7, %c0_33] : memref<9x128xf32, #tpu.memory_space<vmem>>, vector<1x128xf32>
    %70 = vector.shape_cast %69 : vector<1x128xf32> to vector<1x1x128xf32>
    %71 = vector.broadcast %70 : vector<1x1x128xf32> to vector<8x16x128xf32>
    %72 = arith.mulf %68, %71 : vector<8x16x128xf32>
    %73 = arith.addf %67, %72 : vector<8x16x128xf32>
    %74 = vector.extract_strided_slice %26 {offsets = [2, 0, 0], sizes = [8, 16, 128], strides = [1, 1, 1]} : vector<10x16x128xf32> to vector<8x16x128xf32>
    %c8 = arith.constant 8 : index
    %c0_34 = arith.constant 0 : index
    %75 = vector.load %arg3[%c8, %c0_34] : memref<9x128xf32, #tpu.memory_space<vmem>>, vector<1x128xf32>
    %76 = vector.shape_cast %75 : vector<1x128xf32> to vector<1x1x128xf32>
    %77 = vector.broadcast %76 : vector<1x1x128xf32> to vector<8x16x128xf32>
    %78 = arith.mulf %74, %77 : vector<8x16x128xf32>
    %79 = arith.addf %73, %78 : vector<8x16x128xf32>
    %80 = vector.shape_cast %79 : vector<8x16x128xf32> to vector<128x128xf32>
    %c0_35 = arith.constant 0 : index
    %c0_36 = arith.constant 0 : index
    %81 = vector.load %arg4[%c0_35, %c0_36] : memref<128x128xf32, #tpu.memory_space<vmem>>, vector<128x128xf32>
    %cst = arith.constant dense<0.000000e+00> : vector<128x128xf32>
    %82 = tpu.matmul %80, %81, %cst {dimension_numbers = #tpu.dot_dimension_numbers<[1], [0], [0], [1], [0, 0, 1, 1], [], []>} : vector<128x128xf32>, vector<128x128xf32>, vector<128x128xf32> -> vector<128x128xf32>
    %cst_37 = arith.constant dense<0.000000e+00> : vector<128xf32>
    %83 = vector.multi_reduction <add>, %82, %cst_37 [0] : vector<128x128xf32> to vector<128xf32>
    %84 = vector.shape_cast %83 : vector<128xf32> to vector<1x128xf32>
    %85 = arith.mulf %82, %82 : vector<128x128xf32>
    %cst_38 = arith.constant dense<0.000000e+00> : vector<128xf32>
    %86 = vector.multi_reduction <add>, %85, %cst_38 [0] : vector<128x128xf32> to vector<128xf32>
    %87 = vector.shape_cast %86 : vector<128xf32> to vector<1x128xf32>
    %88 = tpu.concatenate %84, %87 in 0 : vector<1x128xf32>, vector<1x128xf32> -> vector<2x128xf32>
    %c0_39 = arith.constant 0 : index
    %c0_40 = arith.constant 0 : index
    %c0_41 = arith.constant 0 : index
    %c0_42 = arith.constant 0 : index
    %89 = vector.load %arg5[%c0_39, %c0_40, %c0_41, %c0_42] : memref<1x1x2x128xf32, #tpu.memory_space<vmem>>, vector<1x1x2x128xf32>
    %90 = vector.shape_cast %89 : vector<1x1x2x128xf32> to vector<2x128xf32>
    %91 = vector.shape_cast %88 : vector<2x128xf32> to vector<1x1x2x128xf32>
    tpu.vector_store %arg5[%c0_39, %c0_40, %c0_41, %c0_42], %91 {strides = array<i32>} : memref<1x1x2x128xf32, #tpu.memory_space<vmem>>, vector<1x1x2x128xf32>,
    return
  }
  func.func @transform_1(%arg0: i32, %arg1: i32) -> (i32, i32) {
    %c0_i32 = arith.constant 0 : i32
    %c0_i32_0 = arith.constant 0 : i32
    %c0_i32_1 = arith.constant 0 : i32
    return %c0_i32, %c0_i32_0 : i32, i32
  }
  func.func @transform_2(%arg0: i32, %arg1: i32) -> (i32, i32) {
    %c0_i32 = arith.constant 0 : i32
    %c0_i32_0 = arith.constant 0 : i32
    %c0_i32_1 = arith.constant 0 : i32
    return %c0_i32, %c0_i32_0 : i32, i32
  }
  func.func @transform_3(%arg0: i32, %arg1: i32) -> (i32, i32, i32, i32) {
    %c0_i32 = arith.constant 0 : i32
    %c0_i32_0 = arith.constant 0 : i32
    %c0_i32_1 = arith.constant 0 : i32
    return %arg0, %arg1, %c0_i32, %c0_i32_0 : i32, i32, i32, i32
  }
}

module attributes {stable_mosaic.version = 11 : i64} {
  func.func @_out_kernel(%arg0: i32, %arg1: i32, %arg2: memref<2x18x24x128xbf16, #tpu.memory_space<any>>, %arg3: memref<9x128xf32, #tpu.memory_space<vmem>>, %arg4: memref<128x128xf32, #tpu.memory_space<vmem>>, %arg5: memref<8x1xf32, #tpu.memory_space<vmem>>, %arg6: memref<1x8x128xf32, #tpu.memory_space<vmem>>, %arg7: memref<2x10x24x128xbf16, #tpu.memory_space<vmem>>, %arg8: memref<2x!tpu.dma_semaphore, #tpu.memory_space<semaphore_mem>>) attributes {dimension_semantics = [#tpu.dimension_semantics<parallel>, #tpu.dimension_semantics<arbitrary>], iteration_bounds = array<i64: 2, 2>, scalar_prefetch = 0 : i64, scratch_operands = 2 : i64, tpu.core_type = #tpu.core_type<tc>, window_params = [{}, {pipeline_mode = #tpu.pipeline_mode<synchronous>, transform_indices = @transform_1, window_bounds = array<i64: 9, 128>}, {pipeline_mode = #tpu.pipeline_mode<synchronous>, transform_indices = @transform_2, window_bounds = array<i64: 128, 128>}, {pipeline_mode = #tpu.pipeline_mode<synchronous>, transform_indices = @transform_3, window_bounds = array<i64: 8, 1>}, {transform_indices = @transform_4, window_bounds = array<i64: 1, 8, 128>}]} {
    %c2_i32 = arith.constant 2 : i32
    %0 = arith.remsi %arg1, %c2_i32 : i32
    %c0_i32 = arith.constant 0 : i32
    %1 = arith.cmpi eq, %arg1, %c0_i32 : i32
    %2 = arith.extui %1 : i1 to i32
    %c0_i32_0 = arith.constant 0 : i32
    %3 = arith.cmpi ne, %2, %c0_i32_0 : i32
    scf.if %3 {
      %c0_i32_43 = arith.constant 0 : i32
      %c0_i32_44 = arith.constant 0 : i32
      %c0_i32_45 = arith.constant 0 : i32
      %c0_i32_46 = arith.constant 0 : i32
      %c0_i32_47 = arith.constant 0 : i32
      %93 = tpu.memref_slice %arg2[%arg0, %c0_i32_45, %c0_i32_46, %c0_i32_47] : memref<2x18x24x128xbf16, #tpu.memory_space<any>> -> memref<1x10x24x128xbf16, #tpu.memory_space<any>>
      %94 = tpu.memref_squeeze %93 : memref<1x10x24x128xbf16, #tpu.memory_space<any>> -> memref<10x24x128xbf16, #tpu.memory_space<any>>
      %c0_i32_48 = arith.constant 0 : i32
      %c0_i32_49 = arith.constant 0 : i32
      %c0_i32_50 = arith.constant 0 : i32
      %95 = tpu.memref_slice %arg7[%c0_i32_43, %c0_i32_48, %c0_i32_49, %c0_i32_50] : memref<2x10x24x128xbf16, #tpu.memory_space<vmem>> -> memref<1x10x24x128xbf16, #tpu.memory_space<vmem>>
      %96 = tpu.memref_squeeze %95 : memref<1x10x24x128xbf16, #tpu.memory_space<vmem>> -> memref<10x24x128xbf16, #tpu.memory_space<vmem>>
      %97 = tpu.memref_slice %arg8[%c0_i32_44] : memref<2x!tpu.dma_semaphore, #tpu.memory_space<semaphore_mem>> -> memref<1x!tpu.dma_semaphore, #tpu.memory_space<semaphore_mem>>
      %98 = tpu.memref_squeeze %97 : memref<1x!tpu.dma_semaphore, #tpu.memory_space<semaphore_mem>> -> memref<!tpu.dma_semaphore, #tpu.memory_space<semaphore_mem>>
      tpu.enqueue_dma source(%94 : memref<10x24x128xbf16, #tpu.memory_space<any>>) target(%96 : memref<10x24x128xbf16, #tpu.memory_space<vmem>>) target_semaphore(%98 : memref<!tpu.dma_semaphore, #tpu.memory_space<semaphore_mem>>)
    } else {
    }
    %c1_i32 = arith.constant 1 : i32
    %4 = arith.addi %arg1, %c1_i32 : i32
    %c2_i32_1 = arith.constant 2 : i32
    %5 = arith.cmpi slt, %4, %c2_i32_1 : i32
    %6 = arith.extui %5 : i1 to i32
    %c0_i32_2 = arith.constant 0 : i32
    %7 = arith.cmpi ne, %6, %c0_i32_2 : i32
    scf.if %7 {
      %c1_i32_43 = arith.constant 1 : i32
      %93 = arith.addi %arg1, %c1_i32_43 : i32
      %c8_i32_44 = arith.constant 8 : i32
      %94 = arith.muli %93, %c8_i32_44 : i32
      %c1_i32_45 = arith.constant 1 : i32
      %95 = arith.subi %c1_i32_45, %0 : i32
      %c1_i32_46 = arith.constant 1 : i32
      %96 = arith.subi %c1_i32_46, %0 : i32
      %c0_i32_47 = arith.constant 0 : i32
      %c0_i32_48 = arith.constant 0 : i32
      %97 = tpu.memref_slice %arg2[%arg0, %94, %c0_i32_47, %c0_i32_48] : memref<2x18x24x128xbf16, #tpu.memory_space<any>> -> memref<1x10x24x128xbf16, #tpu.memory_space<any>>
      %98 = tpu.memref_squeeze %97 : memref<1x10x24x128xbf16, #tpu.memory_space<any>> -> memref<10x24x128xbf16, #tpu.memory_space<any>>
      %c0_i32_49 = arith.constant 0 : i32
      %c0_i32_50 = arith.constant 0 : i32
      %c0_i32_51 = arith.constant 0 : i32
      %99 = tpu.memref_slice %arg7[%95, %c0_i32_49, %c0_i32_50, %c0_i32_51] : memref<2x10x24x128xbf16, #tpu.memory_space<vmem>> -> memref<1x10x24x128xbf16, #tpu.memory_space<vmem>>
      %100 = tpu.memref_squeeze %99 : memref<1x10x24x128xbf16, #tpu.memory_space<vmem>> -> memref<10x24x128xbf16, #tpu.memory_space<vmem>>
      %101 = tpu.memref_slice %arg8[%96] : memref<2x!tpu.dma_semaphore, #tpu.memory_space<semaphore_mem>> -> memref<1x!tpu.dma_semaphore, #tpu.memory_space<semaphore_mem>>
      %102 = tpu.memref_squeeze %101 : memref<1x!tpu.dma_semaphore, #tpu.memory_space<semaphore_mem>> -> memref<!tpu.dma_semaphore, #tpu.memory_space<semaphore_mem>>
      tpu.enqueue_dma source(%98 : memref<10x24x128xbf16, #tpu.memory_space<any>>) target(%100 : memref<10x24x128xbf16, #tpu.memory_space<vmem>>) target_semaphore(%102 : memref<!tpu.dma_semaphore, #tpu.memory_space<semaphore_mem>>)
    } else {
    }
    %c8_i32 = arith.constant 8 : i32
    %8 = arith.muli %arg1, %c8_i32 : i32
    %c0_i32_3 = arith.constant 0 : i32
    %c0_i32_4 = arith.constant 0 : i32
    %9 = tpu.memref_slice %arg2[%arg0, %8, %c0_i32_3, %c0_i32_4] : memref<2x18x24x128xbf16, #tpu.memory_space<any>> -> memref<1x10x24x128xbf16, #tpu.memory_space<any>>
    %10 = tpu.memref_squeeze %9 : memref<1x10x24x128xbf16, #tpu.memory_space<any>> -> memref<10x24x128xbf16, #tpu.memory_space<any>>
    %c0_i32_5 = arith.constant 0 : i32
    %c0_i32_6 = arith.constant 0 : i32
    %c0_i32_7 = arith.constant 0 : i32
    %11 = tpu.memref_slice %arg7[%0, %c0_i32_5, %c0_i32_6, %c0_i32_7] : memref<2x10x24x128xbf16, #tpu.memory_space<vmem>> -> memref<1x10x24x128xbf16, #tpu.memory_space<vmem>>
    %12 = tpu.memref_squeeze %11 : memref<1x10x24x128xbf16, #tpu.memory_space<vmem>> -> memref<10x24x128xbf16, #tpu.memory_space<vmem>>
    %13 = tpu.memref_slice %arg8[%0] : memref<2x!tpu.dma_semaphore, #tpu.memory_space<semaphore_mem>> -> memref<1x!tpu.dma_semaphore, #tpu.memory_space<semaphore_mem>>
    %14 = tpu.memref_squeeze %13 : memref<1x!tpu.dma_semaphore, #tpu.memory_space<semaphore_mem>> -> memref<!tpu.dma_semaphore, #tpu.memory_space<semaphore_mem>>
    tpu.wait_dma2 semaphore(%14 : memref<!tpu.dma_semaphore, #tpu.memory_space<semaphore_mem>>) src(%10 : memref<10x24x128xbf16, #tpu.memory_space<any>>) dst(%12 : memref<10x24x128xbf16, #tpu.memory_space<vmem>>)
    %c0_i32_8 = arith.constant 0 : i32
    %c0_i32_9 = arith.constant 0 : i32
    %c0_i32_10 = arith.constant 0 : i32
    %15 = tpu.memref_slice %arg7[%0, %c0_i32_8, %c0_i32_9, %c0_i32_10] : memref<2x10x24x128xbf16, #tpu.memory_space<vmem>> -> memref<1x10x24x128xbf16, #tpu.memory_space<vmem>>
    %16 = tpu.memref_squeeze %15 : memref<1x10x24x128xbf16, #tpu.memory_space<vmem>> -> memref<10x24x128xbf16, #tpu.memory_space<vmem>>
    %c0 = arith.constant 0 : index
    %c0_11 = arith.constant 0 : index
    %c0_12 = arith.constant 0 : index
    %17 = vector.load %16[%c0, %c0_11, %c0_12] : memref<10x24x128xbf16, #tpu.memory_space<vmem>>, vector<10x16x128xbf16>
    %18 = arith.extf %17 : vector<10x16x128xbf16> to vector<10x16x128xf32>
    %c0_i32_13 = arith.constant 0 : i32
    %c0_i32_14 = arith.constant 0 : i32
    %c0_i32_15 = arith.constant 0 : i32
    %19 = tpu.memref_slice %arg7[%0, %c0_i32_13, %c0_i32_14, %c0_i32_15] : memref<2x10x24x128xbf16, #tpu.memory_space<vmem>> -> memref<1x10x24x128xbf16, #tpu.memory_space<vmem>>
    %20 = tpu.memref_squeeze %19 : memref<1x10x24x128xbf16, #tpu.memory_space<vmem>> -> memref<10x24x128xbf16, #tpu.memory_space<vmem>>
    %c0_16 = arith.constant 0 : index
    %c1 = arith.constant 1 : index
    %c0_17 = arith.constant 0 : index
    %21 = vector.load %20[%c0_16, %c1, %c0_17] : memref<10x24x128xbf16, #tpu.memory_space<vmem>>, vector<10x16x128xbf16>
    %22 = arith.extf %21 : vector<10x16x128xbf16> to vector<10x16x128xf32>
    %c0_i32_18 = arith.constant 0 : i32
    %c0_i32_19 = arith.constant 0 : i32
    %c0_i32_20 = arith.constant 0 : i32
    %23 = tpu.memref_slice %arg7[%0, %c0_i32_18, %c0_i32_19, %c0_i32_20] : memref<2x10x24x128xbf16, #tpu.memory_space<vmem>> -> memref<1x10x24x128xbf16, #tpu.memory_space<vmem>>
    %24 = tpu.memref_squeeze %23 : memref<1x10x24x128xbf16, #tpu.memory_space<vmem>> -> memref<10x24x128xbf16, #tpu.memory_space<vmem>>
    %c0_21 = arith.constant 0 : index
    %c2 = arith.constant 2 : index
    %c0_22 = arith.constant 0 : index
    %25 = vector.load %24[%c0_21, %c2, %c0_22] : memref<10x24x128xbf16, #tpu.memory_space<vmem>>, vector<10x16x128xbf16>
    %26 = arith.extf %25 : vector<10x16x128xbf16> to vector<10x16x128xf32>
    %27 = vector.extract_strided_slice %18 {offsets = [0, 0, 0], sizes = [8, 16, 128], strides = [1, 1, 1]} : vector<10x16x128xf32> to vector<8x16x128xf32>
    %c0_23 = arith.constant 0 : index
    %c0_24 = arith.constant 0 : index
    %28 = vector.load %arg3[%c0_23, %c0_24] : memref<9x128xf32, #tpu.memory_space<vmem>>, vector<1x128xf32>
    %29 = vector.shape_cast %28 : vector<1x128xf32> to vector<1x1x128xf32>
    %30 = vector.broadcast %29 : vector<1x1x128xf32> to vector<8x16x128xf32>
    %31 = arith.mulf %27, %30 : vector<8x16x128xf32>
    %32 = vector.extract_strided_slice %22 {offsets = [0, 0, 0], sizes = [8, 16, 128], strides = [1, 1, 1]} : vector<10x16x128xf32> to vector<8x16x128xf32>
    %c1_25 = arith.constant 1 : index
    %c0_26 = arith.constant 0 : index
    %33 = vector.load %arg3[%c1_25, %c0_26] : memref<9x128xf32, #tpu.memory_space<vmem>>, vector<1x128xf32>
    %34 = vector.shape_cast %33 : vector<1x128xf32> to vector<1x1x128xf32>
    %35 = vector.broadcast %34 : vector<1x1x128xf32> to vector<8x16x128xf32>
    %36 = arith.mulf %32, %35 : vector<8x16x128xf32>
    %37 = arith.addf %31, %36 : vector<8x16x128xf32>
    %38 = vector.extract_strided_slice %26 {offsets = [0, 0, 0], sizes = [8, 16, 128], strides = [1, 1, 1]} : vector<10x16x128xf32> to vector<8x16x128xf32>
    %c2_27 = arith.constant 2 : index
    %c0_28 = arith.constant 0 : index
    %39 = vector.load %arg3[%c2_27, %c0_28] : memref<9x128xf32, #tpu.memory_space<vmem>>, vector<1x128xf32>
    %40 = vector.shape_cast %39 : vector<1x128xf32> to vector<1x1x128xf32>
    %41 = vector.broadcast %40 : vector<1x1x128xf32> to vector<8x16x128xf32>
    %42 = arith.mulf %38, %41 : vector<8x16x128xf32>
    %43 = arith.addf %37, %42 : vector<8x16x128xf32>
    %44 = vector.extract_strided_slice %18 {offsets = [1, 0, 0], sizes = [8, 16, 128], strides = [1, 1, 1]} : vector<10x16x128xf32> to vector<8x16x128xf32>
    %c3 = arith.constant 3 : index
    %c0_29 = arith.constant 0 : index
    %45 = vector.load %arg3[%c3, %c0_29] : memref<9x128xf32, #tpu.memory_space<vmem>>, vector<1x128xf32>
    %46 = vector.shape_cast %45 : vector<1x128xf32> to vector<1x1x128xf32>
    %47 = vector.broadcast %46 : vector<1x1x128xf32> to vector<8x16x128xf32>
    %48 = arith.mulf %44, %47 : vector<8x16x128xf32>
    %49 = arith.addf %43, %48 : vector<8x16x128xf32>
    %50 = vector.extract_strided_slice %22 {offsets = [1, 0, 0], sizes = [8, 16, 128], strides = [1, 1, 1]} : vector<10x16x128xf32> to vector<8x16x128xf32>
    %c4 = arith.constant 4 : index
    %c0_30 = arith.constant 0 : index
    %51 = vector.load %arg3[%c4, %c0_30] : memref<9x128xf32, #tpu.memory_space<vmem>>, vector<1x128xf32>
    %52 = vector.shape_cast %51 : vector<1x128xf32> to vector<1x1x128xf32>
    %53 = vector.broadcast %52 : vector<1x1x128xf32> to vector<8x16x128xf32>
    %54 = arith.mulf %50, %53 : vector<8x16x128xf32>
    %55 = arith.addf %49, %54 : vector<8x16x128xf32>
    %56 = vector.extract_strided_slice %26 {offsets = [1, 0, 0], sizes = [8, 16, 128], strides = [1, 1, 1]} : vector<10x16x128xf32> to vector<8x16x128xf32>
    %c5 = arith.constant 5 : index
    %c0_31 = arith.constant 0 : index
    %57 = vector.load %arg3[%c5, %c0_31] : memref<9x128xf32, #tpu.memory_space<vmem>>, vector<1x128xf32>
    %58 = vector.shape_cast %57 : vector<1x128xf32> to vector<1x1x128xf32>
    %59 = vector.broadcast %58 : vector<1x1x128xf32> to vector<8x16x128xf32>
    %60 = arith.mulf %56, %59 : vector<8x16x128xf32>
    %61 = arith.addf %55, %60 : vector<8x16x128xf32>
    %62 = vector.extract_strided_slice %18 {offsets = [2, 0, 0], sizes = [8, 16, 128], strides = [1, 1, 1]} : vector<10x16x128xf32> to vector<8x16x128xf32>
    %c6 = arith.constant 6 : index
    %c0_32 = arith.constant 0 : index
    %63 = vector.load %arg3[%c6, %c0_32] : memref<9x128xf32, #tpu.memory_space<vmem>>, vector<1x128xf32>
    %64 = vector.shape_cast %63 : vector<1x128xf32> to vector<1x1x128xf32>
    %65 = vector.broadcast %64 : vector<1x1x128xf32> to vector<8x16x128xf32>
    %66 = arith.mulf %62, %65 : vector<8x16x128xf32>
    %67 = arith.addf %61, %66 : vector<8x16x128xf32>
    %68 = vector.extract_strided_slice %22 {offsets = [2, 0, 0], sizes = [8, 16, 128], strides = [1, 1, 1]} : vector<10x16x128xf32> to vector<8x16x128xf32>
    %c7 = arith.constant 7 : index
    %c0_33 = arith.constant 0 : index
    %69 = vector.load %arg3[%c7, %c0_33] : memref<9x128xf32, #tpu.memory_space<vmem>>, vector<1x128xf32>
    %70 = vector.shape_cast %69 : vector<1x128xf32> to vector<1x1x128xf32>
    %71 = vector.broadcast %70 : vector<1x1x128xf32> to vector<8x16x128xf32>
    %72 = arith.mulf %68, %71 : vector<8x16x128xf32>
    %73 = arith.addf %67, %72 : vector<8x16x128xf32>
    %74 = vector.extract_strided_slice %26 {offsets = [2, 0, 0], sizes = [8, 16, 128], strides = [1, 1, 1]} : vector<10x16x128xf32> to vector<8x16x128xf32>
    %c8 = arith.constant 8 : index
    %c0_34 = arith.constant 0 : index
    %75 = vector.load %arg3[%c8, %c0_34] : memref<9x128xf32, #tpu.memory_space<vmem>>, vector<1x128xf32>
    %76 = vector.shape_cast %75 : vector<1x128xf32> to vector<1x1x128xf32>
    %77 = vector.broadcast %76 : vector<1x1x128xf32> to vector<8x16x128xf32>
    %78 = arith.mulf %74, %77 : vector<8x16x128xf32>
    %79 = arith.addf %73, %78 : vector<8x16x128xf32>
    %80 = vector.shape_cast %79 : vector<8x16x128xf32> to vector<128x128xf32>
    %c0_35 = arith.constant 0 : index
    %c0_36 = arith.constant 0 : index
    %81 = vector.load %arg4[%c0_35, %c0_36] : memref<128x128xf32, #tpu.memory_space<vmem>>, vector<128x128xf32>
    %cst = arith.constant dense<0.000000e+00> : vector<128x128xf32>
    %82 = tpu.matmul %80, %81, %cst {dimension_numbers = #tpu.dot_dimension_numbers<[1], [0], [0], [1], [0, 0, 1, 1], [], []>} : vector<128x128xf32>, vector<128x128xf32>, vector<128x128xf32> -> vector<128x128xf32>
    %83 = tpu.transpose %82, [1, 0] : vector<128x128xf32> -> vector<128x128xf32>
    %84 = vector.extract_strided_slice %83 {offsets = [0, 0], sizes = [8, 128], strides = [1, 1]} : vector<128x128xf32> to vector<8x128xf32>
    %c0_37 = arith.constant 0 : index
    %c0_38 = arith.constant 0 : index
    %85 = vector.load %arg5[%c0_37, %c0_38] : memref<8x1xf32, #tpu.memory_space<vmem>>, vector<8x1xf32>
    %86 = vector.broadcast %85 : vector<8x1xf32> to vector<8x128xf32>
    %87 = arith.addf %84, %86 : vector<8x128xf32>
    %cst_39 = arith.constant 0.000000e+00 : f32
    %88 = vector.broadcast %cst_39 : f32 to vector<8x128xf32>
    %89 = arith.maximumf %87, %88 : vector<8x128xf32>
    %c0_40 = arith.constant 0 : index
    %c0_41 = arith.constant 0 : index
    %c0_42 = arith.constant 0 : index
    %90 = vector.load %arg6[%c0_40, %c0_41, %c0_42] : memref<1x8x128xf32, #tpu.memory_space<vmem>>, vector<1x8x128xf32>
    %91 = vector.shape_cast %90 : vector<1x8x128xf32> to vector<8x128xf32>
    %92 = vector.shape_cast %89 : vector<8x128xf32> to vector<1x8x128xf32>
    tpu.vector_store %arg6[%c0_40, %c0_41, %c0_42], %92 {strides = array<i32>} : memref<1x8x128xf32, #tpu.memory_space<vmem>>, vector<1x8x128xf32>,
    return
  }
  func.func @transform_1(%arg0: i32, %arg1: i32) -> (i32, i32) {
    %c0_i32 = arith.constant 0 : i32
    %c0_i32_0 = arith.constant 0 : i32
    %c0_i32_1 = arith.constant 0 : i32
    return %c0_i32, %c0_i32_0 : i32, i32
  }
  func.func @transform_2(%arg0: i32, %arg1: i32) -> (i32, i32) {
    %c0_i32 = arith.constant 0 : i32
    %c0_i32_0 = arith.constant 0 : i32
    %c0_i32_1 = arith.constant 0 : i32
    return %c0_i32, %c0_i32_0 : i32, i32
  }
  func.func @transform_3(%arg0: i32, %arg1: i32) -> (i32, i32) {
    %c0_i32 = arith.constant 0 : i32
    %c0_i32_0 = arith.constant 0 : i32
    %c0_i32_1 = arith.constant 0 : i32
    return %c0_i32, %c0_i32_0 : i32, i32
  }
  func.func @transform_4(%arg0: i32, %arg1: i32) -> (i32, i32, i32) {
    %c0_i32 = arith.constant 0 : i32
    %c0_i32_0 = arith.constant 0 : i32
    return %arg0, %c0_i32, %arg1 : i32, i32, i32
  }
}

</mosaic_0001>

<bundles_post_ra>
// kernel: depthwise_separable_conv.2
= control target key start
LH: loop header
LB: loop body
LE: loop exit
PB: predicated region body
PF: predicated region fallthrough
CT: control target
= control target key end

     0   :  { %s3261_s0 = inlined_call_operand.hbm [shape: bf16[2,18,24,128], index: 0, kind: input, shape index: {}]   ;;  %s3262_s1 = inlined_call_operand.hbm [shape: f32[9,128], index: 1, kind: input, shape index: {}]   ;;  %s3263_s2 = inlined_call_operand.hbm [shape: f32[128,128], index: 2, kind: input, shape index: {}]   ;;  %s3264_s3 = inlined_call_operand.hbm [shape: f32[2,2,2,128], index: 3, kind: output, shape index: {}]  }
   0x1   :  { %3276 = sst [smem:[#allocation25_spill]] %s3262_s1 }
   0x2   :  { %3277 = sst [smem:[#allocation26_spill]] %s3263_s2 }
   0x3   :  { %8 = vsyncpa [#allocation5], 0 }
   0x4   :  { %9 = vsyncpa [#allocation8], 0 }
   0x5   :  { %10 = vsyncpa [#allocation6], 0 }
   0x6   :  { %12 = vsyncpa [#allocation6 + $0x1], 0  ;;  %s2115_s12 = smov 0   ;;  %s2117_s13 = smov 0  }
   0x7   :  { %s2119_s14 = smov 0   ;;  %s2121_s15 = smov 0  }
   0x8   :  { %s2123_s16 = smov 0   ;;  %s2125_s17 = smov 0  }
   0x9   :  { %s2127_s18 = smov 0   ;;  %s2129_s19 = smov 0  }
   0xa LB: > { %3278 = sst [smem:[#allocation20_spill]] %s2079_s17  ;;  %s1541_s20 = sadd.s32 4294967295, %s2087_s19   ;;  %s2087_s19 = sphi %s2129_s19, %s18_s19   ;;  %s2083_s18 = sphi %s2127_s18, %s3302_s18   ;;  %s2079_s17 = sphi %s2125_s17, %s3301_s17   ;;  %s2075_s16 = sphi %s2123_s16, %s3300_s16   ;;  %s2071_s15 = sphi %s2121_s15, %s3299_s15   ;;  %s2067_s14 = sphi %s2119_s14, %s3305_s14   ;;  %s2063_s13 = sphi %s2117_s13, %s3304_s13   ;;  %s2059_s12 = sphi %s2115_s12, %s3303_s12  }
   0xb   : > { %3279 = sst [smem:[#allocation21_spill]] %s2083_s18  ;;  %s1542_s21 = sadd.s32 4294967294, %s2087_s19  }
   0xc   : > { %s27_s22 = sadd.s32 1, %s2079_s17  ;;  %s30_s23 = sadd.s32 1, %s2083_s18 }
   0xd   : > { %p28_p0 = scmp.ge.s32.totalorder %s27_s22, 2  ;;  %s81_s24 = sadd.s32 1, %s2067_s14 }
   0xe   : > { %p91_p1 = scmp.ne.s32.totalorder %s2067_s14, %s2063_s13  ;;  %p92_p2 = scmp.eq.s32.totalorder %s1541_s20, 3 }
   0xf   : > { %s3307_s22 = smov (%p28_p0, %s27_s22), 0  ;;  %s3309_s23 = smov (!%p28_p0, %s30_s23), %s2083_s18 }
  0x10   : > { %3280 = sst [smem:[#allocation22_spill]] %s3307_s22  ;;  %s77_s25 = ssub.s32 %s2079_s17, %s3307_s22 }
  0x11   : > { %p2167_p3 = por %p92_p2, %p91_p1  ;;  %p32_p4 = scmp.ge.s32.totalorder %s3309_s23, 2 }
  0x12   : > { %p97_p5 = scmp.ne.s32.totalorder %s2063_s13, %s2059_s12  ;;  %p98_p6 = scmp.eq.s32.totalorder %s1542_s21, 3 }
  0x13   : > { %s3281_s26 = scalar_select %p2167_p3, 1, 0 }
  0x14   : > { %p1543_p7 = scmp.ge.s32.totalorder %s2087_s19, 1  ;;  %s3311_s23 = smov (%p32_p4, %s3309_s23), 0 }
  0x15   : > { %3282 = sst [smem:[#allocation23_spill]] %s3311_s23  ;;  %p2176_p8 = por %p98_p6, %p97_p5 }
  0x16   : > { %p105_p9 = scmp.lt.s32.totalorder %s2087_s19, 5  ;;  %s76_s28 = ssub.s32 %s2083_s18, %s3311_s23 }
  0x17   : > { %s3283_s27 = scalar_select %p2176_p8, 1, 0 }
  0x18   : > { %s78_s29 = sor.u32 %s77_s25, %s76_s28  ;;  %p2183_p10 = pnand %p1543_p7, %p105_p9 }
  0x19   : > { %p79_p11 = scmp.eq.s32.totalorder %s78_s29, 0  ;;  %p2187_p12 = scmp.eq.s32.totalorder %s1541_s20, 0 }
  0x1a   : > { %s3284_s30 = scalar_select %p2183_p10, 1, 0 }
  0x1b   : > { %s3285_s4 = scalar_select %p2187_p12, 1, 0 }
  0x1c   : > { %p1774_p13 = pneg %p2183_p10  ;;  %s2089_s6 = smov [#allocation4]  }
  0x1d   : > { %s2194_s5 = scalar_select %p79_p11, %s2067_s14, %s81_s24  }
  0x1e   : > { %s117_s7 = sshll.u32 %s2089_s6, 4  ;;  %p2198_p0 = pnand %p2187_p12, %p1774_p13  ;;  %s118_s7 = int_to_ptr.vmem [resolvable:$true] %s117_s7 }
  0x1f   : > { %3286 = sst [smem:[#allocation24_spill]] %s2194_s5  ;;  %s3288_s1 = sld [smem:[#allocation25_spill]] }
  0x20   : > { %p1872_p2 = pneg %p2198_p0 }
  0x25   : > { %s1870_s11 = scalar_lea.hbm %s3288_s1, 256 }
  0x26   : > { %p1871_p1 = scmp.ne.s32.totalorder %s3288_s1, %s1870_s11  ;;  %p1877_p6 = scmp.lt.u32.totalorder %s1870_s11, %s3288_s1 }
  0x28   : > { %p1873_p4 = pnand %p1872_p2, %p1871_p1 }
  0x2a   : > { %p1874_p5 = pneg %p1873_p4 }
  0x2c   : > { %p1879_p7 = pnand %p1877_p6, %p1874_p5 }
  0x2e   : > { %1882 = shalt.err (!%p1879_p7)
}
  0x2f   : > { %s1883_s28 = scalar_lea.vmem %s118_s7, 256  ;;  %p1891_p8 = scmp.lt.s32.totalorder %s118_s7, %s118_s7 }
  0x30   : > { %p1884_p9 = scmp.ne.s32.totalorder %s118_s7, %s1883_s28  ;;  %p1892_p3 = scmp.lt.s32.totalorder %s1883_s28, %s1883_s28 }
  0x32   : > { %p1886_p11 = pnand %p1884_p9, %p1872_p2  ;;  %p1893_p12 = por %p1892_p3, %p1891_p8 }
  0x34   : > { %p1887_p13 = pneg %p1886_p11 }
  0x36   : > { %p1894_p10 = pnand %p1893_p12, %p1887_p13 }
  0x38   : > { %1897 = shalt.err (!%p1894_p10)
}
  0x39   : > { %s2090_s29 = smov 128   ;;  %s2091_s6 = smov 8  }
  0x3a   : > { %1777 = dma.hbm_to_vmem [thread:$0]  (!%p2198_p0), %s3288_s1, 256, %s118_s7, [#allocation5], %s2090_s29, %s2090_s29, %s2091_s6  }
  0x3b   : > { %s2092_s11 = smov [#allocation7]   ;;  %s3289_s2 = sld [smem:[#allocation26_spill]] }
  0x3c   : > { %s130_s20 = sshll.u32 %s2092_s11, 4  ;;  %s131_s20 = int_to_ptr.vmem [resolvable:$true] %s130_s20 }
  0x41   : > { %s1898_s25 = scalar_lea.hbm %s3289_s2, 2048 }
  0x42   : > { %p1899_p3 = scmp.ne.s32.totalorder %s3289_s2, %s1898_s25  ;;  %p1905_p12 = scmp.lt.u32.totalorder %s1898_s25, %s3289_s2 }
  0x44   : > { %p1901_p8 = pnand %p1899_p3, %p1872_p2 }
  0x46   : > { %p1902_p10 = pneg %p1901_p8 }
  0x48   : > { %p1907_p1 = pnand %p1905_p12, %p1902_p10 }
  0x4a   : > { %1910 = shalt.err (!%p1907_p1)
}
  0x4b   : > { %s1911_s7 = scalar_lea.vmem %s131_s20, 2048  ;;  %p1919_p7 = scmp.lt.s32.totalorder %s131_s20, %s131_s20 }
  0x4c   : > { %p1912_p4 = scmp.ne.s32.totalorder %s131_s20, %s1911_s7  ;;  %p1920_p9 = scmp.lt.s32.totalorder %s1911_s7, %s1911_s7 }
  0x4e   : > { %p1914_p5 = pnand %p1912_p4, %p1872_p2  ;;  %p1921_p11 = por %p1920_p9, %p1919_p7 }
  0x50   : > { %p1915_p6 = pneg %p1914_p5 }
  0x52   : > { %p1922_p13 = pnand %p1921_p11, %p1915_p6 }
  0x54   : > { %1925 = shalt.err (!%p1922_p13)
}
  0x55   : > { %1780 = dma.hbm_to_vmem [thread:$0]  (!%p2198_p0), %s3289_s2, 2048, %s131_s20, [#allocation8], %s2090_s29, %s2090_s29, %s2091_s6  }
  0x56   : > { %p3290_p3 = scmp.ne.s32.totalorder %s3284_s30, 0 }
  0x57   : > { %p3291_p8 = scmp.ne.s32.totalorder (!%p3290_p3), %s3285_s4, 0 }
  0x58   : > { %146 = sbr.rel (%p3290_p3) target bundleno = 572 (0x23c), region = 28 }
  0x5f   : > { %2044 = dma.done.wait (%p3291_p8), [#allocation5], 256  }
  0x60   : > { %2046 = vsyncadd (%p3291_p8), [#allocation5], 4294967040 }
  0x61   : > { %2048 = dma.done.wait (%p3291_p8), [#allocation8], 2048  }
  0x62   : > { %2050 = vsyncadd (%p3291_p8), [#allocation8], 4294965248  ;;  %s3272_s18 = sand.u32 1, %s2063_s13   ;;  %p1789_p0 = scmp.eq.s32.totalorder %s2071_s15, 0 }
  0x63   : > { %s2257_s22 = sshll.u32 %s3272_s18, 1  ;;  %s1573_s30 = smul.u32 3456, %s2075_s16 }
  0x64   : > { %p167_p2 = scmp.lt.s32.totalorder %s2071_s15, 0  ;;  %s2093_s4 = smov [#allocation2]  }
  0x65   : > { %s179_s6 = scalar_lea.hbm %s3261_s0, %s1573_s30  ;;  %s187_s10 = sshll.u32 %s2093_s4, 4  ;;  %s2265_s10 = int_to_ptr.vmem [resolvable:$true] %s187_s10 }
  0x66   : > { %s168_s11 = ssub.s32 0, %s2071_s15  ;;  %s1926_s20 = scalar_lea.hbm %s179_s6, 1920 }
  0x67   : > { %p1927_p10 = scmp.ne.s32.totalorder %s179_s6, %s1926_s20  ;;  %s3274_s25 = scalar_lea.hbm %s3261_s0, 6912 }
  0x68   : > { %p1931_p4 = scmp.lt.u32.totalorder %s179_s6, %s3261_s0  ;;  %p1932_p5 = scmp.lt.u32.totalorder %s3274_s25, %s1926_s20 }
  0x69   : > { %p1928_p12 = pnand %p1927_p10, %p1789_p0  ;;  %p1934_p7 = scmp.lt.u32.totalorder %s1926_s20, %s179_s6 }
  0x6a   : > { %p1933_p6 = por %p1932_p5, %p1931_p4 }
  0x6b   : > { %p1929_p1 = pneg %p1928_p12 }
  0x6c   : > { %p1935_p9 = por %p1934_p7, %p1933_p6 }
  0x6e   : > { %p1936_p11 = pnand %p1935_p9, %p1929_p1 }
  0x70   : > { %1939 = shalt.err (!%p1936_p11)  }
  0x71   : > { %s1940_s30 = scalar_lea.vmem %s2265_s10, 1920  ;;  %s3273_s8 = scalar_lea.vmem %s2265_s10, 3840 }
  0x72   : > { %p1941_p13 = scmp.ne.s32.totalorder %s2265_s10, %s1940_s30  ;;  %p1947_p10 = scmp.lt.s32.totalorder %s2265_s10, %s2265_s10 }
  0x73   : > { %p1948_p12 = scmp.lt.s32.totalorder %s3273_s8, %s1940_s30 }
  0x74   : > { %p1942_p3 = pnand %p1941_p13, %p1789_p0 }
  0x75   : > { %p1949_p4 = por %p1948_p12, %p1947_p10 }
  0x76   : > { %p1943_p8 = pneg %p1942_p3 }
  0x78   : > { %p1950_p5 = pnand %p1949_p4, %p1943_p8 }
  0x7a   : > { %1953 = shalt.err (!%p1950_p5)  }
  0x7b   : > { %1769 = dma.hbm_to_vmem [thread:$0]  (%p1789_p0), %s179_s6, 1920, %s2265_s10, [#allocation3] }
  0x7c   : > { %s1550_s29 = smin.u32 %s2071_s15, %s168_s11  ;;  %s191_s4 = sadd.s32 1, %s2071_s15 }
  0x7d   : > { %s170_s20 = sand.u32 1, %s1550_s29   ;;  %p2298_p1 = scmp.lt.s32.totalorder %s191_s4, 2 }
  0x7e   : > { %s171_s21 = ssub.s32 0, %s170_s20  ;;  %s1475_s28 = smul.u32 24, %s2071_s15 }
  0x7f   : > { %s3313_s21 = smov (!%p167_p2, %s171_s21), %s170_s20  ;;  %s1476_s23 = smul.u32 54, %s2075_s16 }
  0x80   : > { %s197_s7 = ssub.s32 1, %s3313_s21  ;;  %s1575_s6 = smul.u32 120, %s3313_s21 }
  0x81   : > { %s1574_s9 = smul.u32 120, %s197_s7  ;;  %s1477_s30 = sadd.s32 %s1476_s23, %s1475_s28 }
  0x82   : > { %s1554_s11 = sshll.u32 %s1477_s30, 6  ;;  %s206_s4 = scalar_lea.sflag [#allocation3], %s197_s7 }
  0x83   : > { %s1479_s8 = scalar_lea.hbm %s3261_s0, %s1554_s11  ;;  %s205_s20 = scalar_lea.vmem [#allocation2], %s1574_s9 }
  0x84   : > { %s214_s25 = sshll.u32 %s205_s20, 4  ;;  %s1480_s1 = scalar_lea.hbm %s1479_s8, 1536  ;;  %s215_s25 = int_to_ptr.vmem [resolvable:$true] %s214_s25 }
  0x85   : > { %s1982_s2 = scalar_lea.hbm %s1479_s8, 3456  ;;  %p1959_p7 = scmp.lt.u32.totalorder %s1480_s1, %s3261_s0 }
  0x86   : > { %p1955_p0 = scmp.ne.s32.totalorder %s1480_s1, %s1982_s2  ;;  %s3293_s30 = scalar_lea.hbm %s3261_s0, 6912 }
  0x87   : > { %p1960_p9 = scmp.lt.u32.totalorder %s3293_s30, %s1982_s2  ;;  %p1962_p13 = scmp.lt.u32.totalorder %s1982_s2, %s1480_s1 }
  0x88   : > { %p1956_p2 = pnand %p1955_p0, %p2298_p1 }
  0x89   : > { %p1961_p11 = por %p1960_p9, %p1959_p7 }
  0x8a   : > { %p1957_p6 = pneg %p1956_p2 }
  0x8b   : > { %p1963_p3 = por %p1962_p13, %p1961_p11 }
  0x8d   : > { %p1964_p8 = pnand %p1963_p3, %p1957_p6 }
  0x8f   : > { %1967 = shalt.err (!%p1964_p8)  }
  0x90   : > { %s1968_s18 = scalar_lea.vmem %s215_s25, 1920  ;;  %p1975_p5 = scmp.lt.s32.totalorder %s215_s25, %s2265_s10 }
  0x91   : > { %p1969_p10 = scmp.ne.s32.totalorder %s215_s25, %s1968_s18  ;;  %s3294_s17 = scalar_lea.vmem %s2265_s10, 3840 }
  0x92   : > { %p1976_p0 = scmp.lt.s32.totalorder %s3294_s17, %s1968_s18 }
  0x93   : > { %p1970_p12 = pnand %p1969_p10, %p2298_p1 }
  0x94   : > { %p1977_p2 = por %p1976_p0, %p1975_p5 }
  0x95   : > { %p1971_p4 = pneg %p1970_p12 }
  0x97   : > { %p1978_p7 = pnand %p1977_p2, %p1971_p4 }
  0x99   : > { %1981 = shalt.err (!%p1978_p7)  }
  0x9a   : > { %1771 = dma.hbm_to_vmem [thread:$0]  (%p2298_p1), %s1480_s1, 1920, %s215_s25, %s206_s4 }
  0x9b   : > { %s166_s2 = scalar_lea.vmem [#allocation9], %s2257_s22  ;;  %s2328_s5 = scalar_lea.vmem [#allocation2], %s1575_s6 }
  0x9c   : > { %s221_s8 = scalar_lea.sflag [#allocation3], %s3313_s21 }
  0x9d   : > { %2051 = dma.done.wait %s221_s8, 1920 }
  0x9e   : > { %2052 = vsyncadd %s221_s8, 4294965376  ;;  %v1194_v0 = vld [vmem:[#allocation7] sm:$0xff]  ;;  %v1195_v1 = vld [vmem:[#allocation7 + $0x8] sm:$0xff]  ;;  %vm421_vm0 = vcmask 1046528   ;;  %vm547_vm1 = vcmask 1045504   ;;  %s1567_s1 = sshll.u32 %s2075_s16, 1 }
  0x9f   : > { %v1196_v2 = vld [vmem:[#allocation7 + $0x10] sm:$0xff]  ;;  %v1712_v3 = vpack.c.bf16 %v1195_v1, %v1194_v0  ;;  %v1197_v4 = vld [vmem:[#allocation7 + $0x18] sm:$0xff]  ;;  %v1198_v5 = vld [vmem:[#allocation7 + $0x20] sm:$0xff]  ;;  %s1428_s10 = sadd.s32 %s2071_s15, %s1567_s1  ;;  %s1432_s21 = sshll.u32 %s166_s2, 4  ;;  %vm1413_vm2 = vcmask 1040384   ;;  %s3206_s21 = int_to_ptr.vmem [resolvable:$true] %s1432_s21 }
  0xa0   : > { %v1716_v6 = vpack.c.bf16 %v1197_v4, %v1196_v2  ;;  %v1199_v7 = vld [vmem:[#allocation7 + $0x28] sm:$0xff]  ;;  %v1200_v8 = vld [vmem:[#allocation7 + $0x30] sm:$0xff]  ;;  %v1201_v9 = vld [vmem:[#allocation7 + $0x38] sm:$0xff]  ;;  %s1568_s25 = sshll.u32 %s1428_s10, 5  ;;  %s3295_s15 = sand.u32 1, %s2063_s13  }
  0xa1   : > { %1713 = vmatprep.subr.bf16.mxu0 %v1712_v3  ;;  %1744 = vmatprep.subr.bf16.mxu1 %v1712_v3  ;;  %v1202_v10 = vld [vmem:[#allocation7 + $0x40] sm:$0xff]  ;;  %v1203_v11 = vld [vmem:[#allocation7 + $0x48] sm:$0xff]  ;;  %v1204_v12 = vld [vmem:[#allocation7 + $0x50] sm:$0xff]  ;;  %v1720_v16 = vpack.c.bf16 %v1199_v7, %v1198_v5  ;;  %v1724_v25 = vpack.c.bf16 %v1201_v9, %v1200_v8  ;;  %s3204_s9 = scalar_lea.hbm %s3264_s3, %s1568_s25  ;;  %s1417_s16 = scalar_lea.sflag [#allocation6], %s3295_s15 }
  0xa2   : > { %1715 = vmatpush3.bf16.msra.mxu0 %v1712_v3  ;;  %1752 = vmatpush3.bf16.msra.mxu1 %v1712_v3  ;;  %v1205_v13 = vld [vmem:[#allocation7 + $0x58] sm:$0xff]  ;;  %v1206_v14 = vld [vmem:[#allocation7 + $0x60] sm:$0xff]  ;;  %v1207_v15 = vld [vmem:[#allocation7 + $0x68] sm:$0xff]  ;;  %v2339_v26 = vpack.c.bf16 %v1203_v11, %v1202_v10  ;;  %s1983_s6 = scalar_lea.vmem %s3206_s21, 32  ;;  %p3296_p6 = scmp.ne.s32.totalorder %s3281_s26, 0 }
  0xa3   : > { %1717 = vmatprep.subr.bf16.mxu0 %v1716_v6  ;;  %1745 = vmatprep.subr.bf16.mxu1 %v1716_v6  ;;  %v1208_v17 = vld [vmem:[#allocation7 + $0x70] sm:$0xff]  ;;  %v1209_v18 = vld [vmem:[#allocation7 + $0x78] sm:$0xff]  ;;  %v2343_v28 = vld [vmem:[%s2328_s5 + $0xc] sm:$0xe]  ;;  %v2346_v30 = vpack.c.bf16 %v1205_v13, %v1204_v12  ;;  %v2357_v37 = vpack.c.bf16 %v1207_v15, %v1206_v14  ;;  %p1984_p1 = scmp.ne.s32.totalorder %s3206_s21, %s1983_s6  ;;  %s2094_s11 = smov [#allocation9]  }
  0xa4   : > { %v1577_v19 = vld [vmem:[%s2328_s5] sm:$0xff]   ;;  %v1616_v22 = vld [vmem:[%s2328_s5 + $0x18] sm:$0xff]   ;;  %v2336_v23 = vld [vmem:[%s2328_s5 + $0xc] sm:$0xff]   ;;  %v2359_v38 = vpack.c.bf16 %v1209_v18, %v1208_v17  ;;  %v338_v42 = vunpack.c.l.bf16 %v2343_v28  ;;  %s1987_s29 = sshll.u32 %s2094_s11, 4  ;;  %s1988_s29 = int_to_ptr.vmem [resolvable:$false] %s1987_s29 }
  0xa5   : > { %v1578_v20 = vunpack.c.l.bf16 %v1577_v19  ;;  %v2332_v21 = vunpack.c.h.bf16 %v1577_v19  ;;  %v327_v24 = vld [vmem:[%s2328_s5] sm:$0xe]  ;;  %v229_v27 = vld [vmem:[%s2328_s5 + $0xc] sm:$0xff]   ;;  %v329_v29 = vld [vmem:[%s2328_s5 + $0x18] sm:$0xe]  ;;  %v2348_v31 = vunpack.c.l.bf16 %v1616_v22  ;;  %v300_v32 = vunpack.c.l.bf16 %v2336_v23  ;;  %p1985_p9 = pnand %p1984_p1, %p3296_p6  ;;  %s1989_s20 = scalar_lea.vmem %s1988_s29, 64 }
  0xa6   : > { %1719 = vmatpush3.bf16.msra.mxu0 %v1716_v6  ;;  %1753 = vmatpush3.bf16.msra.mxu1 %v1716_v6  ;;  %v337_v33 = vunpack.c.l.bf16 %v327_v24  ;;  %v2351_v34 = vld [vmem:[#allocation4] ss:$0 sm:$0xff]  ;;  %v2353_v35 = vld [vmem:[#allocation4 + $0x1] ss:$0 sm:$0xff]  ;;  %v2355_v36 = vld [vmem:[#allocation4 + $0x2] ss:$0 sm:$0xff]  ;;  %v2361_v39 = vunpack.c.h.bf16 %v1616_v22  ;;  %v249_v40 = vunpack.c.l.bf16 %v229_v27  ;;  %v2363_v41 = vunpack.c.h.bf16 %v229_v27  ;;  %p1990_p13 = scmp.lt.s32.totalorder %s3206_s21, %s1988_s29  ;;  %p1991_p3 = scmp.lt.s32.totalorder %s1989_s20, %s1983_s6 }
  0xa7   : > { %1721 = vmatprep.subr.bf16.mxu0 %v1720_v16  ;;  %1746 = vmatprep.subr.bf16.mxu1 %v1720_v16  ;;  %v373_v43 = vmul.f32 %v1578_v20, %v2353_v35  ;;  %v2369_v44 = vmul.f32 %v2332_v21, %v2353_v35  ;;  %v2371_v45 = vunpack.c.l.bf16 %v329_v29  ;;  %v352_v46 = vmul.f32 %v1578_v20, %v2351_v34  ;;  %v2387_v53 = vld [vmem:[#allocation4 + $0x3] ss:$0 sm:$0xff]  ;;  %v2397_v58 = vld [vmem:[#allocation4 + $0x4] ss:$0 sm:$0xff]  ;;  %v2410_v62 = vld [vmem:[#allocation4 + $0x5] ss:$0 sm:$0xff]  ;;  %p1986_p11 = pneg %p1985_p9 }
  0xa8   : > { %v499_v47 = vmul.f32 %v2355_v36, %v337_v33  ;;  %v2377_v48 = vmul.f32 %v2332_v21, %v2355_v36  ;;  %v2380_v49 = vmul.f32 %v2353_v35, %v300_v32  ;;  %v2384_v50 = vmul.f32 %v2348_v31, %v2353_v35  ;;  %v269_v4 = vld [vmem:[%s2328_s5 + $0x8] sm:$0x1]  ;;  %v2428_v9 = vld [vmem:[#allocation4 + $0x7] ss:$0 sm:$0xff]  ;;  %v272_v10 = vld [vmem:[%s2328_s5 + $0x14] sm:$0x1]  ;;  %p1992_p8 = por %p1991_p3, %p1990_p13 }
  0xa9   : > { %v422_v51 = vrot.slane %v373_v43, 1  ;;  %v423_v52 = vrot.slane %v2369_v44, 1  ;;  %v2390_v54 = vmul.f32 %v2351_v34, %v249_v40  ;;  %v2394_v55 = vmul.f32 %v2361_v39, %v2353_v35  ;;  %v2439_v15 = vld [vmem:[#allocation4 + $0x8] ss:$0 sm:$0xff]  ;;  %v2446_v19 = vld [vmem:[#allocation4 + $0x6] ss:$0 sm:$0xff] }
  0xaa   : > { %1723 = vmatpush3.bf16.msra.mxu0 %v1720_v16  ;;  %1754 = vmatpush3.bf16.msra.mxu1 %v1720_v16  ;;  %v548_v56 = vrot.slane %v499_v47, 2  ;;  %v549_v57 = vrot.slane %v2377_v48, 2  ;;  %v2401_v59 = vmul.f32 %v2348_v31, %v2351_v34  ;;  %v2405_v60 = vmul.f32 %v2361_v39, %v2351_v34  ;;  %v275_v27 = vld [vmem:[%s2328_s5 + $0x20] sm:$0x1]  ;;  %p1993_p10 = pnand %p1992_p8, %p1986_p11 }
  0xab   : > { %1725 = vmatprep.subr.bf16.mxu0 %v1724_v25  ;;  %1747 = vmatprep.subr.bf16.mxu1 %v1724_v25  ;;  %v424_v61 = vsel %vm421_vm0, %v422_v51, %v423_v52  ;;  %v250_v63 = vunpack.c.h.bf16 %v2336_v23  ;;  %v2414_v1 = vmul.f32 %v2355_v36, %v338_v42  ;;  %v625_v3 = vmul.f32 %v2387_v53, %v249_v40 }
  0xac   : > { %v478_v0 = vadd.f32 %v424_v61, %v352_v46  ;;  %v550_v2 = vsel %vm547_vm1, %v548_v56, %v549_v57  ;;  %v427_v5 = vrot.slane %v2380_v49, 1  ;;  %v432_v6 = vrot.slane %v2384_v50, 1 }
  0xad   : > { %v662_v7 = vmul.f32 %v2397_v58, %v300_v32  ;;  %v2426_v8 = vmul.f32 %v2397_v58, %v2363_v41  ;;  %v433_v11 = vrot.slane %v2394_v55, 1  ;;  %v2436_v12 = vmul.f32 %v2355_v36, %v2371_v45 }
  0xae   : > { %1727 = vmatpush3.bf16.msra.mxu0 %v1724_v25  ;;  %1755 = vmatpush3.bf16.msra.mxu1 %v1724_v25  ;;  %v604_v13 = vadd.f32 %v550_v2, %v478_v0  ;;  %v787_v14 = vmul.f32 %v2410_v62, %v338_v42  ;;  %v2444_v18 = vmul.f32 %v2410_v62, %v2363_v41  ;;  %v299_v20 = vunpack.c.l.bf16 %v269_v4 }
  0xaf   : > { %1729 = vmatprep.subr.bf16.mxu0 %v2339_v26  ;;  %1748 = vmatprep.subr.bf16.mxu1 %v2339_v26  ;;  %v710_v16 = vrot.slane %v662_v7, 1  ;;  %v711_v17 = vrot.slane %v2426_v8, 1  ;;  %v949_v25 = vmul.f32 %v2348_v31, %v2428_v9  ;;  %v2451_v28 = vunpack.c.l.bf16 %v272_v10 }
  0xb0   : > { %v641_v22 = vadd.f32 %v625_v3, %v604_v13  ;;  %v835_v24 = vrot.slane %v787_v14, 2  ;;  %v836_v32 = vrot.slane %v2444_v18, 2  ;;  %v2460_v33 = vmul.f32 %v2361_v39, %v2428_v9 }
  0xb1   : > { %v712_v29 = vsel %vm421_vm0, %v710_v16, %v711_v17  ;;  %v1074_v40 = vmul.f32 %v2439_v15, %v2371_v45  ;;  %v912_v43 = vmul.f32 %v2348_v31, %v2446_v19  ;;  %v997_v46 = vrot.slane %v949_v25, 1 }
  0xb2   : > { %1731 = vmatpush3.bf16.msra.mxu0 %v2339_v26  ;;  %1756 = vmatpush3.bf16.msra.mxu1 %v2339_v26  ;;  %v766_v42 = vadd.f32 %v712_v29, %v641_v22  ;;  %v2470_v47 = vmul.f32 %v2361_v39, %v2439_v15  ;;  %v837_v50 = vsel %vm547_vm1, %v835_v24, %v836_v32  ;;  %v998_v51 = vrot.slane %v2460_v33, 1 }
  0xb3   : > { %1733 = vmatprep.subr.bf16.mxu0 %v2346_v30  ;;  %1749 = vmatprep.subr.bf16.mxu1 %v2346_v30  ;;  %v1122_v56 = vrot.slane %v1074_v40, 2  ;;  %v2475_v61 = vunpack.c.l.bf16 %v275_v27  ;;  %v375_v2 = vmul.f32 %v2353_v35, %v299_v20  ;;  %v501_v3 = vmul.f32 %v2355_v36, %v299_v20 }
  0xb4   : > { %v891_v26 = vadd.f32 %v837_v50, %v766_v42  ;;  %v1123_v0 = vrot.slane %v2470_v47, 2  ;;  %v999_v4 = vsel %vm421_vm0, %v997_v46, %v998_v51  ;;  %v353_v7 = vmul.f32 %v2332_v21, %v2351_v34 }
  0xb5   : > { %v664_v10 = vmul.f32 %v2397_v58, %v2451_v28  ;;  %v789_v13 = vmul.f32 %v2410_v62, %v2451_v28  ;;  %v434_v14 = vsel %vm421_vm0, %v432_v6, %v433_v11  ;;  %v425_v18 = vrot.slane %v375_v2, 1  ;;  %v276_v2 = vld [vmem:[%s2328_s5 + $0x24] sm:$0xff]  }
  0xb6   : > { %1735 = vmatpush3.bf16.msra.mxu0 %v2346_v30  ;;  %v928_v16 = vadd.f32 %v912_v43, %v891_v26  ;;  %v551_v20 = vrot.slane %v501_v3, 2  ;;  %1757 = vmatpush3.bf16.msra.mxu1 %v2346_v30  ;;  %v1124_v21 = vsel %vm547_vm1, %v1122_v56, %v1123_v0  ;;  %v951_v25 = vmul.f32 %v2428_v9, %v2475_v61  ;;  %v233_v26 = vld [vmem:[%s2328_s5 + $0x24] sm:$0xff]  }
  0xb7   : > { %1737 = vmatprep.subr.bf16.mxu0 %v2357_v37  ;;  %v713_v22 = vrot.slane %v664_v10, 1  ;;  %v838_v24 = vrot.slane %v789_v13, 2  ;;  %1750 = vmatprep.subr.bf16.mxu1 %v2357_v37  ;;  %v426_v6 = vsel %vm421_vm0, %v423_v52, %v425_v18  ;;  %v1076_v29 = vmul.f32 %v2439_v15, %v2475_v61 }
  0xb8   : > { %v1053_v27 = vadd.f32 %v999_v4, %v928_v16  ;;  %v552_v30 = vsel %vm547_vm1, %v549_v57, %v551_v20  ;;  %v553_v40 = vrot.slane %v2414_v1, 2  ;;  %v627_v42 = vmul.f32 %v2348_v31, %v2387_v53  ;;  %v330_v4 = vld [vmem:[%s2328_s5 + $0x24] sm:$0xe] }
  0xb9   : > { %v479_v43 = vadd.f32 %v426_v6, %v353_v7  ;;  %v626_v44 = vmul.f32 %v2387_v53, %v250_v63  ;;  %v2518_v48 = vadd.f32 %v434_v14, %v2401_v59  ;;  %v558_v52 = vrot.slane %v2436_v12, 2 }
  0xba   : > { %1739 = vmatpush3.bf16.msra.mxu0 %v2357_v37  ;;  %v665_v57 = vmul.f32 %v2348_v31, %v2397_v58  ;;  %v1178_v1 = vadd.f32 %v1124_v21, %v1053_v27  ;;  %1758 = vmatpush3.bf16.msra.mxu1 %v2357_v37  ;;  %v790_v46 = vmul.f32 %v2410_v62, %v2371_v45  ;;  %v1000_v3 = vrot.slane %v951_v25, 1 }
  0xbb   : > { %1741 = vmatprep.subr.bf16.mxu0 %v2359_v38  ;;  %v605_v50 = vadd.f32 %v552_v30, %v479_v43  ;;  %v714_v56 = vsel %vm421_vm0, %v711_v17, %v713_v22  ;;  %v913_v59 = vmul.f32 %v2361_v39, %v2446_v19  ;;  %1751 = vmatprep.subr.bf16.mxu1 %v2359_v38  ;;  %v1125_v37 = vrot.slane %v1076_v29, 2 }
  0xbc   : > { %1688 = vmatprep.mubr.f32.mxu0 %v1178_v1  ;;  %v839_v31 = vsel %vm547_vm1, %v836_v32, %v838_v24  ;;  %v377_v45 = vmul.f32 %v2353_v35, %v2363_v41  ;;  %v2539_v17 = vunpack.c.l.bf16 %v233_v26  ;;  %v503_v7 = vmul.f32 %v2355_v36, %v2363_v41 }
  0xbd   : > { %v642_v8 = vadd.f32 %v626_v44, %v605_v50  ;;  %v2545_v10 = vmul.f32 %v2361_v39, %v2397_v58  ;;  %v2547_v13 = vunpack.c.l.bf16 %v276_v2  ;;  %v2549_v32 = vunpack.c.h.bf16 %v233_v26 }
  0xbe   : > { %1743 = vmatpush3.bf16.msra.mxu0 %v2359_v38  ;;  %v428_v14 = vrot.slane %v377_v45, 1  ;;  %v2553_v16 = vmul.f32 %v2361_v39, %v2410_v62  ;;  %1759 = vmatpush3.bf16.msra.mxu1 %v2359_v38  ;;  %v2556_v20 = vunpack.c.l.bf16 %v330_v4  ;;  %v554_v21 = vrot.slane %v503_v7, 2 }
  0xbf   : > { %v767_v18 = vadd.f32 %v714_v56, %v642_v8  ;;  %v715_v41 = vrot.slane %v665_v57, 1  ;;  %v716_v24 = vrot.slane %v2545_v10, 1  ;;  %v840_v25 = vrot.slane %v790_v46, 2 }
  0xc0   : > { %v429_v22 = vsel %vm421_vm0, %v427_v5, %v428_v14  ;;  %v841_v27 = vrot.slane %v2553_v16, 2  ;;  %v1001_v38 = vsel %vm421_vm0, %v998_v51, %v1000_v3  ;;  %v555_v29 = vsel %vm547_vm1, %v553_v40, %v554_v21 }
  0xc1   : > { %v892_v6 = vadd.f32 %v839_v31, %v767_v18  ;;  %v480_v30 = vadd.f32 %v429_v22, %v2390_v54  ;;  %v1126_v49 = vsel %vm547_vm1, %v1123_v0, %v1125_v37  ;;  %v952_v5 = vmul.f32 %v2428_v9, %v2547_v13  ;;  %v278_v0 = vld [vmem:[%s2328_s5 + $0x2c] sm:$0x1] }
  0xc2   : > { %v2575_v43 = vmul.f32 %v2428_v9, %v2549_v32  ;;  %v1077_v33 = vmul.f32 %v2439_v15, %v2556_v20  ;;  %v2581_v54 = vmul.f32 %v2353_v35, %v2547_v13  ;;  %v2585_v47 = vmul.f32 %v2439_v15, %v2549_v32 }
  0xc3   : > { %v929_v44 = vadd.f32 %v913_v59, %v892_v6  ;;  %v606_v51 = vadd.f32 %v555_v29, %v480_v30  ;;  %v717_v40 = vsel %vm421_vm0, %v715_v41, %v716_v24  ;;  %v842_v57 = vsel %vm547_vm1, %v840_v25, %v841_v27  ;;  %v1617_v30 = vld [vmem:[%s2328_s5 + $0x30] sm:$0xff]  }
  0xc4   : > { %v914_v1 = vmul.f32 %v2446_v19, %v2539_v17  ;;  %v2592_v46 = vunpack.c.h.bf16 %v276_v2  ;;  %v1002_v59 = vrot.slane %v952_v5, 1  ;;  %v1003_v26 = vrot.slane %v2575_v43, 1 }
  0xc5   : > { %v1054_v50 = vadd.f32 %v1001_v38, %v929_v44  ;;  %v643_v56 = vadd.f32 %v627_v42, %v606_v51  ;;  %v1127_v31 = vrot.slane %v1077_v33, 2  ;;  %v2595_v3 = vunpack.c.l.bf16 %v278_v0  ;;  %v331_v33 = vld [vmem:[%s2328_s5 + $0x30] sm:$0xe] }
  0xc6   : > { %v378_v37 = vmul.f32 %v2353_v35, %v2451_v28  ;;  %v504_v4 = vmul.f32 %v2355_v36, %v2451_v28  ;;  %v1128_v2 = vrot.slane %v2585_v47, 2  ;;  %v355_v42 = vmul.f32 %v2351_v34, %v250_v63 }
  0xc7   : > { %v1179_v45 = vadd.f32 %v1126_v49, %v1054_v50  ;;  %v768_v8 = vadd.f32 %v717_v40, %v643_v56  ;;  %v667_v16 = vmul.f32 %v2397_v58, %v2475_v61  ;;  %v792_v18 = vmul.f32 %v2410_v62, %v2475_v61 }
  0xc8   : > { %v430_v7 = vrot.slane %v378_v37, 1  ;;  %v556_v10 = vrot.slane %v504_v4, 2  ;;  %v1004_v41 = vsel %vm421_vm0, %v1002_v59, %v1003_v26  ;;  %v954_v22 = vmul.f32 %v2428_v9, %v2595_v3 }
  0xc9   : > { %1689 = vmatmul.mubr.f32.vlgmr.msra.gmra.mrb[0].mxu0 %v1179_v45  ;;  %v893_v28 = vadd.f32 %v842_v57, %v768_v8  ;;  %v1079_v23 = vmul.f32 %v2439_v15, %v2595_v3  ;;  %v718_v6 = vrot.slane %v667_v16, 1  ;;  %v843_v38 = vrot.slane %v792_v18, 2 }
  0xca   : > { %v431_v63 = vsel %vm421_vm0, %v428_v14, %v430_v7  ;;  %v557_v25 = vsel %vm547_vm1, %v554_v21, %v556_v10  ;;  %v1129_v49 = vsel %vm547_vm1, %v1127_v31, %v1128_v2  ;;  %v628_v43 = vmul.f32 %v2361_v39, %v2387_v53 }
  0xcb   : > { %v930_v29 = vadd.f32 %v914_v1, %v893_v28  ;;  %v481_v5 = vadd.f32 %v431_v63, %v355_v42  ;;  %v719_v44 = vsel %vm421_vm0, %v716_v24, %v718_v6  ;;  %v915_v51 = vmul.f32 %v2446_v19, %v2592_v46 }
  0xcc   : > { %v1005_v47 = vrot.slane %v954_v22, 1  ;;  %v1130_v14 = vrot.slane %v1079_v23, 2  ;;  %v844_v40 = vsel %vm547_vm1, %v841_v27, %v843_v38  ;;  %v2625_v57 = vunpack.c.l.bf16 %v1617_v30 }
  0xcd   : > { %v1055_v0 = vadd.f32 %v1004_v41, %v930_v29  ;;  %v607_v21 = vadd.f32 %v557_v25, %v481_v5  ;;  %v2627_v1 = vunpack.c.h.bf16 %v1617_v30  ;;  %v2629_v50 = vunpack.c.l.bf16 %v331_v33  ;;  %v281_v30 = vld [vmem:[%s2328_s5 + $0x38] sm:$0x1] }
  0xce   : > { %v506_v56 = vmul.f32 %v2361_v39, %v2355_v36  ;;  %v668_v24 = vmul.f32 %v2397_v58, %v2547_v13  ;;  %v2637_v37 = vmul.f32 %v2397_v58, %v2549_v32  ;;  %v793_v27 = vmul.f32 %v2410_v62, %v2556_v20 }
  0xcf   : > { %v1180_v59 = vadd.f32 %v1129_v49, %v1055_v0  ;;  %v644_v31 = vadd.f32 %v628_v43, %v607_v21  ;;  %v629_v45 = vmul.f32 %v2387_v53, %v2539_v17  ;;  %v794_v39 = vmul.f32 %v2410_v62, %v2549_v32 }
  0xd0   : > { %v559_v4 = vrot.slane %v506_v56, 2  ;;  %v720_v8 = vrot.slane %v668_v24, 1  ;;  %v721_v13 = vrot.slane %v2637_v37, 1  ;;  %v845_v7 = vrot.slane %v793_v27, 2 }
  0xd1   : > { %1691 = vmatprep.mubr.f32.mxu0 %v1180_v59  ;;  %v769_v42 = vadd.f32 %v719_v44, %v644_v31  ;;  %v955_v10 = vmul.f32 %v2625_v57, %v2428_v9  ;;  %v846_v18 = vrot.slane %v794_v39, 2  ;;  %v956_v28 = vmul.f32 %v2627_v1, %v2428_v9 }
  0xd2   : > { %v560_v16 = vsel %vm547_vm1, %v558_v52, %v559_v4  ;;  %v1080_v41 = vmul.f32 %v2439_v15, %v2629_v50  ;;  %v2657_v22 = vmul.f32 %v2355_v36, %v2556_v20  ;;  %v1006_v63 = vsel %vm421_vm0, %v1003_v26, %v1005_v47 }
  0xd3   : > { %v894_v23 = vadd.f32 %v844_v40, %v769_v42  ;;  %v608_v25 = vadd.f32 %v560_v16, %v2518_v48  ;;  %v1131_v12 = vsel %vm547_vm1, %v1128_v2, %v1130_v14  ;;  %v722_v52 = vsel %vm421_vm0, %v720_v8, %v721_v13 }
  0xd4   : > { %v916_v6 = vmul.f32 %v2625_v57, %v2446_v19  ;;  %v2667_v38 = vmul.f32 %v2627_v1, %v2439_v15  ;;  %v1007_v49 = vrot.slane %v955_v10, 1  ;;  %v1008_v5 = vrot.slane %v956_v28, 1  ;;  %v2698_v10 = vld [vmem:[%s2328_s5 + $0x3c] sm:$0xff]  }
  0xd5   : > { %v931_v29 = vadd.f32 %v915_v51, %v894_v23  ;;  %v645_v20 = vadd.f32 %v629_v45, %v608_v25  ;;  %v847_v26 = vsel %vm547_vm1, %v845_v7, %v846_v18  ;;  %v1132_v43 = vrot.slane %v1080_v41, 2  ;;  %v237_v23 = vld [vmem:[%s2328_s5 + $0x3c] sm:$0xff]  }
  0xd6   : > { %v381_v48 = vmul.f32 %v2353_v35, %v2475_v61  ;;  %v507_v2 = vmul.f32 %v2355_v36, %v2475_v61  ;;  %v2675_v47 = vunpack.c.l.bf16 %v281_v30  ;;  %v670_v14 = vmul.f32 %v2397_v58, %v2595_v3 }
  0xd7   : > { %v1056_v33 = vadd.f32 %v1006_v63, %v931_v29  ;;  %v770_v44 = vadd.f32 %v722_v52, %v645_v20  ;;  %v1133_v51 = vrot.slane %v2667_v38, 2  ;;  %v795_v40 = vmul.f32 %v2410_v62, %v2595_v3 }
  0xd8   : > { %v435_v0 = vrot.slane %v381_v48, 1  ;;  %v561_v21 = vrot.slane %v507_v2, 2  ;;  %v1009_v59 = vsel %vm421_vm0, %v1007_v49, %v1008_v5  ;;  %v723_v61 = vrot.slane %v670_v14, 1 }
  0xd9   : > { %v1181_v56 = vadd.f32 %v1131_v12, %v1056_v33  ;;  %v895_v24 = vadd.f32 %v847_v26, %v770_v44  ;;  %v848_v27 = vrot.slane %v795_v40, 2  ;;  %v957_v45 = vmul.f32 %v2428_v9, %v2675_v47 }
  0xda   : > { %v436_v31 = vsel %vm421_vm0, %v433_v11, %v435_v0  ;;  %v562_v37 = vsel %vm547_vm1, %v559_v4, %v561_v21  ;;  %v630_v42 = vmul.f32 %v2387_v53, %v2592_v46  ;;  %v1082_v55 = vmul.f32 %v2439_v15, %v2675_v47 }
  0xdb   : > { %1692 = vmatmul.mubr.f32.gmra.mrb[2].mxu0 %v1181_v56  ;;  %v932_v8 = vadd.f32 %v916_v6, %v895_v24  ;;  %v483_v39 = vadd.f32 %v436_v31, %v2405_v60  ;;  %v358_v11 = vmul.f32 %v2351_v34, %v2539_v17  ;;  %v1134_v4 = vsel %vm547_vm1, %v1132_v43, %v1133_v51  ;;  %v332_v17 = vld [vmem:[%s2328_s5 + $0x3c] sm:$0xe] }
  0xdc   : > { %v1010_v7 = vrot.slane %v957_v45, 1  ;;  %v437_v16 = vrot.slane %v2581_v54, 1  ;;  %v563_v28 = vrot.slane %v2657_v22, 2  ;;  %v724_v63 = vsel %vm421_vm0, %v721_v13, %v723_v61 }
  0xdd   : > { %v1057_v41 = vadd.f32 %v1009_v59, %v932_v8  ;;  %v609_v60 = vadd.f32 %v562_v37, %v483_v39  ;;  %v849_v25 = vsel %vm547_vm1, %v846_v18, %v848_v27  ;;  %v917_v12 = vmul.f32 %v2627_v1, %v2446_v19 }
  0xde   : > { %v2710_v52 = vmul.f32 %v2353_v35, %v2549_v32  ;;  %v1135_v54 = vrot.slane %v1082_v55, 2  ;;  %v2713_v22 = vunpack.c.l.bf16 %v2698_v10  ;;  %v1011_v30 = vsel %vm421_vm0, %v1008_v5, %v1010_v7 }
  0xdf   : > { %v1182_v6 = vadd.f32 %v1134_v4, %v1057_v41  ;;  %v646_v38 = vadd.f32 %v630_v42, %v609_v60  ;;  %v2716_v29 = vunpack.c.h.bf16 %v237_v23  ;;  %v509_v18 = vmul.f32 %v2355_v36, %v2549_v32  ;;  %v284_v41 = vld [vmem:[%s2328_s5 + $0x44] sm:$0x1] }
  0xe0   : > { %v438_v13 = vrot.slane %v2710_v52, 1  ;;  %v2721_v49 = vunpack.c.l.bf16 %v332_v17  ;;  %v671_v26 = vmul.f32 %v2625_v57, %v2397_v58  ;;  %v2727_v43 = vmul.f32 %v2627_v1, %v2397_v58 }
  0xe1   : > { %1694 = vmatprep.mubr.f32.mxu0 %v1182_v6  ;;  %v771_v20 = vadd.f32 %v724_v63, %v646_v38  ;;  %v564_v48 = vrot.slane %v509_v18, 2  ;;  %v631_v2 = vmul.f32 %v2625_v57, %v2387_v53  ;;  %v796_v32 = vmul.f32 %v2410_v62, %v2629_v50 }
  0xe2   : > { %v439_v5 = vsel %vm421_vm0, %v437_v16, %v438_v13  ;;  %v725_v14 = vrot.slane %v671_v26, 1  ;;  %v726_v0 = vrot.slane %v2727_v43, 1  ;;  %v1136_v21 = vsel %vm547_vm1, %v1133_v51, %v1135_v54 }
  0xe3   : > { %v896_v33 = vadd.f32 %v849_v25, %v771_v20  ;;  %v484_v44 = vadd.f32 %v439_v5, %v358_v11  ;;  %v565_v40 = vsel %vm547_vm1, %v563_v28, %v564_v48  ;;  %v2739_v56 = vmul.f32 %v2627_v1, %v2410_v62 }
  0xe4   : > { %v850_v24 = vrot.slane %v796_v32, 2  ;;  %v727_v31 = vsel %vm421_vm0, %v725_v14, %v726_v0  ;;  %v958_v37 = vmul.f32 %v2428_v9, %v2713_v22  ;;  %v2747_v51 = vmul.f32 %v2428_v9, %v2716_v29 }
  0xe5   : > { %v933_v59 = vadd.f32 %v917_v12, %v896_v33  ;;  %v610_v61 = vadd.f32 %v565_v40, %v484_v44  ;;  %v851_v27 = vrot.slane %v2739_v56, 2  ;;  %v1083_v45 = vmul.f32 %v2439_v15, %v2721_v49 }
  0xe6   : > { %v2753_v8 = vmul.f32 %v2439_v15, %v2716_v29  ;;  %v359_v39 = vmul.f32 %v2351_v34, %v2592_v46  ;;  %v2757_v55 = vunpack.c.l.bf16 %v237_v23  ;;  %v2761_v4 = vmul.f32 %v2353_v35, %v2713_v22 }
  0xe7   : > { %v1058_v42 = vadd.f32 %v1011_v30, %v933_v59  ;;  %v647_v11 = vadd.f32 %v631_v2, %v610_v61  ;;  %v852_v7 = vsel %vm547_vm1, %v850_v24, %v851_v27  ;;  %v1012_v16 = vrot.slane %v958_v37, 1  ;;  %v1618_v59 = vld [vmem:[%s2328_s5 + $0x48] sm:$0xff]  }
  0xe8   : > { %v1013_v28 = vrot.slane %v2747_v51, 1  ;;  %v2768_v63 = vmul.f32 %v2355_v36, %v2721_v49  ;;  %v918_v23 = vmul.f32 %v2446_v19, %v2757_v55  ;;  %v1137_v25 = vrot.slane %v1083_v45, 2 }
  0xe9   : > { %v1183_v60 = vadd.f32 %v1136_v21, %v1058_v42  ;;  %v772_v46 = vadd.f32 %v727_v31, %v647_v11  ;;  %v1138_v12 = vrot.slane %v2753_v8, 2  ;;  %v384_v17 = vmul.f32 %v2353_v35, %v2595_v3 }
  0xea   : > { %v510_v52 = vmul.f32 %v2355_v36, %v2595_v3  ;;  %v2777_v38 = vunpack.c.l.bf16 %v284_v41  ;;  %v673_v54 = vmul.f32 %v2397_v58, %v2675_v47  ;;  %v798_v30 = vmul.f32 %v2410_v62, %v2675_v47 }
  0xeb   : > { %1695 = vmatmul.mubr.f32.gmra.mrb[4].mxu0 %v1183_v60  ;;  %v897_v6 = vadd.f32 %v852_v7, %v772_v46  ;;  %v1014_v18 = vsel %vm421_vm0, %v1012_v16, %v1013_v28  ;;  %v2785_v20 = vunpack.c.h.bf16 %v2698_v10  ;;  %v440_v26 = vrot.slane %v384_v17, 1  ;;  %v333_v60 = vld [vmem:[%s2328_s5 + $0x48] sm:$0xe] }
  0xec   : > { %v566_v43 = vrot.slane %v510_v52, 2  ;;  %v2789_v3 = vmul.f32 %v2627_v1, %v2351_v34  ;;  %v2793_v5 = vmul.f32 %v2351_v34, %v2757_v55  ;;  %v960_v32 = vmul.f32 %v2428_v9, %v2777_v38 }
  0xed   : > { %v934_v2 = vadd.f32 %v918_v23, %v897_v6  ;;  %v1139_v33 = vsel %vm547_vm1, %v1137_v25, %v1138_v12  ;;  %v441_v44 = vsel %vm421_vm0, %v438_v13, %v440_v26  ;;  %v728_v14 = vrot.slane %v673_v54, 1 }
  0xee   : > { %v567_v10 = vsel %vm547_vm1, %v564_v48, %v566_v43  ;;  %v485_v40 = vadd.f32 %v441_v44, %v359_v39  ;;  %v632_v56 = vmul.f32 %v2627_v1, %v2387_v53  ;;  %v853_v24 = vrot.slane %v798_v30, 2 }
  0xef   : > { %v1059_v21 = vadd.f32 %v1014_v18, %v934_v2  ;;  %v447_v61 = vrot.slane %v2761_v4, 1  ;;  %v573_v31 = vrot.slane %v2768_v63, 2  ;;  %v2807_v37 = vmul.f32 %v2351_v34, %v2785_v20 }
  0xf0   : > { %v1085_v13 = vmul.f32 %v2439_v15, %v2777_v38  ;;  %v611_v51 = vadd.f32 %v567_v10, %v485_v40  ;;  %v919_v45 = vmul.f32 %v2446_v19, %v2785_v20  ;;  %v1015_v8 = vrot.slane %v960_v32, 1 }
  0xf1   : > { %v1184_v48 = vadd.f32 %v1139_v33, %v1059_v21  ;;  %v729_v39 = vsel %vm421_vm0, %v726_v0, %v728_v14  ;;  %v2814_v42 = vunpack.c.l.bf16 %v1618_v59  ;;  %v385_v11 = vmul.f32 %v2625_v57, %v2353_v35 }
  0xf2   : > { %v2820_v7 = vmul.f32 %v2627_v1, %v2353_v35  ;;  %v648_v16 = vadd.f32 %v632_v56, %v611_v51  ;;  %v854_v41 = vsel %vm547_vm1, %v851_v27, %v853_v24  ;;  %v360_v46 = vmul.f32 %v2625_v57, %v2351_v34 }
  0xf3   : > { %1697 = vmatprep.mubr.f32.mxu0 %v1184_v48  ;;  %v511_v0 = vmul.f32 %v2355_v36, %v2629_v50  ;;  %v1140_v23 = vrot.slane %v1085_v13, 2  ;;  %v442_v25 = vrot.slane %v385_v11, 1  ;;  %v2831_v52 = vmul.f32 %v2627_v1, %v2355_v36 }
  0xf4   : > { %v443_v17 = vrot.slane %v2820_v7, 1  ;;  %v773_v6 = vadd.f32 %v729_v39, %v648_v16  ;;  %v1016_v54 = vsel %vm421_vm0, %v1013_v28, %v1015_v8  ;;  %v2834_v30 = vunpack.c.h.bf16 %v1618_v59 }
  0xf5   : > { %v568_v27 = vrot.slane %v511_v0, 2  ;;  %v2836_v18 = vunpack.c.l.bf16 %v333_v60  ;;  %v391_v57 = vmul.f32 %v2814_v42, %v2353_v35  ;;  %v569_v26 = vrot.slane %v2831_v52, 2 }
  0xf6   : > { %v444_v50 = vsel %vm421_vm0, %v442_v25, %v443_v17  ;;  %v898_v43 = vadd.f32 %v854_v41, %v773_v6  ;;  %v364_v1 = vmul.f32 %v2814_v42, %v2351_v34  ;;  %v633_v28 = vmul.f32 %v2387_v53, %v2757_v55  ;;  %v287_v25 = vld [vmem:[%s2328_s5 + $0x50] sm:$0x1] }
  0xf7   : > { %v486_v2 = vadd.f32 %v444_v50, %v360_v46  ;;  %v1141_v32 = vsel %vm547_vm1, %v1138_v12, %v1140_v23  ;;  %v570_v33 = vsel %vm547_vm1, %v568_v27, %v569_v26  ;;  %v674_v44 = vmul.f32 %v2397_v58, %v2713_v22 }
  0xf8   : > { %v2852_v10 = vmul.f32 %v2397_v58, %v2716_v29  ;;  %v935_v14 = vadd.f32 %v919_v45, %v898_v43  ;;  %v2856_v21 = vmul.f32 %v2834_v30, %v2353_v35  ;;  %v799_v55 = vmul.f32 %v2410_v62, %v2721_v49 }
  0xf9   : > { %v612_v40 = vadd.f32 %v570_v33, %v486_v2  ;;  %v452_v56 = vrot.slane %v391_v57, 1  ;;  %v730_v12 = vrot.slane %v674_v44, 1  ;;  %v800_v22 = vmul.f32 %v2410_v62, %v2716_v29 }
  0xfa   : > { %v731_v24 = vrot.slane %v2852_v10, 1  ;;  %v1060_v59 = vadd.f32 %v1016_v54, %v935_v14  ;;  %v855_v48 = vrot.slane %v799_v55, 2  ;;  %v920_v51 = vmul.f32 %v2814_v42, %v2446_v19 }
  0xfb   : > { %v649_v13 = vadd.f32 %v633_v28, %v612_v40  ;;  %v856_v8 = vrot.slane %v800_v22, 2  ;;  %v961_v49 = vmul.f32 %v2814_v42, %v2428_v9  ;;  %v2870_v39 = vmul.f32 %v2834_v30, %v2428_v9 }
  0xfc   : > { %v732_v45 = vsel %vm421_vm0, %v730_v12, %v731_v24  ;;  %v1185_v11 = vadd.f32 %v1141_v32, %v1060_v59  ;;  %v1086_v16 = vmul.f32 %v2439_v15, %v2836_v18  ;;  %v2876_v41 = vmul.f32 %v2834_v30, %v2439_v15 }
  0xfd   : > { %v774_v7 = vadd.f32 %v732_v45, %v649_v13  ;;  %v453_v60 = vrot.slane %v2856_v21, 1  ;;  %v857_v46 = vsel %vm547_vm1, %v855_v48, %v856_v8  ;;  %v1017_v0 = vrot.slane %v961_v49, 1 }
  0xfe   : > { %v1018_v23 = vrot.slane %v2870_v39, 1  ;;  %1698 = vmatmul.mubr.f32.gmra.mrb[6].mxu0 %v1185_v11  ;;  %v1142_v6 = vrot.slane %v1086_v16, 2  ;;  %v1143_v54 = vrot.slane %v2876_v41, 2  ;;  %v387_v27 = vmul.f32 %v2353_v35, %v2675_v47  ;;  %v288_v16 = vld [vmem:[%s2328_s5 + $0x54] sm:$0xff]  }
  0xff   : > { %v899_v52 = vadd.f32 %v857_v46, %v774_v7  ;;  %v2887_v57 = vmul.f32 %v2355_v36, %v2836_v18  ;;  %v513_v43 = vmul.f32 %v2355_v36, %v2675_v47  ;;  %v676_v2 = vmul.f32 %v2397_v58, %v2777_v38 }
 0x100   : > { %v1019_v50 = vsel %vm421_vm0, %v1017_v0, %v1018_v23  ;;  %v2896_v32 = vunpack.c.l.bf16 %v287_v25  ;;  %v445_v33 = vrot.slane %v387_v27, 1  ;;  %v801_v44 = vmul.f32 %v2410_v62, %v2777_v38 }
 0x101   : > { %v936_v28 = vadd.f32 %v920_v51, %v899_v52  ;;  %v2902_v10 = vmul.f32 %v2834_v30, %v2351_v34  ;;  %v454_v14 = vsel %vm421_vm0, %v452_v56, %v453_v60  ;;  %v1144_v47 = vsel %vm547_vm1, %v1142_v6, %v1143_v54  ;;  %v241_v52 = vld [vmem:[%s2328_s5 + $0x54] sm:$0xff]  }
 0x102   : > { %v571_v40 = vrot.slane %v513_v43, 2  ;;  %v446_v12 = vsel %vm421_vm0, %v443_v17, %v445_v33  ;;  %v733_v22 = vrot.slane %v676_v2, 1  ;;  %v963_v59 = vmul.f32 %v2428_v9, %v2896_v32  ;;  %v334_v43 = vld [vmem:[%s2328_s5 + $0x54] sm:$0xe] }
 0x103   : > { %v1061_v55 = vadd.f32 %v1019_v50, %v936_v28  ;;  %v487_v13 = vadd.f32 %v446_v12, %v2789_v3  ;;  %v634_v56 = vmul.f32 %v2387_v53, %v2785_v20  ;;  %v858_v51 = vrot.slane %v801_v44, 2 }
 0x104   : > { %v572_v48 = vsel %vm547_vm1, %v569_v26, %v571_v40  ;;  %v578_v45 = vrot.slane %v2887_v57, 2  ;;  %v635_v49 = vmul.f32 %v2814_v42, %v2387_v53  ;;  %v1088_v17 = vmul.f32 %v2439_v15, %v2896_v32 }
 0x105   : > { %v1186_v11 = vadd.f32 %v1144_v47, %v1061_v55  ;;  %v2922_v7 = vadd.f32 %v454_v14, %v364_v1  ;;  %v677_v3 = vmul.f32 %v2814_v42, %v2397_v58  ;;  %v802_v26 = vmul.f32 %v2410_v62, %v2836_v18 }
 0x106   : > { %v613_v20 = vadd.f32 %v572_v48, %v487_v13  ;;  %v734_v46 = vsel %vm421_vm0, %v731_v24, %v733_v22  ;;  %v921_v0 = vmul.f32 %v2834_v30, %v2446_v19  ;;  %v1020_v25 = vrot.slane %v963_v59, 1 }
 0x107   : > { %1700 = vmatprep.mubr.f32.mxu1 %v1186_v11  ;;  %v389_v1 = vmul.f32 %v2353_v35, %v2716_v29  ;;  %v859_v42 = vsel %vm547_vm1, %v856_v8, %v858_v51  ;;  %v515_v27 = vmul.f32 %v2355_v36, %v2716_v29  ;;  %v2940_v18 = vmul.f32 %v2834_v30, %v2397_v58 }
 0x108   : > { %v650_v6 = vadd.f32 %v634_v56, %v613_v20  ;;  %v1145_v50 = vrot.slane %v1088_v17, 2  ;;  %v2942_v24 = vunpack.c.l.bf16 %v288_v16  ;;  %v2947_v28 = vmul.f32 %v2834_v30, %v2410_v62 }
 0x109   : > { %v448_v2 = vrot.slane %v389_v1, 1  ;;  %v2949_v44 = vunpack.c.h.bf16 %v241_v52  ;;  %v574_v8 = vrot.slane %v515_v27, 2  ;;  %v735_v14 = vrot.slane %v677_v3, 1 }
 0x10a   : > { %v775_v33 = vadd.f32 %v734_v46, %v650_v6  ;;  %v736_v47 = vrot.slane %v2940_v18, 1  ;;  %v860_v40 = vrot.slane %v802_v26, 2  ;;  %v861_v55 = vrot.slane %v2947_v28, 2 }
 0x10b   : > { %v449_v29 = vsel %vm421_vm0, %v447_v61, %v448_v2  ;;  %v2956_v22 = vunpack.c.l.bf16 %v334_v43  ;;  %v575_v13 = vsel %vm547_vm1, %v573_v31, %v574_v8  ;;  %v1021_v4 = vsel %vm421_vm0, %v1018_v23, %v1020_v25  ;;  %v290_v31 = vld [vmem:[%s2328_s5 + $0x5c] sm:$0x1] }
 0x10c   : > { %v900_v12 = vadd.f32 %v859_v42, %v775_v33  ;;  %v488_v59 = vadd.f32 %v449_v29, %v2793_v5  ;;  %v2965_v61 = vunpack.c.l.bf16 %v241_v52  ;;  %v964_v48 = vmul.f32 %v2428_v9, %v2942_v24 }
 0x10d   : > { %v2971_v56 = vmul.f32 %v2428_v9, %v2949_v44  ;;  %v1089_v63 = vmul.f32 %v2439_v15, %v2956_v22  ;;  %v2977_v5 = vmul.f32 %v2439_v15, %v2949_v44  ;;  %v1146_v39 = vsel %vm547_vm1, %v1143_v54, %v1145_v50 }
 0x10e   : > { %v937_v51 = vadd.f32 %v921_v0, %v900_v12  ;;  %v614_v11 = vadd.f32 %v575_v13, %v488_v59  ;;  %v737_v23 = vsel %vm421_vm0, %v735_v14, %v736_v47  ;;  %v862_v17 = vsel %vm547_vm1, %v860_v40, %v861_v55 }
 0x10f   : > { %v922_v3 = vmul.f32 %v2446_v19, %v2965_v61  ;;  %v1022_v46 = vrot.slane %v964_v48, 1  ;;  %v1023_v0 = vrot.slane %v2971_v56, 1  ;;  %v2988_v25 = vunpack.c.h.bf16 %v288_v16  ;;  %v3016_v48 = vld [vmem:[#allocation4 + $0x1] ss:$0 sm:$0xff] }
 0x110   : > { %v1062_v26 = vadd.f32 %v1021_v4, %v937_v51  ;;  %v651_v20 = vadd.f32 %v635_v49, %v614_v11  ;;  %v2990_v52 = vunpack.c.l.bf16 %v290_v31  ;;  %v390_v41 = vmul.f32 %v2353_v35, %v2777_v38  ;;  %v1619_v4 = vld [vmem:[%s2328_s5 + $0x60] sm:$0xff]  }
 0x111   : > { %v516_v54 = vmul.f32 %v2355_v36, %v2777_v38  ;;  %v1147_v42 = vrot.slane %v1089_v63, 2  ;;  %v1148_v27 = vrot.slane %v2977_v5, 2  ;;  %v679_v16 = vmul.f32 %v2397_v58, %v2896_v32 }
 0x112   : > { %v1187_v1 = vadd.f32 %v1146_v39, %v1062_v26  ;;  %v776_v6 = vadd.f32 %v737_v23, %v651_v20  ;;  %v450_v18 = vrot.slane %v390_v41, 1  ;;  %v804_v50 = vmul.f32 %v2410_v62, %v2896_v32 }
 0x113   : > { %v576_v49 = vrot.slane %v516_v54, 2  ;;  %v1024_v35 = vsel %vm421_vm0, %v1022_v46, %v1023_v0  ;;  %v966_v36 = vmul.f32 %v2428_v9, %v2990_v52  ;;  %v1091_v38 = vmul.f32 %v2439_v15, %v2990_v52 }
 0x114   : > { %1701 = vmatmul.mubr.f32.vlgmr.msra.gmra.mrb[0].mxu1 %v1187_v1  ;;  %v901_v43 = vadd.f32 %v862_v17, %v776_v6  ;;  %v451_v28 = vsel %vm421_vm0, %v448_v2, %v450_v18  ;;  %v738_v14 = vrot.slane %v679_v16, 1  ;;  %v863_v29 = vrot.slane %v804_v50, 2 }
 0x115   : > { %v577_v33 = vsel %vm547_vm1, %v574_v8, %v576_v49  ;;  %v3010_v40 = vmul.f32 %v2351_v34, %v2965_v61  ;;  %v489_v59 = vadd.f32 %v451_v28, %v2807_v37  ;;  %v636_v13 = vmul.f32 %v2834_v30, %v2387_v53  ;;  %v3022_v8 = vld [vmem:[#allocation4 + $0x2] ss:$0 sm:$0xff] }
 0x116   : > { %v938_v12 = vadd.f32 %v922_v3, %v901_v43  ;;  %v3020_v2 = vmul.f32 %v3016_v48, %v2942_v24  ;;  %v3026_v56 = vmul.f32 %v3022_v8, %v2956_v22  ;;  %v1149_v34 = vsel %vm547_vm1, %v1147_v42, %v1148_v27 }
 0x117   : > { %v923_v37 = vmul.f32 %v2446_v19, %v2988_v25  ;;  %v615_v51 = vadd.f32 %v577_v33, %v489_v59  ;;  %v1025_v11 = vrot.slane %v966_v36, 1  ;;  %v1150_v63 = vrot.slane %v1091_v38, 2  ;;  %v293_v38 = vld [vmem:[%s2328_s5 + $0x68] sm:$0x1] }
 0x118   : > { %v1063_v53 = vadd.f32 %v1024_v35, %v938_v12  ;;  %v739_v5 = vsel %vm421_vm0, %v736_v47, %v738_v14  ;;  %v864_v31 = vsel %vm547_vm1, %v861_v55, %v863_v29  ;;  %v3033_v39 = vunpack.c.l.bf16 %v1619_v4  ;;  %v3048_v47 = vld [vmem:[%s2328_s5 + $0x60] sm:$0xe] }
 0x119   : > { %v3037_v23 = vmul.f32 %v3022_v8, %v2834_v30  ;;  %v652_v3 = vadd.f32 %v636_v13, %v615_v51  ;;  %v680_v26 = vmul.f32 %v2397_v58, %v2942_v24  ;;  %v3043_v20 = vmul.f32 %v2397_v58, %v2949_v44  ;;  %v3057_v24 = vld [vmem:[#allocation4 + $0x3] ss:$0 sm:$0xff] }
 0x11a   : > { %v1188_v17 = vadd.f32 %v1149_v34, %v1063_v53  ;;  %v3045_v46 = vunpack.c.h.bf16 %v1619_v4  ;;  %v805_v41 = vmul.f32 %v2410_v62, %v2956_v22  ;;  %v3055_v30 = vmul.f32 %v2410_v62, %v2949_v44 }
 0x11b   : > { %v579_v55 = vrot.slane %v3037_v23, 2  ;;  %v777_v54 = vadd.f32 %v739_v5, %v652_v3  ;;  %v637_v58 = vmul.f32 %v3057_v24, %v2965_v61  ;;  %v740_v1 = vrot.slane %v680_v26, 1  ;;  %v3105_v5 = vld [vmem:[#allocation4 + $0x4] ss:$0 sm:$0xff] }
 0x11c   : > { %1703 = vmatprep.mubr.f32.mxu1 %v1188_v17  ;;  %v741_v6 = vrot.slane %v3043_v20, 1  ;;  %v1026_v42 = vsel %vm421_vm0, %v1023_v0, %v1025_v11  ;;  %v865_v18 = vrot.slane %v805_v41, 2  ;;  %v866_v62 = vrot.slane %v3055_v30, 2 }
 0x11d   : > { %v580_v22 = vsel %vm547_vm1, %v578_v45, %v579_v55  ;;  %v902_v49 = vadd.f32 %v864_v31, %v777_v54  ;;  %v1151_v16 = vsel %vm547_vm1, %v1148_v27, %v1150_v63  ;;  %v345_v50 = vunpack.c.l.bf16 %v3048_v47  ;;  %v3122_v54 = vld [vmem:[#allocation4 + $0x8] ss:$0 sm:$0xff] }
 0x11e   : > { %v616_v61 = vadd.f32 %v580_v22, %v2922_v7  ;;  %v742_v43 = vsel %vm421_vm0, %v740_v1, %v741_v6  ;;  %v867_v0 = vsel %vm547_vm1, %v865_v18, %v866_v62  ;;  %v967_v57 = vmul.f32 %v3033_v39, %v2428_v9 }
 0x11f   : > { %v3078_v45 = vmul.f32 %v3045_v46, %v2428_v9  ;;  %v939_v35 = vadd.f32 %v923_v37, %v902_v49  ;;  %v1092_v27 = vmul.f32 %v2439_v15, %v345_v50  ;;  %v3083_v7 = vmul.f32 %v3045_v46, %v2439_v15 }
 0x120   : > { %v653_v36 = vadd.f32 %v637_v58, %v616_v61  ;;  %v924_v28 = vmul.f32 %v3033_v39, %v2446_v19  ;;  %v1027_v33 = vrot.slane %v967_v57, 1  ;;  %v393_v29 = vmul.f32 %v3016_v48, %v2896_v32 }
 0x121   : > { %v1028_v14 = vrot.slane %v3078_v45, 1  ;;  %v1064_v9 = vadd.f32 %v1026_v42, %v939_v35  ;;  %v1152_v59 = vrot.slane %v1092_v27, 2  ;;  %v1153_v13 = vrot.slane %v3083_v7, 2  ;;  %v3140_v35 = vld [vmem:[#allocation4 + $0x6] ss:$0 sm:$0xff] }
 0x122   : > { %v778_v12 = vadd.f32 %v742_v43, %v653_v36  ;;  %v457_v4 = vrot.slane %v3020_v2, 1  ;;  %v3093_v34 = vunpack.c.l.bf16 %v293_v38  ;;  %v455_v15 = vrot.slane %v393_v29, 1  ;;  %v245_v43 = vld [vmem:[%s2328_s5 + $0x6c] sm:$0xff]  }
 0x123   : > { %v519_v37 = vmul.f32 %v3022_v8, %v2896_v32  ;;  %v1189_v19 = vadd.f32 %v1151_v16, %v1064_v9  ;;  %v1029_v51 = vsel %vm421_vm0, %v1027_v33, %v1028_v14  ;;  %v638_v11 = vmul.f32 %v3057_v24, %v2988_v25  ;;  %v3109_v32 = vld [vmem:[#allocation4 + $0x5] ss:$0 sm:$0xff]  ;;  %v336_v27 = vld [vmem:[%s2328_s5 + $0x6c] sm:$0xe] }
 0x124   : > { %v903_v53 = vadd.f32 %v867_v0, %v778_v12  ;;  %v456_v63 = vsel %vm421_vm0, %v453_v60, %v455_v15  ;;  %v682_v31 = vmul.f32 %v3105_v5, %v2990_v52  ;;  %v807_v23 = vmul.f32 %v3109_v32, %v2990_v52  ;;  %v3117_v60 = vld [vmem:[#allocation4 + $0x7] ss:$0 sm:$0xff]  ;;  %v3138_v0 = vld [vmem:[%s2328_s5 + $0x6c] sm:$0xff]  }
 0x125   : > { %v581_v2 = vrot.slane %v519_v37, 2  ;;  %1704 = vmatmul.mubr.f32.gmra.mrb[2].mxu1 %v1189_v19  ;;  %v1154_v3 = vsel %vm547_vm1, %v1152_v59, %v1153_v13  ;;  %v491_v21 = vadd.f32 %v456_v63, %v2902_v10  ;;  %v969_v26 = vmul.f32 %v3117_v60, %v3093_v34  ;;  %v1868_v10 = vld [vmem:[#allocation4] ss:$0 sm:$0xff] }
 0x126   : > { %v940_v17 = vadd.f32 %v924_v28, %v903_v53  ;;  %v743_v47 = vrot.slane %v682_v31, 1  ;;  %v868_v41 = vrot.slane %v807_v23, 2  ;;  %v1094_v58 = vmul.f32 %v3122_v54, %v3093_v34 }
 0x127   : > { %v582_v20 = vsel %vm547_vm1, %v579_v55, %v581_v2  ;;  %v583_v1 = vrot.slane %v3026_v56, 2  ;;  %v3128_v42 = vmul.f32 %v1868_v10, %v2988_v25  ;;  %v639_v49 = vmul.f32 %v3057_v24, %v3033_v39 }
 0x128   : > { %v1065_v22 = vadd.f32 %v1029_v51, %v940_v17  ;;  %v617_v18 = vadd.f32 %v582_v20, %v491_v21  ;;  %v683_v55 = vmul.f32 %v3105_v5, %v3033_v39  ;;  %v808_v16 = vmul.f32 %v3109_v32, %v345_v50 }
 0x129   : > { %v744_v61 = vsel %vm421_vm0, %v741_v6, %v743_v47  ;;  %v925_v25 = vmul.f32 %v3140_v35, %v3045_v46  ;;  %v1030_v36 = vrot.slane %v969_v26, 1  ;;  %v869_v39 = vsel %vm547_vm1, %v866_v62, %v868_v41 }
 0x12a   : > { %v1190_v56 = vadd.f32 %v1154_v3, %v1065_v22  ;;  %v654_v57 = vadd.f32 %v638_v11, %v617_v18  ;;  %v1155_v38 = vrot.slane %v1094_v58, 2  ;;  %v395_v6 = vmul.f32 %v3016_v48, %v2949_v44  ;;  %v296_v3 = vld [vmem:[%s2328_s5 + $0x74] sm:$0x1] }
 0x12b   : > { %v521_v50 = vmul.f32 %v3022_v8, %v2949_v44  ;;  %v324_v33 = vunpack.c.l.bf16 %v3138_v0  ;;  %v325_v29 = vunpack.c.h.bf16 %v245_v43  ;;  %v684_v9 = vmul.f32 %v3105_v5, %v3045_v46 }
 0x12c   : > { %1706 = vmatprep.mubr.f32.mxu1 %v1190_v56  ;;  %v779_v28 = vadd.f32 %v744_v61, %v654_v57  ;;  %v346_v12 = vunpack.c.l.bf16 %v336_v27  ;;  %v458_v30 = vrot.slane %v395_v6, 1  ;;  %v809_v62 = vmul.f32 %v3109_v32, %v3045_v46 }
 0x12d   : > { %v584_v59 = vrot.slane %v521_v50, 2  ;;  %v745_v15 = vrot.slane %v683_v55, 1  ;;  %v870_v37 = vrot.slane %v808_v16, 2  ;;  %v746_v53 = vrot.slane %v684_v9, 1 }
 0x12e   : > { %v904_v19 = vadd.f32 %v869_v39, %v779_v28  ;;  %v640_v44 = vmul.f32 %v3057_v24, %v3045_v46  ;;  %v1031_v51 = vsel %vm421_vm0, %v1028_v14, %v1030_v36  ;;  %v459_v11 = vsel %vm421_vm0, %v457_v4, %v458_v30 }
 0x12f   : > { %v585_v63 = vsel %vm547_vm1, %v583_v1, %v584_v59  ;;  %v1156_v31 = vsel %vm547_vm1, %v1153_v13, %v1155_v38  ;;  %v265_v23 = vunpack.c.l.bf16 %v245_v43  ;;  %v492_v17 = vadd.f32 %v459_v11, %v3010_v40 }
 0x130   : > { %v941_v2 = vadd.f32 %v925_v25, %v904_v19  ;;  %v871_v21 = vrot.slane %v809_v62, 2  ;;  %v970_v46 = vmul.f32 %v3117_v60, %v324_v33  ;;  %v971_v24 = vmul.f32 %v3117_v60, %v325_v29 }
 0x131   : > { %v1095_v45 = vmul.f32 %v3122_v54, %v346_v12  ;;  %v618_v4 = vadd.f32 %v585_v63, %v492_v17  ;;  %v747_v26 = vsel %vm421_vm0, %v745_v15, %v746_v53  ;;  %v396_v7 = vmul.f32 %v3016_v48, %v2990_v52 }
 0x132   : > { %v1066_v14 = vadd.f32 %v1031_v51, %v941_v2  ;;  %v1096_v13 = vmul.f32 %v3122_v54, %v325_v29  ;;  %v326_v20 = vunpack.c.l.bf16 %v296_v3  ;;  %v522_v40 = vmul.f32 %v3022_v8, %v2990_v52 }
 0x133   : > { %v685_v47 = vmul.f32 %v3105_v5, %v3093_v34  ;;  %v655_v58 = vadd.f32 %v639_v49, %v618_v4  ;;  %v460_v1 = vrot.slane %v396_v7, 1  ;;  %v810_v10 = vmul.f32 %v3109_v32, %v3093_v34 }
 0x134   : > { %v1191_v41 = vadd.f32 %v1156_v31, %v1066_v14  ;;  %v872_v22 = vsel %vm547_vm1, %v870_v37, %v871_v21  ;;  %v1032_v18 = vrot.slane %v970_v46, 1  ;;  %v1033_v55 = vrot.slane %v971_v24, 1 }
 0x135   : > { %v586_v48 = vrot.slane %v522_v40, 2  ;;  %v780_v16 = vadd.f32 %v747_v26, %v655_v58  ;;  %v926_v61 = vmul.f32 %v3140_v35, %v265_v23  ;;  %v461_v52 = vsel %vm421_vm0, %v458_v30, %v460_v1 }
 0x136   : > { %1707 = vmatmul.mubr.f32.gmra.mrb[4].mxu1 %v1191_v41  ;;  %v748_v8 = vrot.slane %v685_v47, 1  ;;  %v1157_v43 = vrot.slane %v1095_v45, 2  ;;  %v1158_v5 = vrot.slane %v1096_v13, 2  ;;  %v493_v49 = vadd.f32 %v461_v52, %v3128_v42 }
 0x137   : > { %v587_v56 = vsel %vm547_vm1, %v584_v59, %v586_v48  ;;  %v905_v57 = vadd.f32 %v872_v22, %v780_v16  ;;  %v873_v34 = vrot.slane %v810_v10, 2  ;;  %v972_v32 = vmul.f32 %v3117_v60, %v326_v20 }
 0x138   : > { %v1034_v25 = vsel %vm421_vm0, %v1032_v18, %v1033_v55  ;;  %v266_v36 = vunpack.c.h.bf16 %v3138_v0  ;;  %v619_v27 = vadd.f32 %v587_v56, %v493_v49  ;;  %v749_v38 = vsel %vm421_vm0, %v746_v53, %v748_v8 }
 0x139   : > { %v942_v39 = vadd.f32 %v926_v61, %v905_v57  ;;  %v1097_v6 = vmul.f32 %v3122_v54, %v326_v20  ;;  %v1159_v50 = vsel %vm547_vm1, %v1157_v43, %v1158_v5  ;;  %v874_v33 = vsel %vm547_vm1, %v871_v21, %v873_v34 }
 0x13a   : > { %v656_v28 = vadd.f32 %v640_v44, %v619_v27  ;;  %v1035_v29 = vrot.slane %v972_v32, 1  ;;  %v927_v60 = vmul.f32 %v3140_v35, %v266_v36 }
 0x13b   : > { %v1067_v42 = vadd.f32 %v1034_v25, %v942_v39  ;;  %v1160_v30 = vrot.slane %v1097_v6, 2 }
 0x13c   : > { %v781_v9 = vadd.f32 %v749_v38, %v656_v28  ;;  %v1036_v0 = vsel %vm421_vm0, %v1033_v55, %v1035_v29 }
 0x13d   : > { %v1192_v12 = vadd.f32 %v1159_v50, %v1067_v42  ;;  %v1161_v15 = vsel %vm547_vm1, %v1158_v5, %v1160_v30 }
 0x13e   : > { %v906_v59 = vadd.f32 %v874_v33, %v781_v9 }
 0x13f   : > { %1709 = vmatprep.mubr.f32.mxu1 %v1192_v12 }
 0x140   : > { %v943_v62 = vadd.f32 %v927_v60, %v906_v59 }
 0x142   : > { %v1068_v54 = vadd.f32 %v1036_v0, %v943_v62 }
 0x144   : > { %v1193_v37 = vadd.f32 %v1161_v15, %v1068_v54 }
 0x146   : > { %1710 = vmatmul.mubr.f32.gmra.mrb[6].mxu1 %v1193_v37 }
 0x19c   : > { %v1690_v19 = vpop.f32.mrb[0].mxu0 }
 0x19d   : > { %v1377_v53 = vmul.f32 %v1690_v19, %v1690_v19  ;;  %v1276_v44 = vpop.f32.mrb[1].mxu0 }
 0x19e   : > { %v1355_v51 = vadd.f32 %v1690_v19, %v1276_v44  ;;  %v1376_v11 = vmul.f32 %v1276_v44, %v1276_v44 }
 0x1a0   : > { %v1392_v63 = vadd.f32 %v1377_v53, %v1376_v11 }
 0x1ae   : > { %v1693_v2 = vpop.f32.mrb[2].mxu0 }
 0x1af   : > { %v1286_v35 = vpop.f32.mrb[3].mxu0  ;;  %v1379_v17 = vmul.f32 %v1693_v2, %v1693_v2 }
 0x1b0   : > { %v1356_v31 = vadd.f32 %v1355_v51, %v1286_v35  ;;  %v1378_v23 = vmul.f32 %v1286_v35, %v1286_v35 }
 0x1b2   : > { %v1393_v3 = vadd.f32 %v1392_v63, %v1378_v23  ;;  %v1357_v21 = vadd.f32 %v1693_v2, %v1356_v31 }
 0x1b4   : > { %v1394_v46 = vadd.f32 %v1393_v3, %v1379_v17 }
 0x1be   : > { %v1696_v24 = vpop.f32.mrb[4].mxu0 }
 0x1bf   : > { %v1296_v45 = vpop.f32.mrb[5].mxu0  ;;  %v1381_v26 = vmul.f32 %v1696_v24, %v1696_v24 }
 0x1c0   : > { %v1358_v14 = vadd.f32 %v1357_v21, %v1296_v45  ;;  %v1380_v4 = vmul.f32 %v1296_v45, %v1296_v45 }
 0x1c2   : > { %v1395_v7 = vadd.f32 %v1394_v46, %v1380_v4  ;;  %v1359_v13 = vadd.f32 %v1696_v24, %v1358_v14 }
 0x1c4   : > { %v1396_v20 = vadd.f32 %v1395_v7, %v1381_v26 }
 0x1d1   : > { %v1699_v40 = vpop.f32.mrb[6].mxu0 }
 0x1d2   : > { %v1306_v47 = vpop.f32.mrb[7].mxu0  ;;  %v1383_v1 = vmul.f32 %v1699_v40, %v1699_v40 }
 0x1d3   : > { %v1360_v41 = vadd.f32 %v1359_v13, %v1306_v47  ;;  %v1382_v58 = vmul.f32 %v1306_v47, %v1306_v47 }
 0x1d5   : > { %v1361_v10 = vadd.f32 %v1699_v40, %v1360_v41  ;;  %v1397_v22 = vadd.f32 %v1396_v20, %v1382_v58 }
 0x1d7   : > { %v1398_v18 = vadd.f32 %v1397_v22, %v1383_v1 }
 0x1e7   : > { %v1702_v55 = vpop.f32.mrb[0].mxu1 }
 0x1e8   : > { %v1316_v48 = vpop.f32.mrb[1].mxu1  ;;  %v1385_v52 = vmul.f32 %v1702_v55, %v1702_v55 }
 0x1e9   : > { %v1362_v16 = vadd.f32 %v1361_v10, %v1316_v48  ;;  %v1384_v61 = vmul.f32 %v1316_v48, %v1316_v48 }
 0x1eb   : > { %v1399_v8 = vadd.f32 %v1398_v18, %v1384_v61  ;;  %v1363_v43 = vadd.f32 %v1702_v55, %v1362_v16 }
 0x1ed   : > { %v1400_v5 = vadd.f32 %v1399_v8, %v1385_v52 }
 0x1f8   : > { %v1705_v49 = vpop.f32.mrb[2].mxu1 }
 0x1f9   : > { %v1326_v56 = vpop.f32.mrb[3].mxu1  ;;  %v1387_v32 = vmul.f32 %v1705_v49, %v1705_v49 }
 0x1fa   : > { %v1364_v57 = vadd.f32 %v1363_v43, %v1326_v56  ;;  %v1386_v34 = vmul.f32 %v1326_v56, %v1326_v56 }
 0x1fc   : > { %v1401_v25 = vadd.f32 %v1400_v5, %v1386_v34  ;;  %v1365_v36 = vadd.f32 %v1705_v49, %v1364_v57 }
 0x1fe   : > { %v1402_v27 = vadd.f32 %v1401_v25, %v1387_v32 }
 0x209   : > { %v1708_v39 = vpop.f32.mrb[4].mxu1 }
 0x20a   : > { %v1336_v38 = vpop.f32.mrb[5].mxu1  ;;  %v1389_v28 = vmul.f32 %v1708_v39, %v1708_v39 }
 0x20b   : > { %v1366_v6 = vadd.f32 %v1365_v36, %v1336_v38  ;;  %v1388_v50 = vmul.f32 %v1336_v38, %v1336_v38 }
 0x20d   : > { %v1403_v42 = vadd.f32 %v1402_v27, %v1388_v50  ;;  %v1367_v33 = vadd.f32 %v1708_v39, %v1366_v6 }
 0x20f   : > { %v1404_v29 = vadd.f32 %v1403_v42, %v1389_v28 }
 0x219   : > { %v1711_v9 = vpop.f32.mrb[6].mxu1 }
 0x21a   : > { %v1346_v60 = vpop.f32.mrb[7].mxu1  ;;  %v1391_v59 = vmul.f32 %v1711_v9, %v1711_v9 }
 0x21b   : > { %v1368_v12 = vadd.f32 %v1367_v33, %v1346_v60  ;;  %v1390_v30 = vmul.f32 %v1346_v60, %v1346_v60 }
 0x21d   : > { %v1369_v0 = vadd.f32 %v1711_v9, %v1368_v12  ;;  %v1405_v62 = vadd.f32 %v1404_v29, %v1390_v30 }
 0x21f   : > { %v1370_v15 = vrot.slane %v1369_v0, 4  ;;  %v1406_v54 = vadd.f32 %v1405_v62, %v1391_v59 }
 0x221   : > { %v1371_v37 = vadd.f32 %v1370_v15, %v1369_v0  ;;  %v1407_v19 = vrot.slane %v1406_v54, 4 }
 0x223   : > { %v1372_v53 = vrot.slane %v1371_v37, 2  ;;  %v1408_v44 = vadd.f32 %v1407_v19, %v1406_v54 }
 0x225   : > { %v1373_v51 = vadd.f32 %v1372_v53, %v1371_v37  ;;  %v1409_v11 = vrot.slane %v1408_v44, 2 }
 0x227   : > { %v1374_v63 = vrot.slane %v1373_v51, 1  ;;  %v1410_v2 = vadd.f32 %v1409_v11, %v1408_v44 }
 0x229   : > { %v1411_v35 = vrot.slane %v1410_v2, 1  ;;  %v1375_v31 = vadd.f32 %v1374_v63, %v1373_v51 }
 0x22b   : > { %v1412_v23 = vadd.f32 %v1411_v35, %v1410_v2 }
 0x22d   : > { %v1414_v17 = vsel %vm1413_vm2, %v1375_v31, %v1412_v23 }
 0x22e   : > { %1415 = vst [vmem:[%s166_s2] sm:$0x3] %v1414_v17 }
 0x22f   : > { %1996 = shalt.err (!%p1993_p10)
}
 0x230   : > { %s1997_s22 = scalar_lea.hbm %s3204_s9, 32  ;;  %s2001_s23 = scalar_lea.hbm %s3264_s3, 128 }
 0x231   : > { %p1998_p12 = scmp.ne.s32.totalorder %s3204_s9, %s1997_s22  ;;  %p2002_p0 = scmp.lt.u32.totalorder %s3204_s9, %s3264_s3 }
 0x232   : > { %p2003_p2 = scmp.lt.u32.totalorder %s2001_s23, %s1997_s22  ;;  %p2005_p1 = scmp.lt.u32.totalorder %s1997_s22, %s3204_s9 }
 0x233   : > { %p1999_p4 = pnand %p1998_p12, %p3296_p6 }
 0x234   : > { %p2004_p7 = por %p2003_p2, %p2002_p0 }
 0x235   : > { %p2000_p5 = pneg %p1999_p4 }
 0x236   : > { %p2006_p9 = por %p2005_p1, %p2004_p7 }
 0x238   : > { %p2007_p11 = pnand %p2006_p9, %p2000_p5 }
 0x23a   : > { %2010 = shalt.err (!%p2007_p11)
}
 0x23b   : > { %1772 = dma.vmem_to_hbm [thread:$0]  (%p3296_p6), %s3206_s21, 32, %s3204_s9, %s1417_s16  }
 0x23c PF: > { %p1791_p13 = scmp.ge.s32.totalorder %s2087_s19, 2  ;;  %s1444_s17 = sand.u32 1, %s2059_s12  }
 0x23d   : > { %p3297_p3 = scmp.ne.s32.totalorder %s3283_s27, 0  ;;  %s1445_s2 = scalar_lea.sflag [#allocation6], %s1444_s17 }
 0x23f   : > { %p1782_p8 = pnand %p1791_p13, %p3297_p3 }
 0x241   : > { %2054 = dma.done.wait (!%p1782_p8), %s1445_s2, 32  }
 0x242   : > { %2056 = vsyncadd (!%p1782_p8), %s1445_s2, 4294967264  ;;  %s18_s19 = sadd.s32 1, %s2087_s19   ;;  %s3298_s26 = sld [smem:[#allocation24_spill]] }
 0x243   : > { %p15_p10 = scmp.ge.s32.totalorder %s18_s19, 6   ;;  %s3299_s15 = sld [smem:[#allocation20_spill]] }
 0x244   : > { %s3300_s16 = sld [smem:[#allocation21_spill]]  ;;  %s3301_s17 = sld [smem:[#allocation22_spill]] }
 0x245   : > { %s3302_s18 = sld [smem:[#allocation23_spill]]  ;;  %s3303_s12 = smov %s2063_s13 }
 0x246   : > { %s3304_s13 = smov %s2067_s14  ;;  %17 = sbr.rel (!%p15_p10) target bundleno = 10 (0xa), region = 92 }
 0x248   : > { %s3305_s14 = smov %s3298_s26 }
 0x24d   :  { %1450 = vsyncpa [#allocation5], 1 }
 0x24e   :  { %1452 = vsyncpa [#allocation5 + $0x1], 1 }
 0x24f   :  { %1453 = vsyncpa [#allocation8], 1 }
 0x250   :  { %1454 = vsyncpa [#allocation6], 1 }
 0x251   :  { %1456 = vsyncpa [#allocation6 + $0x1], 1 }
 0x252   :  { %1457 = vsyncmov [#allocation3] }
 0x255   :  { %s1458_s27 = vpop.sfrf %1457 }
 0x256   :  { %p1571_p6 = scmp.ne.s32.totalorder %s1458_s27, 0 }
 0x258   :  { %1462 = shalt.err (%p1571_p6)  }
 0x259   :  { %1464 = vsyncmov [#allocation3 + $0x1] }
 0x25c   :  { %s1465_s5 = vpop.sfrf %1464 }
 0x25d   :  { %p1572_p12 = scmp.ne.s32.totalorder %s1465_s5, 0 }
 0x25f   :  { %1469 = shalt.err (%p1572_p12)  }

// kernel: depthwise_separable_conv.3
= control target key start
LH: loop header
LB: loop body
LE: loop exit
PB: predicated region body
PF: predicated region fallthrough
CT: control target
= control target key end

     0   :  { %s3382_s0 = inlined_call_operand.hbm [shape: bf16[2,18,24,128], index: 0, kind: input, shape index: {}]   ;;  %s3383_s1 = inlined_call_operand.hbm [shape: f32[9,128], index: 1, kind: input, shape index: {}]   ;;  %s3384_s2 = inlined_call_operand.hbm [shape: f32[128,128], index: 2, kind: input, shape index: {}]   ;;  %s3385_s3 = inlined_call_operand.hbm [shape: f32[8,1], index: 3, kind: input, shape index: {}]   ;;  %s3386_s4 = inlined_call_operand.hbm [shape: f32[2,8,256], index: 4, kind: output, shape index: {}]  }
   0x1   :  { %3398 = sst [smem:[#allocation26_spill]] %s3383_s1 }
   0x2   :  { %3399 = sst [smem:[#allocation27_spill]] %s3384_s2 }
   0x3   :  { %3400 = sst [smem:[#allocation28_spill]] %s3385_s3 }
   0x4   :  { %9 = vsyncpa [#allocation5], 0 }
   0x5   :  { %10 = vsyncpa [#allocation8], 0 }
   0x6   :  { %11 = vsyncpa [#allocation6], 0 }
   0x7   :  { %13 = vsyncpa [#allocation6 + $0x1], 0  ;;  %s2192_s15 = smov 0   ;;  %s2194_s16 = smov 0  }
   0x8   :  { %s2196_s17 = smov 0   ;;  %s2198_s18 = smov 0  }
   0x9   :  { %s2200_s19 = smov 0   ;;  %s2202_s20 = smov 0  }
   0xa   :  { %s2204_s21 = smov 0   ;;  %s2206_s22 = smov 0  }
   0xb LB: > { %3401 = sst [smem:[#allocation21_spill]] %s2149_s20  ;;  %s1569_s23 = sadd.s32 4294967295, %s2157_s22   ;;  %s2157_s22 = sphi %s2206_s22, %s19_s22   ;;  %s2153_s21 = sphi %s2204_s21, %s3427_s21   ;;  %s2149_s20 = sphi %s2202_s20, %s3426_s20   ;;  %s2145_s19 = sphi %s2200_s19, %s3425_s19   ;;  %s2141_s18 = sphi %s2198_s18, %s3424_s18   ;;  %s2137_s17 = sphi %s2196_s17, %s3430_s17   ;;  %s2133_s16 = sphi %s2194_s16, %s3429_s16   ;;  %s2129_s15 = sphi %s2192_s15, %s3428_s15  }
   0xc   : > { %3402 = sst [smem:[#allocation22_spill]] %s2153_s21  ;;  %s1570_s24 = sadd.s32 4294967294, %s2157_s22  }
   0xd   : > { %s28_s25 = sadd.s32 1, %s2149_s20  ;;  %s31_s26 = sadd.s32 1, %s2153_s21 }
   0xe   : > { %p29_p0 = scmp.ge.s32.totalorder %s28_s25, 2  ;;  %s103_s27 = sadd.s32 1, %s2137_s17 }
   0xf   : > { %p113_p1 = scmp.ne.s32.totalorder %s2137_s17, %s2133_s16  ;;  %p114_p2 = scmp.eq.s32.totalorder %s1569_s23, 3 }
  0x10   : > { %s3432_s25 = smov (%p29_p0, %s28_s25), 0  ;;  %s3434_s26 = smov (!%p29_p0, %s31_s26), %s2153_s21 }
  0x11   : > { %3403 = sst [smem:[#allocation23_spill]] %s3432_s25  ;;  %s99_s28 = ssub.s32 %s2149_s20, %s3432_s25 }
  0x12   : > { %p2244_p3 = por %p114_p2, %p113_p1  ;;  %p33_p4 = scmp.ge.s32.totalorder %s3434_s26, 2 }
  0x13   : > { %p119_p5 = scmp.ne.s32.totalorder %s2133_s16, %s2129_s15  ;;  %p120_p6 = scmp.eq.s32.totalorder %s1570_s24, 3 }
  0x14   : > { %s3404_s29 = scalar_select %p2244_p3, 1, 0 }
  0x15   : > { %p1571_p7 = scmp.ge.s32.totalorder %s2157_s22, 1  ;;  %s3436_s26 = smov (%p33_p4, %s3434_s26), 0 }
  0x16   : > { %3405 = sst [smem:[#allocation24_spill]] %s3436_s26  ;;  %p2253_p8 = por %p120_p6, %p119_p5 }
  0x17   : > { %p127_p9 = scmp.lt.s32.totalorder %s2157_s22, 5  ;;  %s98_s5 = ssub.s32 %s2153_s21, %s3436_s26 }
  0x18   : > { %s3406_s30 = scalar_select %p2253_p8, 1, 0 }
  0x19   : > { %s100_s6 = sor.u32 %s99_s28, %s98_s5  ;;  %p2260_p10 = pnand %p1571_p7, %p127_p9 }
  0x1a   : > { %p101_p11 = scmp.eq.s32.totalorder %s100_s6, 0  ;;  %p2264_p12 = scmp.eq.s32.totalorder %s1569_s23, 0 }
  0x1b   : > { %s3407_s7 = scalar_select %p2260_p10, 1, 0 }
  0x1c   : > { %s3408_s8 = scalar_select %p2264_p12, 1, 0 }
  0x1d   : > { %p1808_p13 = pneg %p2260_p10  ;;  %s2159_s11 = smov [#allocation7]  }
  0x1e   : > { %s2271_s9 = scalar_select %p101_p11, %s2137_s17, %s103_s27  }
  0x1f   : > { %p2275_p0 = pnand %p2264_p12, %p1808_p13  ;;  %s152_s12 = sshll.u32 %s2159_s11, 4  ;;  %s153_s12 = int_to_ptr.vmem [resolvable:$true] %s152_s12 }
  0x20   : > { %3409 = sst [smem:[#allocation25_spill]] %s2271_s9  ;;  %s3411_s2 = sld [smem:[#allocation27_spill]] }
  0x21   : > { %p2287_p2 = pneg %p2275_p0 }
  0x26   : > { %s1912_s23 = scalar_lea.hbm %s3411_s2, 2048 }
  0x27   : > { %p1913_p1 = scmp.ne.s32.totalorder %s3411_s2, %s1912_s23  ;;  %p1919_p6 = scmp.lt.u32.totalorder %s1912_s23, %s3411_s2 }
  0x29   : > { %p1915_p4 = pnand %p2287_p2, %p1913_p1 }
  0x2b   : > { %p1916_p5 = pneg %p1915_p4 }
  0x2d   : > { %p1921_p7 = pnand %p1919_p6, %p1916_p5 }
  0x2f   : > { %1924 = shalt.err (!%p1921_p7)
}
  0x30   : > { %s1925_s11 = scalar_lea.vmem %s153_s12, 2048  ;;  %p1933_p8 = scmp.lt.s32.totalorder %s153_s12, %s153_s12 }
  0x31   : > { %p1926_p9 = scmp.ne.s32.totalorder %s153_s12, %s1925_s11  ;;  %p1934_p3 = scmp.lt.s32.totalorder %s1925_s11, %s1925_s11 }
  0x33   : > { %p1928_p11 = pnand %p1926_p9, %p2287_p2  ;;  %p1935_p12 = por %p1934_p3, %p1933_p8 }
  0x35   : > { %p1929_p13 = pneg %p1928_p11 }
  0x37   : > { %p1936_p10 = pnand %p1935_p12, %p1929_p13 }
  0x39   : > { %1939 = shalt.err (!%p1936_p10)
}
  0x3a   : > { %s2160_s13 = smov 128   ;;  %s2161_s14 = smov 8  }
  0x3b   : > { %1814 = dma.hbm_to_vmem [thread:$0]  (!%p2275_p0), %s3411_s2, 2048, %s153_s12, [#allocation8], %s2160_s13, %s2160_s13, %s2161_s14  }
  0x3c   : > { %s2162_s28 = smov [#allocation4]   ;;  %s2163_s6 = smov [#allocation9]  }
  0x3d   : > { %s139_s5 = sshll.u32 %s2162_s28, 4  ;;  %s166_s26 = sshll.u32 %s2163_s6, 4  ;;  %s140_s5 = int_to_ptr.vmem [resolvable:$true] %s139_s5  ;;  %s2303_s26 = int_to_ptr.vmem [resolvable:$true] %s166_s26 }
  0x3e   : > { %s3413_s1 = sld [smem:[#allocation26_spill]] }
  0x44   : > { %s1940_s21 = scalar_lea.hbm %s3413_s1, 256 }
  0x45   : > { %p1941_p3 = scmp.ne.s32.totalorder %s3413_s1, %s1940_s21  ;;  %p1947_p12 = scmp.lt.u32.totalorder %s1940_s21, %s3413_s1 }
  0x47   : > { %p1943_p8 = pnand %p1941_p3, %p2287_p2 }
  0x49   : > { %p1944_p10 = pneg %p1943_p8 }
  0x4b   : > { %p1949_p1 = pnand %p1947_p12, %p1944_p10 }
  0x4d   : > { %1952 = shalt.err (!%p1949_p1)
}
  0x4e   : > { %s1953_s23 = scalar_lea.vmem %s140_s5, 256  ;;  %p1961_p7 = scmp.lt.s32.totalorder %s140_s5, %s140_s5 }
  0x4f   : > { %p1954_p4 = scmp.ne.s32.totalorder %s140_s5, %s1953_s23  ;;  %p1962_p9 = scmp.lt.s32.totalorder %s1953_s23, %s1953_s23 }
  0x51   : > { %p1956_p5 = pnand %p1954_p4, %p2287_p2  ;;  %p1963_p11 = por %p1962_p9, %p1961_p7 }
  0x53   : > { %p1957_p6 = pneg %p1956_p5 }
  0x55   : > { %p1964_p13 = pnand %p1963_p11, %p1957_p6 }
  0x57   : > { %1967 = shalt.err (!%p1964_p13)
}
  0x58   : > { %1811 = dma.hbm_to_vmem [thread:$0]  (!%p2275_p0), %s3413_s1, 256, %s140_s5, [#allocation5], %s2160_s13, %s2160_s13, %s2161_s14  }
  0x59   : > { %s3414_s3 = sld [smem:[#allocation28_spill]] }
  0x5f   : > { %s1968_s28 = scalar_lea.hbm %s3414_s3, 128 }
  0x60   : > { %p1969_p3 = scmp.ne.s32.totalorder %s3414_s3, %s1968_s28  ;;  %p1975_p12 = scmp.lt.u32.totalorder %s1968_s28, %s3414_s3 }
  0x62   : > { %p1971_p8 = pnand %p1969_p3, %p2287_p2 }
  0x64   : > { %p1972_p10 = pneg %p1971_p8 }
  0x66   : > { %p1977_p1 = pnand %p1975_p12, %p1972_p10 }
  0x68   : > { %1980 = shalt.err (!%p1977_p1)
}
  0x69   : > { %s1981_s13 = scalar_lea.vmem %s2303_s26, 128  ;;  %p1989_p7 = scmp.lt.s32.totalorder %s2303_s26, %s2303_s26 }
  0x6a   : > { %p1982_p4 = scmp.ne.s32.totalorder %s2303_s26, %s1981_s13  ;;  %p1990_p9 = scmp.lt.s32.totalorder %s1981_s13, %s1981_s13 }
  0x6c   : > { %p1984_p5 = pnand %p1982_p4, %p2287_p2  ;;  %p1991_p11 = por %p1990_p9, %p1989_p7 }
  0x6e   : > { %p1985_p6 = pneg %p1984_p5 }
  0x70   : > { %p1992_p13 = pnand %p1991_p11, %p1985_p6 }
  0x72   : > { %1995 = shalt.err (!%p1992_p13)
}
  0x73   : > { %1817 = dma.hbm_to_vmem [thread:$0]  (!%p2275_p0), %s3414_s3, 128, %s2303_s26, [#allocation8]  }
  0x74   : > { %p3415_p3 = scmp.ne.s32.totalorder %s3407_s7, 0 }
  0x75   : > { %p3416_p8 = scmp.ne.s32.totalorder (!%p3415_p3), %s3408_s8, 0 }
  0x76   : > { %179 = sbr.rel (%p3415_p3) target bundleno = 660 (0x294), region = 32 }
  0x7d   : > { %2114 = dma.done.wait (%p3416_p8), [#allocation5], 256  }
  0x7e   : > { %2116 = vsyncadd (%p3416_p8), [#allocation5], 4294967040 }
  0x7f   : > { %2118 = dma.done.wait (%p3416_p8), [#allocation8], 2176  }
  0x80   : > { %2120 = vsyncadd (%p3416_p8), [#allocation8], 4294965120  ;;  %s3395_s26 = sand.u32 1, %s2133_s16   ;;  %p1828_p0 = scmp.eq.s32.totalorder %s2141_s18, 0 }
  0x81   : > { %s2359_s7 = sshll.u32 %s3395_s26, 3  ;;  %s1603_s10 = smul.u32 3456, %s2145_s19 }
  0x82   : > { %p206_p2 = scmp.lt.s32.totalorder %s2141_s18, 0  ;;  %s2164_s8 = smov [#allocation2]  }
  0x83   : > { %s218_s20 = scalar_lea.hbm %s3382_s0, %s1603_s10  ;;  %s226_s25 = sshll.u32 %s2164_s8, 4  ;;  %s2367_s25 = int_to_ptr.vmem [resolvable:$true] %s226_s25 }
  0x84   : > { %s207_s21 = ssub.s32 0, %s2141_s18  ;;  %s1996_s9 = scalar_lea.hbm %s218_s20, 1920 }
  0x85   : > { %p1997_p10 = scmp.ne.s32.totalorder %s218_s20, %s1996_s9  ;;  %s3397_s11 = scalar_lea.hbm %s3382_s0, 6912 }
  0x86   : > { %p2001_p4 = scmp.lt.u32.totalorder %s218_s20, %s3382_s0  ;;  %p2002_p5 = scmp.lt.u32.totalorder %s3397_s11, %s1996_s9 }
  0x87   : > { %p1998_p12 = pnand %p1997_p10, %p1828_p0  ;;  %p2004_p7 = scmp.lt.u32.totalorder %s1996_s9, %s218_s20 }
  0x88   : > { %p2003_p6 = por %p2002_p5, %p2001_p4 }
  0x89   : > { %p1999_p1 = pneg %p1998_p12 }
  0x8a   : > { %p2005_p9 = por %p2004_p7, %p2003_p6 }
  0x8c   : > { %p2006_p11 = pnand %p2005_p9, %p1999_p1 }
  0x8e   : > { %2009 = shalt.err (!%p2006_p11)  }
  0x8f   : > { %s2010_s5 = scalar_lea.vmem %s2367_s25, 1920  ;;  %s3396_s10 = scalar_lea.vmem %s2367_s25, 3840 }
  0x90   : > { %p2011_p13 = scmp.ne.s32.totalorder %s2367_s25, %s2010_s5  ;;  %p2017_p10 = scmp.lt.s32.totalorder %s2367_s25, %s2367_s25 }
  0x91   : > { %p2018_p12 = scmp.lt.s32.totalorder %s3396_s10, %s2010_s5 }
  0x92   : > { %p2012_p3 = pnand %p2011_p13, %p1828_p0 }
  0x93   : > { %p2019_p4 = por %p2018_p12, %p2017_p10 }
  0x94   : > { %p2013_p8 = pneg %p2012_p3 }
  0x96   : > { %p2020_p5 = pnand %p2019_p4, %p2013_p8 }
  0x98   : > { %2023 = shalt.err (!%p2020_p5)  }
  0x99   : > { %1803 = dma.hbm_to_vmem [thread:$0]  (%p1828_p0), %s218_s20, 1920, %s2367_s25, [#allocation3] }
  0x9a   : > { %s1580_s27 = smin.u32 %s2141_s18, %s207_s21  ;;  %s230_s23 = sadd.s32 1, %s2141_s18 }
  0x9b   : > { %s209_s8 = sand.u32 1, %s1580_s27   ;;  %p2400_p1 = scmp.lt.s32.totalorder %s230_s23, 2 }
  0x9c   : > { %s210_s9 = ssub.s32 0, %s209_s8  ;;  %s1494_s6 = smul.u32 24, %s2141_s18 }
  0x9d   : > { %s3438_s9 = smov (!%p206_p2, %s210_s9), %s209_s8  ;;  %s1495_s12 = smul.u32 54, %s2145_s19 }
  0x9e   : > { %s236_s24 = ssub.s32 1, %s3438_s9  ;;  %s1605_s20 = smul.u32 120, %s3438_s9 }
  0x9f   : > { %s1604_s13 = smul.u32 120, %s236_s24  ;;  %s1496_s14 = sadd.s32 %s1495_s12, %s1494_s6 }
  0xa0   : > { %s1584_s21 = sshll.u32 %s1496_s14, 6  ;;  %s245_s23 = scalar_lea.sflag [#allocation3], %s236_s24 }
  0xa1   : > { %s1498_s26 = scalar_lea.hbm %s3382_s0, %s1584_s21  ;;  %s244_s8 = scalar_lea.vmem [#allocation2], %s1604_s13 }
  0xa2   : > { %s253_s10 = sshll.u32 %s244_s8, 4  ;;  %s1499_s11 = scalar_lea.hbm %s1498_s26, 1536  ;;  %s254_s10 = int_to_ptr.vmem [resolvable:$true] %s253_s10 }
  0xa3   : > { %s2052_s1 = scalar_lea.hbm %s1498_s26, 3456  ;;  %p2029_p7 = scmp.lt.u32.totalorder %s1499_s11, %s3382_s0 }
  0xa4   : > { %p2025_p0 = scmp.ne.s32.totalorder %s1499_s11, %s2052_s1  ;;  %s3418_s14 = scalar_lea.hbm %s3382_s0, 6912 }
  0xa5   : > { %p2030_p9 = scmp.lt.u32.totalorder %s3418_s14, %s2052_s1  ;;  %p2032_p13 = scmp.lt.u32.totalorder %s2052_s1, %s1499_s11 }
  0xa6   : > { %p2026_p2 = pnand %p2025_p0, %p2400_p1 }
  0xa7   : > { %p2031_p11 = por %p2030_p9, %p2029_p7 }
  0xa8   : > { %p2027_p6 = pneg %p2026_p2 }
  0xa9   : > { %p2033_p3 = por %p2032_p13, %p2031_p11 }
  0xab   : > { %p2034_p8 = pnand %p2033_p3, %p2027_p6 }
  0xad   : > { %2037 = shalt.err (!%p2034_p8)  }
  0xae   : > { %s2038_s24 = scalar_lea.vmem %s254_s10, 1920  ;;  %p2045_p5 = scmp.lt.s32.totalorder %s254_s10, %s2367_s25 }
  0xaf   : > { %p2039_p10 = scmp.ne.s32.totalorder %s254_s10, %s2038_s24  ;;  %s3419_s2 = scalar_lea.vmem %s2367_s25, 3840 }
  0xb0   : > { %p2046_p0 = scmp.lt.s32.totalorder %s3419_s2, %s2038_s24 }
  0xb1   : > { %p2040_p12 = pnand %p2039_p10, %p2400_p1 }
  0xb2   : > { %p2047_p2 = por %p2046_p0, %p2045_p5 }
  0xb3   : > { %p2041_p4 = pneg %p2040_p12 }
  0xb5   : > { %p2048_p7 = pnand %p2047_p2, %p2041_p4 }
  0xb7   : > { %2051 = shalt.err (!%p2048_p7)  }
  0xb8   : > { %1805 = dma.hbm_to_vmem [thread:$0]  (%p2400_p1), %s1499_s11, 1920, %s254_s10, %s245_s23 }
  0xb9   : > { %s205_s1 = scalar_lea.vmem [#allocation10], %s2359_s7  ;;  %s2430_s3 = scalar_lea.vmem [#allocation2], %s1605_s20 }
  0xba   : > { %s260_s26 = scalar_lea.sflag [#allocation3], %s3438_s9 }
  0xbb   : > { %2121 = dma.done.wait %s260_s26, 1920 }
  0xbc   : > { %2122 = vsyncadd %s260_s26, 4294965376  ;;  %v1233_v0 = vld [vmem:[#allocation7] sm:$0xff]  ;;  %v1234_v1 = vld [vmem:[#allocation7 + $0x8] sm:$0xff]  ;;  %vm460_vm0 = vcmask 1046528   ;;  %vm586_vm1 = vcmask 1045504   ;;  %s1597_s25 = sshll.u32 %s2145_s19, 1 }
  0xbd   : > { %v1235_v2 = vld [vmem:[#allocation7 + $0x10] sm:$0xff]  ;;  %v1742_v3 = vpack.c.bf16 %v1234_v1, %v1233_v0  ;;  %v1236_v4 = vld [vmem:[#allocation7 + $0x18] sm:$0xff]  ;;  %v1237_v5 = vld [vmem:[#allocation7 + $0x20] sm:$0xff]  ;;  %s1447_s11 = sadd.s32 %s2141_s18, %s1597_s25  ;;  %s1451_s9 = sshll.u32 %s205_s1, 4  ;;  %s3327_s9 = int_to_ptr.vmem [resolvable:$true] %s1451_s9 }
  0xbe   : > { %v1746_v6 = vpack.c.bf16 %v1236_v4, %v1235_v2  ;;  %v1238_v7 = vld [vmem:[#allocation7 + $0x28] sm:$0xff]  ;;  %v1239_v8 = vld [vmem:[#allocation7 + $0x30] sm:$0xff]  ;;  %v1240_v9 = vld [vmem:[#allocation7 + $0x38] sm:$0xff]  ;;  %s1598_s10 = sshll.u32 %s1447_s11, 7  ;;  %s3420_s19 = sand.u32 1, %s2133_s16  }
  0xbf   : > { %1743 = vmatprep.subr.bf16.mxu0 %v1742_v3  ;;  %v1241_v10 = vld [vmem:[#allocation7 + $0x40] sm:$0xff]  ;;  %v1242_v11 = vld [vmem:[#allocation7 + $0x48] sm:$0xff]  ;;  %v1243_v12 = vld [vmem:[#allocation7 + $0x50] sm:$0xff]  ;;  %1774 = vmatprep.subr.bf16.mxu1 %v1742_v3  ;;  %v1750_v17 = vpack.c.bf16 %v1238_v7, %v1237_v5  ;;  %v2442_v26 = vpack.c.bf16 %v1240_v9, %v1239_v8  ;;  %s3325_s20 = scalar_lea.hbm %s3386_s4, %s1598_s10  ;;  %s1436_s18 = scalar_lea.sflag [#allocation6], %s3420_s19 }
  0xc0   : > { %v1244_v13 = vld [vmem:[#allocation7 + $0x58] sm:$0xff]  ;;  %1745 = vmatpush3.bf16.msra.mxu0 %v1742_v3  ;;  %v1245_v14 = vld [vmem:[#allocation7 + $0x60] sm:$0xff]  ;;  %v1246_v15 = vld [vmem:[#allocation7 + $0x68] sm:$0xff]  ;;  %1782 = vmatpush3.bf16.msra.mxu1 %v1742_v3  ;;  %v2448_v30 = vpack.c.bf16 %v1242_v11, %v1241_v10  ;;  %s2053_s21 = scalar_lea.vmem %s3327_s9, 128  ;;  %p3421_p6 = scmp.ne.s32.totalorder %s3404_s29, 0 }
  0xc1   : > { %v1247_v16 = vld [vmem:[#allocation7 + $0x70] sm:$0xff]  ;;  %1747 = vmatprep.subr.bf16.mxu0 %v1746_v6  ;;  %v1248_v18 = vld [vmem:[#allocation7 + $0x78] sm:$0xff]  ;;  %1775 = vmatprep.subr.bf16.mxu1 %v1746_v6  ;;  %v367_v28 = vld [vmem:[%s2430_s3 + $0xc] sm:$0xe]  ;;  %v2450_v31 = vpack.c.bf16 %v1244_v13, %v1243_v12  ;;  %v2452_v32 = vpack.c.bf16 %v1246_v15, %v1245_v14  ;;  %p2054_p1 = scmp.ne.s32.totalorder %s3327_s9, %s2053_s21  ;;  %s2166_s5 = smov [#allocation10]  }
  0xc2   : > { %v1607_v19 = vld [vmem:[%s2430_s3] sm:$0xff]   ;;  %v268_v20 = vld [vmem:[%s2430_s3 + $0xc] sm:$0xff]   ;;  %v1646_v23 = vld [vmem:[%s2430_s3 + $0x18] sm:$0xff]   ;;  %v2458_v36 = vpack.c.bf16 %v1248_v18, %v1247_v16  ;;  %v377_v42 = vunpack.c.l.bf16 %v367_v28  ;;  %s2057_s27 = sshll.u32 %s2166_s5, 4  ;;  %s2058_s27 = int_to_ptr.vmem [resolvable:$false] %s2057_s27 }
  0xc3   : > { %v1608_v21 = vunpack.c.l.bf16 %v1607_v19  ;;  %v2435_v22 = vunpack.c.h.bf16 %v1607_v19  ;;  %v2439_v24 = vld [vmem:[%s2430_s3 + $0xc] sm:$0xff]   ;;  %v366_v25 = vld [vmem:[%s2430_s3] sm:$0xe]  ;;  %v2460_v37 = vunpack.c.l.bf16 %v1646_v23  ;;  %v288_v38 = vunpack.c.l.bf16 %v268_v20  ;;  %v368_v39 = vld [vmem:[%s2430_s3 + $0x18] sm:$0xe]  ;;  %p2055_p9 = pnand %p2054_p1, %p3421_p6  ;;  %s2059_s8 = scalar_lea.vmem %s2058_s27, 256 }
  0xc4   : > { %v339_v27 = vunpack.c.l.bf16 %v2439_v24  ;;  %v2446_v29 = vld [vmem:[#allocation4] ss:$0 sm:$0xff]  ;;  %1749 = vmatpush3.bf16.msra.mxu0 %v1746_v6  ;;  %v376_v33 = vunpack.c.l.bf16 %v366_v25  ;;  %v2454_v34 = vld [vmem:[#allocation4 + $0x1] ss:$0 sm:$0xff]  ;;  %v2456_v35 = vld [vmem:[#allocation4 + $0x2] ss:$0 sm:$0xff]  ;;  %1783 = vmatpush3.bf16.msra.mxu1 %v1746_v6  ;;  %v2464_v41 = vunpack.c.h.bf16 %v1646_v23  ;;  %v2479_v49 = vunpack.c.h.bf16 %v268_v20  ;;  %p2060_p13 = scmp.lt.s32.totalorder %s3327_s9, %s2058_s27  ;;  %p2061_p3 = scmp.lt.s32.totalorder %s2059_s8, %s2053_s21 }
  0xc5   : > { %1751 = vmatprep.subr.bf16.mxu0 %v1750_v17  ;;  %v412_v40 = vmul.f32 %v1608_v21, %v2454_v34  ;;  %v391_v43 = vmul.f32 %v1608_v21, %v2446_v29  ;;  %v2469_v44 = vmul.f32 %v2435_v22, %v2454_v34  ;;  %1776 = vmatprep.subr.bf16.mxu1 %v1750_v17  ;;  %v2481_v50 = vunpack.c.l.bf16 %v368_v39  ;;  %v2488_v53 = vld [vmem:[#allocation4 + $0x3] ss:$0 sm:$0xff]  ;;  %v2499_v58 = vld [vmem:[#allocation4 + $0x4] ss:$0 sm:$0xff]  ;;  %v2501_v59 = vld [vmem:[#allocation4 + $0x5] ss:$0 sm:$0xff]  ;;  %p2056_p11 = pneg %p2055_p9 }
  0xc6   : > { %v2472_v45 = vmul.f32 %v2454_v34, %v339_v27  ;;  %v538_v47 = vmul.f32 %v2456_v35, %v376_v33  ;;  %v2477_v48 = vmul.f32 %v2435_v22, %v2456_v35  ;;  %v2485_v51 = vmul.f32 %v2460_v37, %v2454_v34  ;;  %v2523_v4 = vld [vmem:[#allocation4 + $0x7] ss:$0 sm:$0xff]  ;;  %v2533_v9 = vld [vmem:[#allocation4 + $0x8] ss:$0 sm:$0xff]  ;;  %v2545_v14 = vld [vmem:[#allocation4 + $0x6] ss:$0 sm:$0xff]  ;;  %p2062_p8 = por %p2061_p3, %p2060_p13 }
  0xc7   : > { %v461_v46 = vrot.slane %v412_v40, 1  ;;  %v462_v52 = vrot.slane %v2469_v44, 1  ;;  %v2492_v54 = vmul.f32 %v2446_v29, %v288_v38  ;;  %v2496_v55 = vmul.f32 %v2464_v41, %v2454_v34  ;;  %v308_v19 = vld [vmem:[%s2430_s3 + $0x8] sm:$0x1]  ;;  %v314_v28 = vld [vmem:[%s2430_s3 + $0x20] sm:$0x1] }
  0xc8   : > { %1753 = vmatpush3.bf16.msra.mxu0 %v1750_v17  ;;  %1784 = vmatpush3.bf16.msra.mxu1 %v1750_v17  ;;  %v587_v56 = vrot.slane %v538_v47, 2  ;;  %v588_v57 = vrot.slane %v2477_v48, 2  ;;  %v2506_v60 = vmul.f32 %v2460_v37, %v2446_v29  ;;  %v2510_v61 = vmul.f32 %v2464_v41, %v2446_v29  ;;  %p2063_p10 = pnand %p2062_p8, %p2056_p11 }
  0xc9   : > { %1755 = vmatprep.subr.bf16.mxu0 %v2442_v26  ;;  %1777 = vmatprep.subr.bf16.mxu1 %v2442_v26  ;;  %v463_v62 = vsel %vm460_vm0, %v461_v46, %v462_v52  ;;  %v2516_v63 = vmul.f32 %v2456_v35, %v377_v42  ;;  %v466_v0 = vrot.slane %v2472_v45, 1  ;;  %v664_v3 = vmul.f32 %v2488_v53, %v288_v38 }
  0xca   : > { %v517_v1 = vadd.f32 %v463_v62, %v391_v43  ;;  %v589_v2 = vsel %vm586_vm1, %v587_v56, %v588_v57  ;;  %v471_v5 = vrot.slane %v2485_v51, 1  ;;  %v701_v6 = vmul.f32 %v2499_v58, %v339_v27  ;;  %v311_v27 = vld [vmem:[%s2430_s3 + $0x14] sm:$0x1] }
  0xcb   : > { %v2530_v7 = vmul.f32 %v2499_v58, %v2479_v49  ;;  %v826_v8 = vmul.f32 %v2501_v59, %v377_v42  ;;  %v472_v10 = vrot.slane %v2496_v55, 1  ;;  %v2539_v11 = vmul.f32 %v2456_v35, %v2481_v50  ;;  %v276_v55 = vld [vmem:[%s2430_s3 + $0x3c] sm:$0xff]  }
  0xcc   : > { %1757 = vmatpush3.bf16.msra.mxu0 %v2442_v26  ;;  %v643_v12 = vadd.f32 %v589_v2, %v517_v1  ;;  %v2543_v13 = vmul.f32 %v2501_v59, %v2479_v49  ;;  %v749_v15 = vrot.slane %v701_v6, 1  ;;  %v988_v18 = vmul.f32 %v2460_v37, %v2523_v4  ;;  %1785 = vmatpush3.bf16.msra.mxu1 %v2442_v26 }
  0xcd   : > { %1759 = vmatprep.subr.bf16.mxu0 %v2448_v30  ;;  %v750_v16 = vrot.slane %v2530_v7, 1  ;;  %v874_v17 = vrot.slane %v826_v8, 2  ;;  %v2555_v23 = vmul.f32 %v2464_v41, %v2523_v4  ;;  %v1113_v25 = vmul.f32 %v2533_v9, %v2481_v50  ;;  %1778 = vmatprep.subr.bf16.mxu1 %v2448_v30 }
  0xce   : > { %v680_v20 = vadd.f32 %v664_v3, %v643_v12  ;;  %v875_v21 = vrot.slane %v2543_v13, 2  ;;  %v951_v33 = vmul.f32 %v2460_v37, %v2545_v14  ;;  %v1036_v38 = vrot.slane %v988_v18, 1 }
  0xcf   : > { %v751_v26 = vsel %vm460_vm0, %v749_v15, %v750_v16  ;;  %v2570_v39 = vmul.f32 %v2464_v41, %v2533_v9  ;;  %v1037_v43 = vrot.slane %v2555_v23, 1  ;;  %v1161_v46 = vrot.slane %v1113_v25, 2  ;;  %v317_v23 = vld [vmem:[%s2430_s3 + $0x2c] sm:$0x1] }
  0xd0   : > { %1761 = vmatpush3.bf16.msra.mxu0 %v2448_v30  ;;  %v805_v40 = vadd.f32 %v751_v26, %v680_v20  ;;  %v876_v42 = vsel %vm586_vm1, %v874_v17, %v875_v21  ;;  %v338_v51 = vunpack.c.l.bf16 %v308_v19  ;;  %v2578_v56 = vunpack.c.l.bf16 %v311_v27  ;;  %1786 = vmatpush3.bf16.msra.mxu1 %v2448_v30 }
  0xd1   : > { %1763 = vmatprep.subr.bf16.mxu0 %v2450_v31  ;;  %v1162_v47 = vrot.slane %v2570_v39, 2  ;;  %v2580_v62 = vunpack.c.l.bf16 %v314_v28  ;;  %v473_v1 = vsel %vm460_vm0, %v471_v5, %v472_v10  ;;  %v592_v2 = vrot.slane %v2516_v63, 2  ;;  %1779 = vmatprep.subr.bf16.mxu1 %v2450_v31 }
  0xd2   : > { %v930_v3 = vadd.f32 %v876_v42, %v805_v40  ;;  %v289_v6 = vunpack.c.h.bf16 %v2439_v24  ;;  %v1038_v8 = vsel %vm460_vm0, %v1036_v38, %v1037_v43  ;;  %v414_v12 = vmul.f32 %v2454_v34, %v338_v51  ;;  %v272_v40 = vld [vmem:[%s2430_s3 + $0x24] sm:$0xff]  }
  0xd3   : > { %v540_v30 = vmul.f32 %v2456_v35, %v338_v51  ;;  %v703_v5 = vmul.f32 %v2499_v58, %v2578_v56  ;;  %v1163_v17 = vsel %vm586_vm1, %v1161_v46, %v1162_v47  ;;  %v392_v18 = vmul.f32 %v2435_v22, %v2446_v29 }
  0xd4   : > { %1765 = vmatpush3.bf16.msra.mxu0 %v2450_v31  ;;  %v967_v15 = vadd.f32 %v951_v33, %v930_v3  ;;  %v828_v19 = vmul.f32 %v2501_v59, %v2578_v56  ;;  %v464_v20 = vrot.slane %v414_v12, 1  ;;  %v990_v28 = vmul.f32 %v2523_v4, %v2580_v62  ;;  %1787 = vmatpush3.bf16.msra.mxu1 %v2450_v31 }
  0xd5   : > { %1767 = vmatprep.subr.bf16.mxu0 %v2452_v32  ;;  %v590_v25 = vrot.slane %v540_v30, 2  ;;  %v752_v27 = vrot.slane %v703_v5, 1  ;;  %v2609_v26 = vadd.f32 %v473_v1, %v2506_v60  ;;  %v2613_v33 = vmul.f32 %v2460_v37, %v2488_v53  ;;  %1780 = vmatprep.subr.bf16.mxu1 %v2452_v32 }
  0xd6   : > { %v1092_v22 = vadd.f32 %v1038_v8, %v967_v15  ;;  %v1115_v38 = vmul.f32 %v2533_v9, %v2580_v62  ;;  %v704_v31 = vmul.f32 %v2460_v37, %v2499_v58  ;;  %v829_v60 = vmul.f32 %v2501_v59, %v2481_v50  ;;  %v315_v50 = vld [vmem:[%s2430_s3 + $0x24] sm:$0xff]  }
  0xd7   : > { %v465_v42 = vsel %vm460_vm0, %v462_v52, %v464_v20  ;;  %v591_v46 = vsel %vm586_vm1, %v588_v57, %v590_v25  ;;  %v665_v3 = vmul.f32 %v2488_v53, %v289_v6  ;;  %v952_v37 = vmul.f32 %v2464_v41, %v2545_v14  ;;  %v369_v8 = vld [vmem:[%s2430_s3 + $0x24] sm:$0xe] }
  0xd8   : > { %1769 = vmatpush3.bf16.msra.mxu0 %v2452_v32  ;;  %v1217_v51 = vadd.f32 %v1163_v17, %v1092_v22  ;;  %v518_v1 = vadd.f32 %v465_v42, %v392_v18  ;;  %v753_v44 = vsel %vm460_vm0, %v750_v16, %v752_v27  ;;  %v877_v48 = vrot.slane %v828_v19, 2  ;;  %1788 = vmatpush3.bf16.msra.mxu1 %v2452_v32 }
  0xd9   : > { %1771 = vmatprep.subr.bf16.mxu0 %v2458_v36  ;;  %v1039_v52 = vrot.slane %v990_v28, 1  ;;  %v2641_v57 = vunpack.c.l.bf16 %v272_v40  ;;  %v1164_v30 = vrot.slane %v1115_v38, 2  ;;  %v416_v5 = vmul.f32 %v2454_v34, %v2479_v49  ;;  %1781 = vmatprep.subr.bf16.mxu1 %v2458_v36 }
  0xda   : > { %1718 = vmatprep.mubr.f32.mxu0 %v1217_v51  ;;  %v644_v12 = vadd.f32 %v591_v46, %v518_v1  ;;  %v542_v15 = vmul.f32 %v2456_v35, %v2479_v49  ;;  %v2649_v7 = vunpack.c.l.bf16 %v315_v50  ;;  %v2651_v16 = vunpack.c.h.bf16 %v272_v40 }
  0xdb   : > { %v2653_v17 = vunpack.c.l.bf16 %v369_v8  ;;  %v2657_v32 = vmul.f32 %v2464_v41, %v2499_v58  ;;  %v467_v19 = vrot.slane %v416_v5, 1  ;;  %v2662_v49 = vmul.f32 %v2464_v41, %v2501_v59 }
  0xdc   : > { %1773 = vmatpush3.bf16.msra.mxu0 %v2458_v36  ;;  %v681_v18 = vadd.f32 %v665_v3, %v644_v12  ;;  %v593_v20 = vrot.slane %v542_v15, 2  ;;  %v878_v25 = vsel %vm586_vm1, %v875_v21, %v877_v48  ;;  %v754_v27 = vrot.slane %v704_v31, 1  ;;  %1789 = vmatpush3.bf16.msra.mxu1 %v2458_v36 }
  0xdd   : > { %v755_v28 = vrot.slane %v2657_v32, 1  ;;  %v879_v22 = vrot.slane %v829_v60, 2  ;;  %v468_v40 = vsel %vm460_vm0, %v466_v0, %v467_v19  ;;  %v880_v13 = vrot.slane %v2662_v49, 2 }
  0xde   : > { %v806_v38 = vadd.f32 %v753_v44, %v681_v18  ;;  %v594_v42 = vsel %vm586_vm1, %v592_v2, %v593_v20  ;;  %v597_v21 = vrot.slane %v2539_v11, 2  ;;  %v1040_v31 = vsel %vm460_vm0, %v1037_v43, %v1039_v52 }
  0xdf   : > { %v519_v60 = vadd.f32 %v468_v40, %v2492_v54  ;;  %v991_v36 = vmul.f32 %v2523_v4, %v2649_v7  ;;  %v1165_v63 = vsel %vm586_vm1, %v1162_v47, %v1164_v30  ;;  %v2688_v0 = vmul.f32 %v2523_v4, %v2651_v16 }
  0xe0   : > { %v931_v45 = vadd.f32 %v878_v25, %v806_v38  ;;  %v1116_v2 = vmul.f32 %v2533_v9, %v2653_v17  ;;  %v2695_v43 = vmul.f32 %v2454_v34, %v2649_v7  ;;  %v756_v46 = vsel %vm460_vm0, %v754_v27, %v755_v28 }
  0xe1   : > { %v645_v54 = vadd.f32 %v594_v42, %v519_v60  ;;  %v2700_v39 = vmul.f32 %v2533_v9, %v2651_v16  ;;  %v881_v51 = vsel %vm586_vm1, %v879_v22, %v880_v13  ;;  %v953_v1 = vmul.f32 %v2545_v14, %v2641_v57  ;;  %v1647_v60 = vld [vmem:[%s2430_s3 + $0x30] sm:$0xff]  }
  0xe2   : > { %v968_v47 = vadd.f32 %v952_v37, %v931_v45  ;;  %v1041_v3 = vrot.slane %v991_v36, 1  ;;  %v1042_v44 = vrot.slane %v2688_v0, 1  ;;  %v2707_v48 = vunpack.c.h.bf16 %v315_v50 }
  0xe3   : > { %v682_v8 = vadd.f32 %v2613_v33, %v645_v54  ;;  %v2709_v52 = vunpack.c.l.bf16 %v317_v23  ;;  %v1166_v30 = vrot.slane %v1116_v2, 2  ;;  %v417_v5 = vmul.f32 %v2454_v34, %v2578_v56  ;;  %v370_v2 = vld [vmem:[%s2430_s3 + $0x30] sm:$0xe] }
  0xe4   : > { %v1093_v12 = vadd.f32 %v1040_v31, %v968_v47  ;;  %v543_v37 = vmul.f32 %v2456_v35, %v2578_v56  ;;  %v1167_v32 = vrot.slane %v2700_v39, 2  ;;  %v394_v33 = vmul.f32 %v2446_v29, %v289_v6 }
  0xe5   : > { %v807_v15 = vadd.f32 %v756_v46, %v682_v8  ;;  %v706_v50 = vmul.f32 %v2499_v58, %v2580_v62  ;;  %v469_v49 = vrot.slane %v417_v5, 1  ;;  %v831_v27 = vmul.f32 %v2501_v59, %v2580_v62 }
  0xe6   : > { %v1218_v18 = vadd.f32 %v1165_v63, %v1093_v12  ;;  %v595_v25 = vrot.slane %v543_v37, 2  ;;  %v2725_v56 = vmul.f32 %v2456_v35, %v2653_v17  ;;  %v993_v24 = vmul.f32 %v2523_v4, %v2709_v52 }
  0xe7   : > { %v932_v22 = vadd.f32 %v881_v51, %v807_v15  ;;  %v757_v38 = vrot.slane %v706_v50, 1  ;;  %v1043_v6 = vsel %vm460_vm0, %v1041_v3, %v1042_v44  ;;  %v470_v40 = vsel %vm460_vm0, %v467_v19, %v469_v49 }
  0xe8   : > { %1719 = vmatmul.mubr.f32.vlgmr.msra.gmra.mrb[0].mxu0 %v1218_v18  ;;  %v596_v42 = vsel %vm586_vm1, %v593_v20, %v595_v25  ;;  %v882_v31 = vrot.slane %v831_v27, 2  ;;  %v1168_v45 = vsel %vm586_vm1, %v1166_v30, %v1167_v32  ;;  %v520_v63 = vadd.f32 %v470_v40, %v394_v33 }
  0xe9   : > { %v969_v36 = vadd.f32 %v953_v1, %v932_v22  ;;  %v667_v0 = vmul.f32 %v2464_v41, %v2488_v53  ;;  %v758_v23 = vsel %vm460_vm0, %v755_v28, %v757_v38  ;;  %v954_v54 = vmul.f32 %v2545_v14, %v2707_v48 }
  0xea   : > { %v1044_v46 = vrot.slane %v993_v24, 1  ;;  %v1118_v19 = vmul.f32 %v2533_v9, %v2709_v52  ;;  %v646_v39 = vadd.f32 %v596_v42, %v520_v63  ;;  %v883_v47 = vsel %vm586_vm1, %v880_v13, %v882_v31  ;;  %v320_v42 = vld [vmem:[%s2430_s3 + $0x38] sm:$0x1] }
  0xeb   : > { %v1094_v20 = vadd.f32 %v1043_v6, %v969_v36  ;;  %v2743_v51 = vunpack.c.l.bf16 %v1647_v60  ;;  %v2745_v1 = vunpack.c.h.bf16 %v1647_v60  ;;  %v2747_v3 = vunpack.c.l.bf16 %v370_v2 }
  0xec   : > { %v545_v28 = vmul.f32 %v2464_v41, %v2456_v35  ;;  %v707_v8 = vmul.f32 %v2499_v58, %v2649_v7  ;;  %v683_v30 = vadd.f32 %v667_v0, %v646_v39  ;;  %v2755_v5 = vmul.f32 %v2499_v58, %v2651_v16 }
  0xed   : > { %v1219_v12 = vadd.f32 %v1168_v45, %v1094_v20  ;;  %v832_v13 = vmul.f32 %v2501_v59, %v2653_v17  ;;  %v1169_v37 = vrot.slane %v1118_v19, 2  ;;  %v833_v50 = vmul.f32 %v2501_v59, %v2651_v16 }
  0xee   : > { %v598_v15 = vrot.slane %v545_v28, 2  ;;  %v759_v33 = vrot.slane %v707_v8, 1  ;;  %v808_v41 = vadd.f32 %v758_v23, %v683_v30  ;;  %v668_v7 = vmul.f32 %v2488_v53, %v2641_v57 }
  0xef   : > { %1721 = vmatprep.mubr.f32.mxu0 %v1219_v12  ;;  %v760_v18 = vrot.slane %v2755_v5, 1  ;;  %v994_v49 = vmul.f32 %v2743_v51, %v2523_v4  ;;  %v884_v25 = vrot.slane %v832_v13, 2  ;;  %v885_v27 = vrot.slane %v833_v50, 2 }
  0xf0   : > { %v599_v17 = vsel %vm586_vm1, %v597_v21, %v598_v15  ;;  %v995_v22 = vmul.f32 %v2745_v1, %v2523_v4  ;;  %v933_v38 = vadd.f32 %v883_v47, %v808_v41  ;;  %v1045_v24 = vsel %vm460_vm0, %v1042_v44, %v1044_v46 }
  0xf1   : > { %v647_v6 = vadd.f32 %v599_v17, %v2609_v26  ;;  %v1119_v40 = vmul.f32 %v2533_v9, %v2747_v3  ;;  %v1170_v31 = vsel %vm586_vm1, %v1167_v32, %v1169_v37  ;;  %v761_v11 = vsel %vm460_vm0, %v759_v33, %v760_v18 }
  0xf2   : > { %v955_v21 = vmul.f32 %v2743_v51, %v2545_v14  ;;  %v2782_v60 = vmul.f32 %v2745_v1, %v2533_v9  ;;  %v970_v36 = vadd.f32 %v954_v54, %v933_v38  ;;  %v1046_v44 = vrot.slane %v994_v49, 1 }
  0xf3   : > { %v684_v45 = vadd.f32 %v668_v7, %v647_v6  ;;  %v1047_v63 = vrot.slane %v995_v22, 1  ;;  %v886_v26 = vsel %vm586_vm1, %v884_v25, %v885_v27  ;;  %v2785_v0 = vunpack.c.l.bf16 %v320_v42  ;;  %v2814_v22 = vld [vmem:[%s2430_s3 + $0x3c] sm:$0xff]  }
  0xf4   : > { %v420_v32 = vmul.f32 %v2454_v34, %v2580_v62  ;;  %v546_v2 = vmul.f32 %v2456_v35, %v2580_v62  ;;  %v1095_v23 = vadd.f32 %v1045_v24, %v970_v36  ;;  %v1171_v19 = vrot.slane %v1119_v40, 2 }
  0xf5   : > { %v809_v46 = vadd.f32 %v761_v11, %v684_v45  ;;  %v709_v20 = vmul.f32 %v2499_v58, %v2709_v52  ;;  %v1172_v54 = vrot.slane %v2782_v60, 2  ;;  %v834_v28 = vmul.f32 %v2501_v59, %v2709_v52 }
  0xf6   : > { %v474_v39 = vrot.slane %v420_v32, 1  ;;  %v600_v47 = vrot.slane %v546_v2, 2  ;;  %v1220_v8 = vadd.f32 %v1170_v31, %v1095_v23  ;;  %v1048_v30 = vsel %vm460_vm0, %v1046_v44, %v1047_v63 }
  0xf7   : > { %v934_v12 = vadd.f32 %v886_v26, %v809_v46  ;;  %v762_v62 = vrot.slane %v709_v20, 1  ;;  %v887_v37 = vrot.slane %v834_v28, 2  ;;  %v996_v33 = vmul.f32 %v2523_v4, %v2785_v0 }
  0xf8   : > { %v475_v5 = vsel %vm460_vm0, %v472_v10, %v474_v39  ;;  %v601_v13 = vsel %vm586_vm1, %v598_v15, %v600_v47  ;;  %1722 = vmatmul.mubr.f32.gmra.mrb[2].mxu0 %v1220_v8  ;;  %v669_v7 = vmul.f32 %v2488_v53, %v2707_v48  ;;  %v1121_v49 = vmul.f32 %v2533_v9, %v2785_v0 }
  0xf9   : > { %v971_v50 = vadd.f32 %v955_v21, %v934_v12  ;;  %v522_v41 = vadd.f32 %v475_v5, %v2510_v61  ;;  %v397_v10 = vmul.f32 %v2446_v29, %v2641_v57  ;;  %v476_v15 = vrot.slane %v2695_v43, 1  ;;  %v371_v57 = vld [vmem:[%s2430_s3 + $0x3c] sm:$0xe] }
  0xfa   : > { %v1173_v17 = vsel %vm586_vm1, %v1171_v19, %v1172_v54  ;;  %v1049_v25 = vrot.slane %v996_v33, 1  ;;  %v602_v61 = vrot.slane %v2725_v56, 2  ;;  %v956_v6 = vmul.f32 %v2745_v1, %v2545_v14 }
  0xfb   : > { %v1096_v38 = vadd.f32 %v1048_v30, %v971_v50  ;;  %v648_v24 = vadd.f32 %v601_v13, %v522_v41  ;;  %v763_v40 = vsel %vm460_vm0, %v760_v18, %v762_v62  ;;  %v888_v42 = vsel %vm586_vm1, %v885_v27, %v887_v37 }
  0xfc   : > { %v2821_v31 = vunpack.c.l.bf16 %v276_v55  ;;  %v2826_v43 = vmul.f32 %v2454_v34, %v2651_v16  ;;  %v1174_v60 = vrot.slane %v1121_v49, 2  ;;  %v2829_v56 = vunpack.c.l.bf16 %v2814_v22 }
  0xfd   : > { %v1221_v11 = vadd.f32 %v1173_v17, %v1096_v38  ;;  %v685_v21 = vadd.f32 %v669_v7, %v648_v24  ;;  %v1050_v36 = vsel %vm460_vm0, %v1047_v63, %v1049_v25  ;;  %v2832_v45 = vunpack.c.h.bf16 %v276_v55  ;;  %v323_v7 = vld [vmem:[%s2430_s3 + $0x44] sm:$0x1] }
  0xfe   : > { %v477_v18 = vrot.slane %v2826_v43, 1  ;;  %v548_v27 = vmul.f32 %v2456_v35, %v2651_v16  ;;  %v2837_v26 = vunpack.c.l.bf16 %v371_v57  ;;  %v710_v32 = vmul.f32 %v2743_v51, %v2499_v58 }
  0xff   : > { %1724 = vmatprep.mubr.f32.mxu0 %v1221_v11  ;;  %v810_v44 = vadd.f32 %v763_v40, %v685_v21  ;;  %v2843_v2 = vmul.f32 %v2745_v1, %v2499_v58  ;;  %v670_v46 = vmul.f32 %v2743_v51, %v2488_v53  ;;  %v835_v16 = vmul.f32 %v2501_v59, %v2747_v3 }
 0x100   : > { %v478_v63 = vsel %vm460_vm0, %v476_v15, %v477_v18  ;;  %v603_v23 = vrot.slane %v548_v27, 2  ;;  %v764_v39 = vrot.slane %v710_v32, 1  ;;  %v1175_v28 = vsel %vm586_vm1, %v1172_v54, %v1174_v60 }
 0x101   : > { %v935_v19 = vadd.f32 %v888_v42, %v810_v44  ;;  %v523_v20 = vadd.f32 %v478_v63, %v397_v10  ;;  %v765_v47 = vrot.slane %v2843_v2, 1  ;;  %v2855_v12 = vmul.f32 %v2745_v1, %v2501_v59 }
 0x102   : > { %v604_v8 = vsel %vm586_vm1, %v602_v61, %v603_v23  ;;  %v889_v30 = vrot.slane %v835_v16, 2  ;;  %v997_v37 = vmul.f32 %v2523_v4, %v2829_v56  ;;  %v2863_v50 = vmul.f32 %v2523_v4, %v2832_v45 }
 0x103   : > { %v972_v62 = vadd.f32 %v956_v6, %v935_v19  ;;  %v649_v5 = vadd.f32 %v604_v8, %v523_v20  ;;  %v766_v13 = vsel %vm460_vm0, %v764_v39, %v765_v47  ;;  %v890_v33 = vrot.slane %v2855_v12, 2 }
 0x104   : > { %v1122_v54 = vmul.f32 %v2533_v9, %v2837_v26  ;;  %v2869_v41 = vmul.f32 %v2533_v9, %v2832_v45  ;;  %v398_v49 = vmul.f32 %v2446_v29, %v2707_v48  ;;  %v2876_v15 = vmul.f32 %v2745_v1, %v2446_v29 }
 0x105   : > { %v1097_v55 = vadd.f32 %v1050_v36, %v972_v62  ;;  %v686_v10 = vadd.f32 %v670_v46, %v649_v5  ;;  %v891_v17 = vsel %vm586_vm1, %v889_v30, %v890_v33  ;;  %v1051_v25 = vrot.slane %v997_v37, 1 }
 0x106   : > { %v1052_v61 = vrot.slane %v2863_v50, 1  ;;  %v957_v6 = vmul.f32 %v2545_v14, %v2821_v31  ;;  %v2882_v40 = vunpack.c.l.bf16 %v323_v7  ;;  %v1176_v42 = vrot.slane %v1122_v54, 2 }
 0x107   : > { %v1222_v38 = vadd.f32 %v1175_v28, %v1097_v55  ;;  %v811_v24 = vadd.f32 %v766_v13, %v686_v10  ;;  %v1177_v48 = vrot.slane %v2869_v41, 2  ;;  %v423_v57 = vmul.f32 %v2454_v34, %v2709_v52 }
 0x108   : > { %v549_v43 = vmul.f32 %v2456_v35, %v2709_v52  ;;  %v2891_v11 = vmul.f32 %v2454_v34, %v2829_v56  ;;  %v2895_v21 = vmul.f32 %v2456_v35, %v2837_v26  ;;  %v712_v36 = vmul.f32 %v2499_v58, %v2785_v0 }
 0x109   : > { %1725 = vmatmul.mubr.f32.gmra.mrb[4].mxu0 %v1222_v38  ;;  %v936_v60 = vadd.f32 %v891_v17, %v811_v24  ;;  %v1053_v27 = vsel %vm460_vm0, %v1051_v25, %v1052_v61  ;;  %v479_v44 = vrot.slane %v423_v57, 1  ;;  %v837_v52 = vmul.f32 %v2501_v59, %v2785_v0  ;;  %v372_v38 = vld [vmem:[%s2430_s3 + $0x48] sm:$0xe] }
 0x10a   : > { %v605_v32 = vrot.slane %v549_v43, 2  ;;  %v2904_v2 = vmul.f32 %v2446_v29, %v2821_v31  ;;  %v2907_v46 = vunpack.c.h.bf16 %v2814_v22  ;;  %v999_v16 = vmul.f32 %v2523_v4, %v2882_v40  ;;  %v1648_v22 = vld [vmem:[%s2430_s3 + $0x48] sm:$0xff]  }
 0x10b   : > { %v973_v63 = vadd.f32 %v957_v6, %v936_v60  ;;  %v1178_v19 = vsel %vm586_vm1, %v1176_v42, %v1177_v48  ;;  %v480_v20 = vsel %vm460_vm0, %v477_v18, %v479_v44  ;;  %v767_v28 = vrot.slane %v712_v36, 1 }
 0x10c   : > { %v606_v39 = vsel %vm586_vm1, %v603_v23, %v605_v32  ;;  %v524_v12 = vadd.f32 %v480_v20, %v398_v49  ;;  %v671_v30 = vmul.f32 %v2745_v1, %v2488_v53  ;;  %v1124_v62 = vmul.f32 %v2533_v9, %v2882_v40 }
 0x10d   : > { %v1098_v8 = vadd.f32 %v1053_v27, %v973_v63  ;;  %v486_v5 = vrot.slane %v2891_v11, 1  ;;  %v612_v13 = vrot.slane %v2895_v21, 2  ;;  %v2923_v18 = vmul.f32 %v2446_v29, %v2907_v46 }
 0x10e   : > { %v892_v23 = vrot.slane %v837_v52, 2  ;;  %v650_v50 = vadd.f32 %v606_v39, %v524_v12  ;;  %v958_v54 = vmul.f32 %v2545_v14, %v2907_v46  ;;  %v1054_v41 = vrot.slane %v999_v16, 1 }
 0x10f   : > { %v1223_v37 = vadd.f32 %v1178_v19, %v1098_v8  ;;  %v768_v7 = vsel %vm460_vm0, %v765_v47, %v767_v28  ;;  %v2928_v49 = vunpack.c.l.bf16 %v1648_v22  ;;  %v424_v55 = vmul.f32 %v2743_v51, %v2454_v34 }
 0x110   : > { %v2934_v10 = vmul.f32 %v2745_v1, %v2454_v34  ;;  %v687_v17 = vadd.f32 %v671_v30, %v650_v50  ;;  %v1179_v25 = vrot.slane %v1124_v62, 2  ;;  %v399_v24 = vmul.f32 %v2743_v51, %v2446_v29 }
 0x111   : > { %1727 = vmatprep.mubr.f32.mxu0 %v1223_v37  ;;  %v550_v6 = vmul.f32 %v2456_v35, %v2747_v3  ;;  %v893_v47 = vsel %vm586_vm1, %v890_v33, %v892_v23  ;;  %v481_v42 = vrot.slane %v424_v55, 1  ;;  %v2945_v43 = vmul.f32 %v2745_v1, %v2456_v35 }
 0x112   : > { %v482_v57 = vrot.slane %v2934_v10, 1  ;;  %v812_v60 = vadd.f32 %v768_v7, %v687_v17  ;;  %v1055_v36 = vsel %vm460_vm0, %v1052_v61, %v1054_v41  ;;  %v2948_v27 = vunpack.c.h.bf16 %v1648_v22 }
 0x113   : > { %v607_v44 = vrot.slane %v550_v6, 2  ;;  %v2950_v32 = vunpack.c.l.bf16 %v372_v38  ;;  %v2954_v51 = vmul.f32 %v2928_v49, %v2446_v29  ;;  %v608_v33 = vrot.slane %v2945_v43, 2 }
 0x114   : > { %v483_v3 = vsel %vm460_vm0, %v481_v42, %v482_v57  ;;  %v937_v52 = vadd.f32 %v893_v47, %v812_v60  ;;  %v1180_v1 = vsel %vm586_vm1, %v1177_v48, %v1179_v25  ;;  %v672_v61 = vmul.f32 %v2488_v53, %v2821_v31 }
 0x115   : > { %v525_v63 = vadd.f32 %v483_v3, %v399_v24  ;;  %v430_v16 = vmul.f32 %v2928_v49, %v2454_v34  ;;  %v609_v19 = vsel %vm586_vm1, %v607_v44, %v608_v33  ;;  %v713_v20 = vmul.f32 %v2499_v58, %v2829_v56 }
 0x116   : > { %v2968_v39 = vmul.f32 %v2499_v58, %v2832_v45  ;;  %v974_v28 = vadd.f32 %v958_v54, %v937_v52  ;;  %v2972_v48 = vmul.f32 %v2948_v27, %v2454_v34  ;;  %v838_v31 = vmul.f32 %v2501_v59, %v2837_v26  ;;  %v326_v54 = vld [vmem:[%s2430_s3 + $0x50] sm:$0x1] }
 0x117   : > { %v651_v8 = vadd.f32 %v609_v19, %v525_v63  ;;  %v2978_v12 = vmul.f32 %v2456_v35, %v2950_v32  ;;  %v769_v30 = vrot.slane %v713_v20, 1  ;;  %v839_v62 = vmul.f32 %v2501_v59, %v2832_v45 }
 0x118   : > { %v770_v56 = vrot.slane %v2968_v39, 1  ;;  %v1099_v22 = vadd.f32 %v1055_v36, %v974_v28  ;;  %v894_v37 = vrot.slane %v838_v31, 2  ;;  %v959_v50 = vmul.f32 %v2928_v49, %v2545_v14 }
 0x119   : > { %v688_v23 = vadd.f32 %v672_v61, %v651_v8  ;;  %v895_v26 = vrot.slane %v839_v62, 2  ;;  %v1000_v7 = vmul.f32 %v2928_v49, %v2523_v4  ;;  %v2991_v55 = vmul.f32 %v2948_v27, %v2523_v4 }
 0x11a   : > { %v771_v41 = vsel %vm460_vm0, %v769_v30, %v770_v56  ;;  %v1224_v10 = vadd.f32 %v1180_v1, %v1099_v22  ;;  %v1125_v25 = vmul.f32 %v2533_v9, %v2950_v32  ;;  %v2997_v38 = vmul.f32 %v2948_v27, %v2533_v9 }
 0x11b   : > { %v813_v17 = vadd.f32 %v771_v41, %v688_v23  ;;  %v896_v24 = vsel %vm586_vm1, %v894_v37, %v895_v26  ;;  %v1056_v6 = vrot.slane %v1000_v7, 1  ;;  %v1057_v47 = vrot.slane %v2991_v55, 1 }
 0x11c   : > { %v3001_v42 = vunpack.c.l.bf16 %v326_v54  ;;  %1728 = vmatmul.mubr.f32.gmra.mrb[6].mxu0 %v1224_v10  ;;  %v1181_v60 = vrot.slane %v1125_v25, 2  ;;  %v1182_v36 = vrot.slane %v2997_v38, 2  ;;  %v426_v44 = vmul.f32 %v2454_v34, %v2785_v0  ;;  %v327_v25 = vld [vmem:[%s2430_s3 + $0x54] sm:$0xff]  }
 0x11d   : > { %v938_v43 = vadd.f32 %v896_v24, %v813_v17  ;;  %v491_v3 = vrot.slane %v430_v16, 1  ;;  %v1058_v52 = vsel %vm460_vm0, %v1056_v6, %v1057_v47  ;;  %v552_v1 = vmul.f32 %v2456_v35, %v2785_v0  ;;  %v280_v17 = vld [vmem:[%s2430_s3 + $0x54] sm:$0xff]  }
 0x11e   : > { %v715_v63 = vmul.f32 %v2499_v58, %v2882_v40  ;;  %v492_v61 = vrot.slane %v2972_v48, 1  ;;  %v484_v20 = vrot.slane %v426_v44, 1  ;;  %v840_v39 = vmul.f32 %v2501_v59, %v2882_v40 }
 0x11f   : > { %v975_v19 = vadd.f32 %v959_v50, %v938_v43  ;;  %v3018_v16 = vmul.f32 %v2948_v27, %v2446_v29  ;;  %v1183_v28 = vsel %vm586_vm1, %v1181_v60, %v1182_v36  ;;  %v610_v8 = vrot.slane %v552_v1, 2  ;;  %v373_v60 = vld [vmem:[%s2430_s3 + $0x54] sm:$0xe] }
 0x120   : > { %v772_v0 = vrot.slane %v715_v63, 1  ;;  %v485_v30 = vsel %vm460_vm0, %v482_v57, %v484_v20  ;;  %v897_v62 = vrot.slane %v840_v39, 2  ;;  %v1002_v22 = vmul.f32 %v2523_v4, %v3001_v42 }
 0x121   : > { %v1100_v31 = vadd.f32 %v1058_v52, %v975_v19  ;;  %v526_v23 = vadd.f32 %v485_v30, %v2876_v15  ;;  %v611_v29 = vsel %vm586_vm1, %v608_v33, %v610_v8  ;;  %v673_v37 = vmul.f32 %v2488_v53, %v2907_v46 }
 0x122   : > { %v1127_v50 = vmul.f32 %v2533_v9, %v3001_v42  ;;  %v493_v57 = vsel %vm460_vm0, %v491_v3, %v492_v61  ;;  %v617_v54 = vrot.slane %v2978_v12, 2  ;;  %v674_v41 = vmul.f32 %v2928_v49, %v2488_v53 }
 0x123   : > { %v1225_v7 = vadd.f32 %v1183_v28, %v1100_v31  ;;  %v716_v15 = vmul.f32 %v2928_v49, %v2499_v58  ;;  %v841_v46 = vmul.f32 %v2501_v59, %v2950_v32  ;;  %v652_v33 = vadd.f32 %v611_v29, %v526_v23 }
 0x124   : > { %v960_v10 = vmul.f32 %v2948_v27, %v2545_v14  ;;  %v773_v24 = vsel %vm460_vm0, %v770_v56, %v772_v0  ;;  %v898_v6 = vsel %vm586_vm1, %v895_v26, %v897_v62  ;;  %v1059_v43 = vrot.slane %v1002_v22, 1 }
 0x125   : > { %1730 = vmatprep.mubr.f32.mxu1 %v1225_v7  ;;  %v428_v44 = vmul.f32 %v2454_v34, %v2832_v45  ;;  %v689_v49 = vadd.f32 %v673_v37, %v652_v33  ;;  %v1184_v3 = vrot.slane %v1127_v50, 2  ;;  %v554_v32 = vmul.f32 %v2456_v35, %v2832_v45  ;;  %v329_v37 = vld [vmem:[%s2430_s3 + $0x5c] sm:$0x1] }
 0x126   : > { %v3055_v52 = vmul.f32 %v2948_v27, %v2499_v58  ;;  %v3057_v1 = vunpack.c.l.bf16 %v327_v25  ;;  %v3059_v63 = vunpack.c.h.bf16 %v280_v17  ;;  %v3063_v26 = vmul.f32 %v2948_v27, %v2501_v59 }
 0x127   : > { %v487_v56 = vrot.slane %v428_v44, 1  ;;  %v814_v19 = vadd.f32 %v773_v24, %v689_v49  ;;  %v3065_v20 = vunpack.c.l.bf16 %v373_v60  ;;  %v613_v39 = vrot.slane %v554_v32, 2 }
 0x128   : > { %v774_v28 = vrot.slane %v716_v15, 1  ;;  %v775_v8 = vrot.slane %v3055_v52, 1  ;;  %v899_v0 = vrot.slane %v841_v46, 2  ;;  %v900_v31 = vrot.slane %v3063_v26, 2 }
 0x129   : > { %v488_v45 = vsel %vm460_vm0, %v486_v5, %v487_v56  ;;  %v3073_v30 = vadd.f32 %v493_v57, %v2954_v51  ;;  %v939_v62 = vadd.f32 %v898_v6, %v814_v19  ;;  %v614_v23 = vsel %vm586_vm1, %v612_v13, %v613_v39 }
 0x12a   : > { %v527_v22 = vadd.f32 %v488_v45, %v2904_v2  ;;  %v1060_v11 = vsel %vm460_vm0, %v1057_v47, %v1059_v43  ;;  %v3082_v5 = vunpack.c.l.bf16 %v280_v17  ;;  %v1003_v29 = vmul.f32 %v2523_v4, %v3057_v1  ;;  %v3125_v45 = vld [vmem:[#allocation4] ss:$0 sm:$0xff] }
 0x12b   : > { %v3088_v51 = vmul.f32 %v2523_v4, %v3059_v63  ;;  %v976_v50 = vadd.f32 %v960_v10, %v939_v62  ;;  %v1128_v21 = vmul.f32 %v2533_v9, %v3065_v20  ;;  %v3095_v13 = vmul.f32 %v2533_v9, %v3059_v63 }
 0x12c   : > { %v653_v2 = vadd.f32 %v614_v23, %v527_v22  ;;  %v1185_v55 = vsel %vm586_vm1, %v1182_v36, %v1184_v3  ;;  %v776_v47 = vsel %vm460_vm0, %v774_v28, %v775_v8  ;;  %v901_v57 = vsel %vm586_vm1, %v899_v0, %v900_v31  ;;  %v1649_v23 = vld [vmem:[%s2430_s3 + $0x60] sm:$0xff]  }
 0x12d   : > { %v1061_v7 = vrot.slane %v1003_v29, 1  ;;  %v1101_v15 = vadd.f32 %v1060_v11, %v976_v50  ;;  %v1062_v33 = vrot.slane %v3088_v51, 1  ;;  %v3103_v10 = vunpack.c.l.bf16 %v329_v37  ;;  %v3135_v11 = vld [vmem:[#allocation4 + $0x1] ss:$0 sm:$0xff] }
 0x12e   : > { %v690_v46 = vadd.f32 %v674_v41, %v653_v2  ;;  %v961_v17 = vmul.f32 %v2545_v14, %v3082_v5  ;;  %v3107_v24 = vunpack.c.h.bf16 %v327_v25  ;;  %v429_v38 = vmul.f32 %v2454_v34, %v2882_v40 }
 0x12f   : > { %v555_v36 = vmul.f32 %v2456_v35, %v2882_v40  ;;  %v1226_v6 = vadd.f32 %v1185_v55, %v1101_v15  ;;  %v1186_v60 = vrot.slane %v1128_v21, 2  ;;  %v1187_v41 = vrot.slane %v3095_v13, 2  ;;  %v3146_v21 = vld [vmem:[%s2430_s3 + $0x60] sm:$0xe] }
 0x130   : > { %v815_v43 = vadd.f32 %v776_v47, %v690_v46  ;;  %v489_v44 = vrot.slane %v429_v38, 1  ;;  %v718_v3 = vmul.f32 %v2499_v58, %v3001_v42  ;;  %v843_v25 = vmul.f32 %v2501_v59, %v3001_v42  ;;  %v3153_v47 = vld [vmem:[#allocation4 + $0x2] ss:$0 sm:$0xff] }
 0x131   : > { %v615_v49 = vrot.slane %v555_v36, 2  ;;  %1731 = vmatmul.mubr.f32.vlgmr.msra.gmra.mrb[0].mxu1 %v1226_v6  ;;  %v1063_v34 = vsel %vm460_vm0, %v1061_v7, %v1062_v33  ;;  %v1005_v35 = vmul.f32 %v2523_v4, %v3103_v10  ;;  %v1130_v40 = vmul.f32 %v2533_v9, %v3103_v10  ;;  %v3173_v6 = vld [vmem:[#allocation4 + $0x3] ss:$0 sm:$0xff] }
 0x132   : > { %v940_v32 = vadd.f32 %v901_v57, %v815_v43  ;;  %v490_v52 = vsel %vm460_vm0, %v487_v56, %v489_v44  ;;  %v777_v19 = vrot.slane %v718_v3, 1  ;;  %v902_v28 = vrot.slane %v843_v25, 2 }
 0x133   : > { %v616_v26 = vsel %vm586_vm1, %v613_v39, %v615_v49  ;;  %v3129_v0 = vmul.f32 %v3125_v45, %v3082_v5  ;;  %v528_v22 = vadd.f32 %v490_v52, %v2923_v18  ;;  %v675_v4 = vmul.f32 %v2948_v27, %v2488_v53 }
 0x134   : > { %v977_v62 = vadd.f32 %v961_v17, %v940_v32  ;;  %v3139_v56 = vmul.f32 %v3135_v11, %v3057_v1  ;;  %v1188_v39 = vsel %vm586_vm1, %v1186_v60, %v1187_v41  ;;  %v962_v29 = vmul.f32 %v2545_v14, %v3107_v24 }
 0x135   : > { %v1064_v51 = vrot.slane %v1005_v35, 1  ;;  %v654_v50 = vadd.f32 %v616_v26, %v528_v22  ;;  %v778_v18 = vsel %vm460_vm0, %v775_v8, %v777_v19  ;;  %v1189_v2 = vrot.slane %v1130_v40, 2  ;;  %v3203_v26 = vld [vmem:[#allocation4 + $0x8] ss:$0 sm:$0xff] }
 0x136   : > { %v1102_v37 = vadd.f32 %v1063_v34, %v977_v62  ;;  %v903_v53 = vsel %vm586_vm1, %v900_v31, %v902_v28  ;;  %v3149_v13 = vunpack.c.l.bf16 %v1649_v23  ;;  %v3151_v55 = vunpack.c.h.bf16 %v1649_v23 }
 0x137   : > { %v3157_v57 = vmul.f32 %v3153_v47, %v2948_v27  ;;  %v691_v15 = vadd.f32 %v675_v4, %v654_v50  ;;  %v719_v8 = vmul.f32 %v2499_v58, %v3057_v1  ;;  %v3163_v46 = vmul.f32 %v2499_v58, %v3059_v63 }
 0x138   : > { %v1227_v7 = vadd.f32 %v1188_v39, %v1102_v37  ;;  %v384_v31 = vunpack.c.l.bf16 %v3146_v21  ;;  %v844_v38 = vmul.f32 %v2501_v59, %v3065_v20  ;;  %v3171_v27 = vmul.f32 %v2501_v59, %v3059_v63 }
 0x139   : > { %v618_v17 = vrot.slane %v3157_v57, 2  ;;  %v816_v36 = vadd.f32 %v778_v18, %v691_v15  ;;  %v676_v58 = vmul.f32 %v3173_v6, %v3082_v5  ;;  %v779_v1 = vrot.slane %v719_v8, 1  ;;  %v332_v5 = vld [vmem:[%s2430_s3 + $0x68] sm:$0x1]  ;;  %v3228_v15 = vld [vmem:[#allocation4 + $0x4] ss:$0 sm:$0xff] }
 0x13a   : > { %1733 = vmatprep.mubr.f32.mxu1 %v1227_v7  ;;  %v780_v43 = vrot.slane %v3163_v46, 1  ;;  %v1065_v60 = vsel %vm460_vm0, %v1062_v33, %v1064_v51  ;;  %v904_v49 = vrot.slane %v844_v38, 2  ;;  %v905_v59 = vrot.slane %v3171_v27, 2  ;;  %v3192_v33 = vld [vmem:[#allocation4 + $0x7] ss:$0 sm:$0xff] }
 0x13b   : > { %v619_v44 = vsel %vm586_vm1, %v617_v54, %v618_v17  ;;  %v941_v3 = vadd.f32 %v903_v53, %v816_v36  ;;  %v1190_v25 = vsel %vm586_vm1, %v1187_v41, %v1189_v2  ;;  %v963_v12 = vmul.f32 %v3149_v13, %v2545_v14 }
 0x13c   : > { %v655_v32 = vadd.f32 %v619_v44, %v3073_v30  ;;  %v781_v34 = vsel %vm460_vm0, %v779_v1, %v780_v43  ;;  %v906_v35 = vsel %vm586_vm1, %v904_v49, %v905_v59  ;;  %v1006_v54 = vmul.f32 %v3192_v33, %v3149_v13 }
 0x13d   : > { %v3198_v41 = vmul.f32 %v3192_v33, %v3151_v55  ;;  %v978_v30 = vadd.f32 %v962_v29, %v941_v3  ;;  %v1131_v52 = vmul.f32 %v2533_v9, %v384_v31  ;;  %v3207_v14 = vmul.f32 %v3203_v26, %v3151_v55 }
 0x13e   : > { %v692_v40 = vadd.f32 %v676_v58, %v655_v32  ;;  %v1066_v19 = vrot.slane %v1006_v54, 1  ;;  %v3210_v62 = vunpack.c.l.bf16 %v332_v5  ;;  %v432_v22 = vmul.f32 %v3135_v11, %v3001_v42  ;;  %v284_v5 = vld [vmem:[%s2430_s3 + $0x6c] sm:$0xff]  }
 0x13f   : > { %v1067_v28 = vrot.slane %v3198_v41, 1  ;;  %v1103_v4 = vadd.f32 %v1065_v60, %v978_v30  ;;  %v1191_v39 = vrot.slane %v1131_v52, 2  ;;  %v1192_v29 = vrot.slane %v3207_v14, 2 }
 0x140   : > { %v817_v23 = vadd.f32 %v781_v34, %v692_v40  ;;  %v496_v9 = vrot.slane %v3139_v56, 1  ;;  %v559_v51 = vmul.f32 %v3153_v47, %v3065_v20  ;;  %v494_v37 = vrot.slane %v432_v22, 1  ;;  %v375_v40 = vld [vmem:[%s2430_s3 + $0x6c] sm:$0xe] }
 0x141   : > { %v558_v50 = vmul.f32 %v3153_v47, %v3001_v42  ;;  %v1228_v18 = vadd.f32 %v1190_v25, %v1103_v4  ;;  %v1068_v53 = vsel %vm460_vm0, %v1066_v19, %v1067_v28  ;;  %v677_v57 = vmul.f32 %v3173_v6, %v3107_v24  ;;  %v3232_v42 = vld [vmem:[#allocation4 + $0x5] ss:$0 sm:$0xff] }
 0x142   : > { %v942_v2 = vadd.f32 %v906_v35, %v817_v23  ;;  %v495_v56 = vsel %vm460_vm0, %v492_v61, %v494_v37  ;;  %v721_v20 = vmul.f32 %v3228_v15, %v3103_v10  ;;  %v846_v8 = vmul.f32 %v3232_v42, %v3103_v10  ;;  %v3259_v35 = vld [vmem:[%s2430_s3 + $0x6c] sm:$0xff]  }
 0x143   : > { %v620_v7 = vrot.slane %v558_v50, 2  ;;  %1734 = vmatmul.mubr.f32.gmra.mrb[2].mxu1 %v1228_v18  ;;  %v1193_v48 = vsel %vm586_vm1, %v1191_v39, %v1192_v29  ;;  %v530_v61 = vadd.f32 %v495_v56, %v3018_v16  ;;  %v1008_v38 = vmul.f32 %v3192_v33, %v3210_v62 }
 0x144   : > { %v979_v46 = vadd.f32 %v963_v12, %v942_v2  ;;  %v782_v58 = vrot.slane %v721_v20, 1  ;;  %v907_v1 = vrot.slane %v846_v8, 2  ;;  %v1133_v60 = vmul.f32 %v3203_v26, %v3210_v62 }
 0x145   : > { %v621_v36 = vsel %vm586_vm1, %v618_v17, %v620_v7  ;;  %v622_v44 = vrot.slane %v559_v51, 2  ;;  %v3247_v49 = vmul.f32 %v3125_v45, %v3107_v24  ;;  %v678_v16 = vmul.f32 %v3173_v6, %v3149_v13  ;;  %v3261_v45 = vld [vmem:[#allocation4 + $0x6] ss:$0 sm:$0xff] }
 0x146   : > { %v1104_v3 = vadd.f32 %v1068_v53, %v979_v46  ;;  %v656_v25 = vadd.f32 %v621_v36, %v530_v61  ;;  %v722_v32 = vmul.f32 %v3228_v15, %v3149_v13  ;;  %v847_v17 = vmul.f32 %v3232_v42, %v384_v31  ;;  %v335_v46 = vld [vmem:[%s2430_s3 + $0x74] sm:$0x1] }
 0x147   : > { %v783_v34 = vsel %vm460_vm0, %v780_v43, %v782_v58  ;;  %v964_v54 = vmul.f32 %v3261_v45, %v3151_v55  ;;  %v1069_v30 = vrot.slane %v1008_v38, 1  ;;  %v908_v21 = vsel %vm586_vm1, %v905_v59, %v907_v1 }
 0x148   : > { %v1229_v12 = vadd.f32 %v1193_v48, %v1104_v3  ;;  %v693_v24 = vadd.f32 %v677_v57, %v656_v25  ;;  %v1194_v13 = vrot.slane %v1133_v60, 2  ;;  %v434_v31 = vmul.f32 %v3135_v11, %v3059_v63 }
 0x149   : > { %v560_v43 = vmul.f32 %v3153_v47, %v3059_v63  ;;  %v363_v19 = vunpack.c.l.bf16 %v3259_v35  ;;  %v364_v22 = vunpack.c.h.bf16 %v284_v5  ;;  %v723_v4 = vmul.f32 %v3228_v15, %v3151_v55 }
 0x14a   : > { %1736 = vmatprep.mubr.f32.mxu1 %v1229_v12  ;;  %v818_v52 = vadd.f32 %v783_v34, %v693_v24  ;;  %v385_v23 = vunpack.c.l.bf16 %v375_v40  ;;  %v497_v27 = vrot.slane %v434_v31, 1  ;;  %v848_v59 = vmul.f32 %v3232_v42, %v3151_v55  ;;  %v1426_v24 = vld [vmem:[#allocation9] sm:$0xff] }
 0x14b   : > { %v623_v39 = vrot.slane %v560_v43, 2  ;;  %v784_v51 = vrot.slane %v722_v32, 1  ;;  %v909_v37 = vrot.slane %v847_v17, 2  ;;  %v785_v18 = vrot.slane %v723_v4, 1 }
 0x14c   : > { %v943_v50 = vadd.f32 %v908_v21, %v818_v52  ;;  %v679_v63 = vmul.f32 %v3173_v6, %v3151_v55  ;;  %v1070_v2 = vsel %vm460_vm0, %v1067_v28, %v1069_v30  ;;  %v498_v53 = vsel %vm460_vm0, %v496_v9, %v497_v27 }
 0x14d   : > { %v624_v57 = vsel %vm586_vm1, %v622_v44, %v623_v39  ;;  %v1195_v7 = vsel %vm586_vm1, %v1192_v29, %v1194_v13  ;;  %v304_v20 = vunpack.c.l.bf16 %v284_v5  ;;  %v531_v8 = vadd.f32 %v498_v53, %v3129_v0 }
 0x14e   : > { %v980_v56 = vadd.f32 %v964_v54, %v943_v50  ;;  %v910_v48 = vrot.slane %v848_v59, 2  ;;  %v1009_v55 = vmul.f32 %v3192_v33, %v363_v19  ;;  %v1010_v6 = vmul.f32 %v3192_v33, %v364_v22 }
 0x14f   : > { %v1134_v41 = vmul.f32 %v3203_v26, %v385_v23  ;;  %v657_v9 = vadd.f32 %v624_v57, %v531_v8  ;;  %v786_v61 = vsel %vm460_vm0, %v784_v51, %v785_v18  ;;  %v435_v14 = vmul.f32 %v3135_v11, %v3103_v10 }
 0x150   : > { %v1105_v28 = vadd.f32 %v1070_v2, %v980_v56  ;;  %v1135_v29 = vmul.f32 %v3203_v26, %v364_v22  ;;  %v365_v38 = vunpack.c.l.bf16 %v335_v46  ;;  %v561_v0 = vmul.f32 %v3153_v47, %v3103_v10 }
 0x151   : > { %v724_v36 = vmul.f32 %v3228_v15, %v3210_v62  ;;  %v694_v1 = vadd.f32 %v678_v16, %v657_v9  ;;  %v499_v60 = vrot.slane %v435_v14, 1  ;;  %v849_v44 = vmul.f32 %v3232_v42, %v3210_v62 }
 0x152   : > { %v1230_v58 = vadd.f32 %v1195_v7, %v1105_v28  ;;  %v911_v3 = vsel %vm586_vm1, %v909_v37, %v910_v48  ;;  %v1071_v25 = vrot.slane %v1009_v55, 1  ;;  %v1072_v32 = vrot.slane %v1010_v6, 1 }
 0x153   : > { %v625_v11 = vrot.slane %v561_v0, 2  ;;  %v819_v17 = vadd.f32 %v786_v61, %v694_v1  ;;  %v965_v34 = vmul.f32 %v3261_v45, %v304_v20  ;;  %v500_v10 = vsel %vm460_vm0, %v497_v27, %v499_v60 }
 0x154   : > { %1737 = vmatmul.mubr.f32.gmra.mrb[4].mxu1 %v1230_v58  ;;  %v787_v47 = vrot.slane %v724_v36, 1  ;;  %v1196_v5 = vrot.slane %v1134_v41, 2  ;;  %v1197_v15 = vrot.slane %v1135_v29, 2  ;;  %v532_v16 = vadd.f32 %v500_v10, %v3247_v49 }
 0x155   : > { %v626_v12 = vsel %vm586_vm1, %v623_v39, %v625_v11  ;;  %v944_v62 = vadd.f32 %v911_v3, %v819_v17  ;;  %v912_v42 = vrot.slane %v849_v44, 2  ;;  %v1011_v54 = vmul.f32 %v3192_v33, %v365_v38 }
 0x156   : > { %v1073_v30 = vsel %vm460_vm0, %v1071_v25, %v1072_v32  ;;  %v305_v40 = vunpack.c.h.bf16 %v3259_v35  ;;  %v658_v21 = vadd.f32 %v626_v12, %v532_v16  ;;  %v2165_v13 = vmov 0  }
 0x157   : > { %1902 = vset.pattern.permute.xlu0 %v2165_v13  ;;  %v981_v31 = vadd.f32 %v965_v34, %v944_v62  ;;  %v788_v43 = vsel %vm460_vm0, %v785_v18, %v787_v47  ;;  %v1136_v52 = vmul.f32 %v3203_v26, %v365_v38  ;;  %v1198_v49 = vsel %vm586_vm1, %v1196_v5, %v1197_v15 }
 0x158   : > { %1429 = vperm.xlu0 %1902, %v1426_v24   ;;  %v695_v19 = vadd.f32 %v679_v63, %v658_v21  ;;  %v913_v4 = vsel %vm586_vm1, %v910_v48, %v912_v42  ;;  %v1074_v33 = vrot.slane %v1011_v54, 1  ;;  %v966_v27 = vmul.f32 %v3261_v45, %v305_v40 }
 0x159   : > { %v1106_v22 = vadd.f32 %v1073_v30, %v981_v31  ;;  %v1199_v39 = vrot.slane %v1136_v52, 2 }
 0x15a   : > { %v820_v23 = vadd.f32 %v788_v43, %v695_v19  ;;  %v1075_v51 = vsel %vm460_vm0, %v1072_v32, %v1074_v33 }
 0x15b   : > { %v1231_v35 = vadd.f32 %v1198_v49, %v1106_v22  ;;  %v1200_v26 = vsel %vm586_vm1, %v1197_v15, %v1199_v39 }
 0x15c   : > { %v945_v59 = vadd.f32 %v913_v4, %v820_v23 }
 0x15d   : > { %1739 = vmatprep.mubr.f32.mxu1 %v1231_v35 }
 0x15e   : > { %v982_v37 = vadd.f32 %v966_v27, %v945_v59 }
 0x160   : > { %v1107_v50 = vadd.f32 %v1075_v51, %v982_v37 }
 0x162   : > { %v1232_v18 = vadd.f32 %v1200_v26, %v1107_v50 }
 0x164   : > { %1740 = vmatmul.mubr.f32.gmra.mrb[6].mxu1 %v1232_v18 }
 0x1bb   : > { %v1720_v63 = vpop.f32.mrb[0].mxu0 }
 0x1bc   : > { %v1315_v2 = vpop.f32.mrb[1].mxu0 }
 0x1bd   : > { %1394 = vxpose.xlu0.b32.start [1/16] (narrow) %v1315_v2, 8 }
 0x1c1   : > { %1395 = vxpose.xlu0.b32.cont [2/16] (narrow) %v1720_v63, 8 }
 0x1cb   : > { %v1723_v53 = vpop.f32.mrb[2].mxu0 }
 0x1cc   : > { %v1325_v57 = vpop.f32.mrb[3].mxu0 }
 0x1cd   : > { %1396 = vxpose.xlu0.b32.cont [3/16] (narrow) %v1325_v57, 8 }
 0x1d1   : > { %1397 = vxpose.xlu0.b32.cont [4/16] (narrow) %v1723_v53, 8 }
 0x1d7   : > { %v1430_v61 = vpop.permute.xlu0 %1429 }
 0x1dc   : > { %v1726_v45 = vpop.f32.mrb[4].mxu0 }
 0x1dd   : > { %v1335_v56 = vpop.f32.mrb[5].mxu0 }
 0x1de   : > { %1398 = vxpose.xlu0.b32.cont [5/16] (narrow) %v1335_v56, 8 }
 0x1e2   : > { %1399 = vxpose.xlu0.b32.cont [6/16] (narrow) %v1726_v45, 8 }
 0x1ef   : > { %v1729_v7 = vpop.f32.mrb[6].mxu0 }
 0x1f0   : > { %v1345_v20 = vpop.f32.mrb[7].mxu0 }
 0x1f1   : > { %1400 = vxpose.xlu0.b32.cont [7/16] (narrow) %v1345_v20, 8 }
 0x1f5   : > { %1401 = vxpose.xlu0.b32.cont [8/16] (narrow) %v1729_v7, 8 }
 0x204   : > { %v1732_v8 = vpop.f32.mrb[0].mxu1 }
 0x205   : > { %v1355_v46 = vpop.f32.mrb[1].mxu1 }
 0x206   : > { %1402 = vxpose.xlu0.b32.cont [9/16] (narrow) %v1355_v46, 8 }
 0x20a   : > { %1403 = vxpose.xlu0.b32.cont [10/16] (narrow) %v1732_v8, 8 }
 0x216   : > { %v1735_v48 = vpop.f32.mrb[2].mxu1 }
 0x217   : > { %v1365_v55 = vpop.f32.mrb[3].mxu1 }
 0x218   : > { %1404 = vxpose.xlu0.b32.cont [11/16] (narrow) %v1365_v55, 8 }
 0x21c   : > { %1405 = vxpose.xlu0.b32.cont [12/16] (narrow) %v1735_v48, 8 }
 0x227   : > { %v1738_v6 = vpop.f32.mrb[4].mxu1 }
 0x228   : > { %v1375_v41 = vpop.f32.mrb[5].mxu1 }
 0x229   : > { %1406 = vxpose.xlu0.b32.cont [13/16] (narrow) %v1375_v41, 8 }
 0x22d   : > { %1407 = vxpose.xlu0.b32.cont [14/16] (narrow) %v1738_v6, 8 }
 0x237   : > { %v1741_v28 = vpop.f32.mrb[6].mxu1 }
 0x238   : > { %v1385_v9 = vpop.f32.mrb[7].mxu1 }
 0x239   : > { %1408 = vxpose.xlu0.b32.cont [15/16] (narrow) %v1385_v9, 8 }
 0x23d   : > { %1409 = vxpose.xlu0.b32.end [16/16] (narrow) %v1741_v28, 8 }
 0x281   : > { %v1410_v14 = vpop.trf.xlu0 }
 0x282   : > { %v1432_v29 = vadd.f32 %v1430_v61, %v1410_v14 }
 0x284   : > { %v1433_v38 = vmax.f32 %v1432_v29, 0.0 }
 0x286   : > { %1434 = vst [vmem:[%s205_s1] sm:$0xff] %v1433_v38 }
 0x287   : > { %2066 = shalt.err (!%p2063_p10)
}
 0x288   : > { %s2067_s7 = scalar_lea.hbm %s3325_s20, 128  ;;  %s2071_s12 = scalar_lea.hbm %s3386_s4, 512 }
 0x289   : > { %p2068_p12 = scmp.ne.s32.totalorder %s3325_s20, %s2067_s7  ;;  %p2072_p0 = scmp.lt.u32.totalorder %s3325_s20, %s3386_s4 }
 0x28a   : > { %p2073_p2 = scmp.lt.u32.totalorder %s2071_s12, %s2067_s7  ;;  %p2075_p1 = scmp.lt.u32.totalorder %s2067_s7, %s3325_s20 }
 0x28b   : > { %p2069_p4 = pnand %p2068_p12, %p3421_p6 }
 0x28c   : > { %p2074_p7 = por %p2073_p2, %p2072_p0 }
 0x28d   : > { %p2070_p5 = pneg %p2069_p4 }
 0x28e   : > { %p2076_p9 = por %p2075_p1, %p2074_p7 }
 0x290   : > { %p2077_p11 = pnand %p2076_p9, %p2070_p5 }
 0x292   : > { %2080 = shalt.err (!%p2077_p11)
}
 0x293   : > { %1806 = dma.vmem_to_hbm [thread:$0]  (%p3421_p6), %s3327_s9, 128, %s3325_s20, %s1436_s18  }
 0x294 PF: > { %p1830_p13 = scmp.ge.s32.totalorder %s2157_s22, 2  ;;  %s1463_s2 = sand.u32 1, %s2129_s15  }
 0x295   : > { %p3422_p3 = scmp.ne.s32.totalorder %s3406_s30, 0  ;;  %s1464_s1 = scalar_lea.sflag [#allocation6], %s1463_s2 }
 0x297   : > { %p1819_p8 = pnand %p1830_p13, %p3422_p3 }
 0x299   : > { %2124 = dma.done.wait (!%p1819_p8), %s1464_s1, 128  }
 0x29a   : > { %2126 = vsyncadd (!%p1819_p8), %s1464_s1, 4294967168  ;;  %s19_s22 = sadd.s32 1, %s2157_s22   ;;  %s3423_s29 = sld [smem:[#allocation25_spill]] }
 0x29b   : > { %p16_p10 = scmp.ge.s32.totalorder %s19_s22, 6   ;;  %s3424_s18 = sld [smem:[#allocation21_spill]] }
 0x29c   : > { %s3425_s19 = sld [smem:[#allocation22_spill]]  ;;  %s3426_s20 = sld [smem:[#allocation23_spill]] }
 0x29d   : > { %s3427_s21 = sld [smem:[#allocation24_spill]]  ;;  %s3428_s15 = smov %s2133_s16 }
 0x29e   : > { %s3429_s16 = smov %s2137_s17  ;;  %18 = sbr.rel (!%p16_p10) target bundleno = 11 (0xb), region = 100 }
 0x2a0   : > { %s3430_s17 = smov %s3423_s29 }
 0x2a5   :  { %1469 = vsyncpa [#allocation5], 1 }
 0x2a6   :  { %1471 = vsyncpa [#allocation5 + $0x1], 1 }
 0x2a7   :  { %1472 = vsyncpa [#allocation8], 1 }
 0x2a8   :  { %1473 = vsyncpa [#allocation6], 1 }
 0x2a9   :  { %1475 = vsyncpa [#allocation6 + $0x1], 1 }
 0x2aa   :  { %1476 = vsyncmov [#allocation3] }
 0x2ad   :  { %s1477_s30 = vpop.sfrf %1476 }
 0x2ae   :  { %p1601_p6 = scmp.ne.s32.totalorder %s1477_s30, 0 }
 0x2b0   :  { %1481 = shalt.err (%p1601_p6)  }
 0x2b1   :  { %1483 = vsyncmov [#allocation3 + $0x1] }
 0x2b4   :  { %s1484_s3 = vpop.sfrf %1483 }
 0x2b5   :  { %p1602_p12 = scmp.ne.s32.totalorder %s1484_s3, 0 }
 0x2b7   :  { %1488 = shalt.err (%p1602_p12)  }

</bundles_post_ra>
